<compile_context>
chip_gen: v7x
topology: tpu7x:2x2x1
jax: 0.10.0
libtpu: 0.0.40
codegen_flags: <defaults>
</compile_context>

<pallas_src>
import math
import functools

import jax
import jax.numpy as jnp
from jax import lax
from jax.experimental import pallas as pl
from jax.experimental.pallas import tpu as pltpu


# ----------------------------- kernel helpers -----------------------------

def _layernorm(t, g, b, eps=1e-6):
    mean = jnp.mean(t, axis=-1, keepdims=True)
    c = t - mean
    var = jnp.mean(c * c, axis=-1, keepdims=True)
    return c * lax.rsqrt(var + eps) * g + b


def _rmsnorm(t, g, scale_dim):
    # PyTorch: F.normalize(x, dim=-1) * g * sqrt(dim); F.normalize eps=1e-12.
    # 1/max(||t||,1e-12) == rsqrt(max(sum(t^2),1e-24))  (EUP rsqrt, no divide)
    ss = jnp.sum(t * t, axis=-1, keepdims=True)
    inv = lax.rsqrt(jnp.maximum(ss, 1e-24))
    return t * inv * g * math.sqrt(scale_dim)


# ------------------------------ Pallas kernel ------------------------------

def decoder_block_kernel(
    x_ref,
    ln1_g_ref, ln1_b_ref,
    wqkv_ref, bqkv_ref,
    gq_ref, gk_ref,
    wo_ref, bo_ref, go_ref,
    ln2_g_ref, ln2_b_ref,
    w1_ref, b1_ref, w2_ref, b2_ref,
    out_ref,
    ctx_ref,                                    # VMEM scratch (M, H) f32
    *, block_batch, seq_len, num_head, dim_head,
):
    M, D = x_ref.shape                          # M = block_batch * seq_len
    H = num_head * dim_head
    bf16 = jnp.bfloat16

    x = x_ref[...].astype(jnp.float32)          # (M, D), batch+seq folded

    # ------------- attention branch: x + attn(ln_1(x)) -------------
    h = _layernorm(x, ln1_g_ref[...], ln1_b_ref[...])
    qkv = jnp.dot(h.astype(bf16), wqkv_ref[...],
                  preferred_element_type=jnp.float32) + bqkv_ref[...]  # (M, 3H)

    # RMSNorm over the full hidden (all heads concatenated), per (b, l) row.
    q = _rmsnorm(qkv[:, 0:H], gq_ref[...], H) * (dim_head ** -0.5)
    k = _rmsnorm(qkv[:, H:2 * H], gk_ref[...], H)
    v = qkv[:, 2 * H:3 * H]

    # Un-fold batch for the (per-batch, per-head) attention; cast once to bf16.
    q3 = q.reshape(block_batch, seq_len, H).astype(bf16)
    k3 = k.reshape(block_batch, seq_len, H).astype(bf16)
    v3 = v.reshape(block_batch, seq_len, H).astype(bf16)

    # Per-head attention.  Each head's context goes into its static lane slice
    # of the (M, H) scratch; the output projection is a single K=H matmul
    # after the loop (full MXU depth, no per-head f32 accumulation).
    # NOTE: num_head is small, so the static unroll is fine; switch to a
    # lax.fori_loop / head grid axis if profiling ever shows VMEM spills.
    for hh in range(num_head):
        sl = slice(hh * dim_head, (hh + 1) * dim_head)
        qh, kh, vh = q3[:, :, sl], k3[:, :, sl], v3[:, :, sl]
        # batched QK^T, contraction on last axes (no explicit transposes)
        s = jnp.einsum("bqd,bkd->bqk", qh, kh,
                       preferred_element_type=jnp.float32)   # (bt, L, L) f32
        s = s - jnp.max(s, axis=-1, keepdims=True)
        p = jnp.exp(s)
        p = p * pl.reciprocal(jnp.sum(p, axis=-1, keepdims=True), approx=True)
        ah = jnp.einsum("bqk,bkd->bqd", p.astype(bf16), vh,
                        preferred_element_type=jnp.float32)  # (bt, L, dh) f32
        ctx_ref[:, sl] = ah.reshape(M, dim_head)

    o = jnp.dot(ctx_ref[...].astype(bf16), wo_ref[...],
                preferred_element_type=jnp.float32) + bo_ref[...]
    o = _rmsnorm(o, go_ref[...], D)
    x1 = x + o

    # ------------------ MLP branch: x1 + mlp(ln_2(x1)) ------------------
    h2 = _layernorm(x1, ln2_g_ref[...], ln2_b_ref[...])
    f = jnp.dot(h2.astype(bf16), w1_ref[...],
                preferred_element_type=jnp.float32) + b1_ref[...]
    f = f * jax.nn.sigmoid(f)                   # SiLU in f32 (EUP sigmoid)
    m = jnp.dot(f.astype(bf16), w2_ref[...],
                preferred_element_type=jnp.float32) + b2_ref[...]
    # TODO(synk): nn.Dropout(p=0.1) treated as identity (eval semantics);
    # adaLN conditioning branch (c is not None) not implemented here.
    out_ref[...] = (x1 + m).astype(out_ref.dtype)


# ------------------------------ host wrapper -------------------------------

def _pick_block_batch(batch, seq, target_rows=1024):
    """Largest batch tile (dividing batch) with ~target_rows rows, capped so
    the grid has >= 2 steps when batch >= 2 (v7x megacore: both TCs busy)."""
    bt = max(1, min(batch, max(1, target_rows // max(seq, 1))))
    if batch >= 2:
        bt = min(bt, batch // 2)
    while batch % bt:
        bt -= 1
    return bt


def _vmem_budget_bytes():
    """Per-generation VMEM budget: ~62% of physical, clamped to [32, 96] MiB.
    v7x (64 MiB physical) -> ~40 MiB; v5e/v6e (128 MiB) -> ~80 MiB."""
    try:
        cap = pltpu.get_tpu_info().vmem_capacity_bytes
    except Exception:
        cap = 64 * 1024 * 1024
    return int(min(96 * 1024 * 1024, max(32 * 1024 * 1024, cap * 0.62)))


def prepare_params(params):
    """One-time bf16 cast of the big matmul weights (hoisted out of the
    per-forward path so no per-call HBM re-read / cast ops are emitted)."""
    bf16 = jnp.bfloat16
    out = dict(params)
    for name in ("wqkv", "wo", "w1", "w2"):
        out[name] = params[name].astype(bf16)
    return out


def decoder_block(x, params, *, num_head, dim_head, block_batch=None):
    B, L, D = x.shape
    H = num_head * dim_head
    FF = params["w1"].shape[1]
    bt = block_batch if block_batch is not None else _pick_block_batch(B, L)
    assert B % bt == 0
    m_blk = bt * L
    grid = (B // bt,)

    # Fold batch+sequence into the matmul M dimension (tall, lane-dense LHS).
    x2 = x.reshape(B * L, D)

    args = (
        x2,
        params["ln1_g"], params["ln1_b"],
        params["wqkv"], params["bqkv"],
        params["gq"], params["gk"],
        params["wo"], params["bo"], params["go"],
        params["ln2_g"], params["ln2_b"],
        params["w1"], params["b1"],
        params["w2"], params["b2"],
    )

    kernel = functools.partial(
        decoder_block_kernel,
        block_batch=bt, seq_len=L, num_head=num_head, dim_head=dim_head)

    # Advisory cost estimate for XLA scheduling around the custom call.
    M = B * L
    matmul_flops = 2 * M * (D * 3 * H + H * D + D * FF + FF * D)
    attn_flops = 4 * B * num_head * L * L * dim_head
    weight_bytes = 2 * (D * 3 * H + H * D + D * FF + FF * D)   # bf16 weights
    small_param_bytes = 4 * (8 * D + 2 * H + 3 * H + FF)
    cost = pl.CostEstimate(
        flops=matmul_flops + attn_flops,
        transcendentals=B * num_head * L * L + M * FF,          # exp + sigmoid
        bytes_accessed=2 * M * D * 4 + weight_bytes + small_param_bytes)

    cparams = pltpu.CompilerParams(
        dimension_semantics=("parallel",),
        vmem_limit_bytes=_vmem_budget_bytes())

    def build(single_buffer_weights):
        def const_spec(shape):
            n = len(shape)
            kwargs = {}
            if single_buffer_weights:
                # Constant index_map across the grid: keep ONE VMEM copy
                # instead of the default double buffer.
                kwargs["pipeline_mode"] = pl.Buffered(1)
            return pl.BlockSpec(shape, lambda i, n=n: (0,) * n, **kwargs)

        in_specs = [
            pl.BlockSpec((m_blk, D), lambda i: (i, 0)),      # x (B*L, D)
            const_spec((1, D)), const_spec((1, D)),          # ln1 gamma, beta
            const_spec((D, 3 * H)), const_spec((1, 3 * H)),  # to_qkv W, b
            const_spec((1, H)), const_spec((1, H)),          # rms_norm_q/k g
            const_spec((H, D)), const_spec((1, D)),          # to_out W, b
            const_spec((1, D)),                              # to_out RMSNorm g
            const_spec((1, D)), const_spec((1, D)),          # ln2 gamma, beta
            const_spec((D, FF)), const_spec((1, FF)),        # mlp W1, b1
            const_spec((FF, D)), const_spec((1, D)),         # mlp W2, b2
        ]
        return pl.pallas_call(
            kernel,
            out_shape=jax.ShapeDtypeStruct((B * L, D), x.dtype),
            grid=grid,
            in_specs=in_specs,
            out_specs=pl.BlockSpec((m_blk, D), lambda i: (i, 0)),
            scratch_shapes=[pltpu.VMEM((m_blk, H), jnp.float32)],  # head ctx
            compiler_params=cparams,
            cost_estimate=cost,
        )

    try:
        out2 = jax.block_until_ready(build(True)(*args))
    except Exception:
        # pipeline_mode=pl.Buffered(1) unsupported on this jax version:
        # fall back to default (double-buffered) constant blocks.
        out2 = build(False)(*args)
    return out2.reshape(B, L, D)


# --------------------------- pure-JAX reference ----------------------------
# Mirrors the kernel's mixed precision (bf16 matmul inputs, f32 accumulation,
# f32 norm/softmax statistics) so the comparison isolates structural bugs.

def decoder_block_ref(x, p, *, num_head, dim_head):
    B, L, D = x.shape
    H = num_head * dim_head
    bf16 = jnp.bfloat16

    def ln(t, g, b):
        mean = jnp.mean(t, -1, keepdims=True)
        var = jnp.mean((t - mean) ** 2, -1, keepdims=True)
        return (t - mean) / jnp.sqrt(var + 1e-6) * g[0] + b[0]

    def rms(t, g, d):
        n = jnp.maximum(jnp.sqrt(jnp.sum(t * t, -1, keepdims=True)), 1e-12)
        return t / n * g[0] * math.sqrt(d)

    h = ln(x, p["ln1_g"], p["ln1_b"])
    qkv = jnp.dot(h.astype(bf16), p["wqkv"].astype(bf16),
                  preferred_element_type=jnp.float32) + p["bqkv"][0]
    q, k, v = qkv[..., :H], qkv[..., H:2 * H], qkv[..., 2 * H:]
    q = rms(q, p["gq"], H) * (dim_head ** -0.5)
    k = rms(k, p["gk"], H)

    def split_heads(t):  # (B, L, H) -> (B, nh, L, dh)
        return t.reshape(B, L, num_head, dim_head).transpose(0, 2, 1, 3)

    qh, kh, vh = split_heads(q), split_heads(k), split_heads(v)
    s = jnp.einsum("bhld,bhnd->bhln", qh.astype(bf16), kh.astype(bf16),
                   preferred_element_type=jnp.float32)
    s = s - jnp.max(s, -1, keepdims=True)
    pr = jnp.exp(s)
    pr = pr / jnp.sum(pr, -1, keepdims=True)
    o = jnp.einsum("bhln,bhnd->bhld", pr.astype(bf16), vh.astype(bf16),
                   preferred_element_type=jnp.float32)        # (B, nh, L, dh)
    o = o.transpose(0, 2, 1, 3).reshape(B, L, H)              # b l (h dv)
    o = jnp.dot(o.astype(bf16), p["wo"].astype(bf16),
                preferred_element_type=jnp.float32) + p["bo"][0]
    o = rms(o, p["go"], D)
    x1 = x + o

    h2 = ln(x1, p["ln2_g"], p["ln2_b"])
    f = jnp.dot(h2.astype(bf16), p["w1"].astype(bf16),
                preferred_element_type=jnp.float32) + p["b1"][0]
    f = f * jax.nn.sigmoid(f)
    m = jnp.dot(f.astype(bf16), p["w2"].astype(bf16),
                preferred_element_type=jnp.float32) + p["b2"][0]
    return x1 + m


# ----------------------------------- main -----------------------------------

if __name__ == "__main__":
    B, L, D = 2, 8, 32
    NUM_HEAD = 4
    DIM_HEAD = D // NUM_HEAD
    H = NUM_HEAD * DIM_HEAD
    FF = 64

    key = jax.random.PRNGKey(0)
    keys = jax.random.split(key, 10)

    x = jax.random.normal(keys[0], (B, L, D), dtype=jnp.float32)

    params = {
        "ln1_g": jnp.ones((1, D), jnp.float32),
        "ln1_b": jnp.zeros((1, D), jnp.float32),
        "wqkv": 0.05 * jax.random.normal(keys[1], (D, 3 * H), jnp.float32),
        "bqkv": 0.05 * jax.random.normal(keys[2], (1, 3 * H), jnp.float32),
        "gq": jnp.ones((1, H), jnp.float32),
        "gk": jnp.ones((1, H), jnp.float32),
        "wo": 0.05 * jax.random.normal(keys[3], (H, D), jnp.float32),
        "bo": 0.05 * jax.random.normal(keys[4], (1, D), jnp.float32),
        "go": jnp.ones((1, D), jnp.float32),
        "ln2_g": jnp.ones((1, D), jnp.float32),
        "ln2_b": jnp.zeros((1, D), jnp.float32),
        "w1": 0.05 * jax.random.normal(keys[5], (D, FF), jnp.float32),
        "b1": 0.05 * jax.random.normal(keys[6], (1, FF), jnp.float32),
        "w2": 0.05 * jax.random.normal(keys[7], (FF, D), jnp.float32),
        "b2": 0.05 * jax.random.normal(keys[8], (1, D), jnp.float32),
    }

    # One-time weight preparation (bf16 casts hoisted out of the call path).
    kparams = prepare_params(params)

    out = decoder_block(x, kparams, num_head=NUM_HEAD, dim_head=DIM_HEAD)
    out = jax.block_until_ready(out)

    ref = decoder_block_ref(x, params, num_head=NUM_HEAD, dim_head=DIM_HEAD)
    ref = jax.block_until_ready(ref)

    assert out.shape == (B, L, D)
    max_err = float(jnp.max(jnp.abs(out - ref)))
    assert jnp.allclose(out, ref, atol=2e-2, rtol=2e-2), (
        f"max abs err {max_err}"
    )

    print("KERNEL_OK")
</pallas_src>

<mosaic_0001>
module attributes {stable_mosaic.version = 11 : i64} {
  func.func @decoder_block_kernel(%arg0: i32, %arg1: memref<8x32xf32, #tpu.memory_space<vmem>>, %arg2: memref<1x32xf32, #tpu.memory_space<vmem>>, %arg3: memref<1x32xf32, #tpu.memory_space<vmem>>, %arg4: memref<32x96xbf16, #tpu.memory_space<vmem>>, %arg5: memref<1x96xf32, #tpu.memory_space<vmem>>, %arg6: memref<1x32xf32, #tpu.memory_space<vmem>>, %arg7: memref<1x32xf32, #tpu.memory_space<vmem>>, %arg8: memref<32x32xbf16, #tpu.memory_space<vmem>>, %arg9: memref<1x32xf32, #tpu.memory_space<vmem>>, %arg10: memref<1x32xf32, #tpu.memory_space<vmem>>, %arg11: memref<1x32xf32, #tpu.memory_space<vmem>>, %arg12: memref<1x32xf32, #tpu.memory_space<vmem>>, %arg13: memref<32x64xbf16, #tpu.memory_space<vmem>>, %arg14: memref<1x64xf32, #tpu.memory_space<vmem>>, %arg15: memref<64x32xbf16, #tpu.memory_space<vmem>>, %arg16: memref<1x32xf32, #tpu.memory_space<vmem>>, %arg17: memref<8x32xf32, #tpu.memory_space<vmem>>, %arg18: memref<8x32xf32, #tpu.memory_space<vmem>>) attributes {dimension_semantics = [#tpu.dimension_semantics<parallel>], iteration_bounds = array<i64: 2>, scalar_prefetch = 0 : i64, scratch_operands = 1 : i64, tpu.core_type = #tpu.core_type<tc>, window_params = [{transform_indices = @transform_0, window_bounds = array<i64: 8, 32>}, {pipeline_mode = #tpu.pipeline_mode<synchronous>, transform_indices = @transform_1, window_bounds = array<i64: 1, 32>}, {pipeline_mode = #tpu.pipeline_mode<synchronous>, transform_indices = @transform_2, window_bounds = array<i64: 1, 32>}, {pipeline_mode = #tpu.pipeline_mode<synchronous>, transform_indices = @transform_3, window_bounds = array<i64: 32, 96>}, {pipeline_mode = #tpu.pipeline_mode<synchronous>, transform_indices = @transform_4, window_bounds = array<i64: 1, 96>}, {pipeline_mode = #tpu.pipeline_mode<synchronous>, transform_indices = @transform_5, window_bounds = array<i64: 1, 32>}, {pipeline_mode = #tpu.pipeline_mode<synchronous>, transform_indices = @transform_6, window_bounds = array<i64: 1, 32>}, {pipeline_mode = #tpu.pipeline_mode<synchronous>, transform_indices = @transform_7, window_bounds = array<i64: 32, 32>}, {pipeline_mode = #tpu.pipeline_mode<synchronous>, transform_indices = @transform_8, window_bounds = array<i64: 1, 32>}, {pipeline_mode = #tpu.pipeline_mode<synchronous>, transform_indices = @transform_9, window_bounds = array<i64: 1, 32>}, {pipeline_mode = #tpu.pipeline_mode<synchronous>, transform_indices = @transform_10, window_bounds = array<i64: 1, 32>}, {pipeline_mode = #tpu.pipeline_mode<synchronous>, transform_indices = @transform_11, window_bounds = array<i64: 1, 32>}, {pipeline_mode = #tpu.pipeline_mode<synchronous>, transform_indices = @transform_12, window_bounds = array<i64: 32, 64>}, {pipeline_mode = #tpu.pipeline_mode<synchronous>, transform_indices = @transform_13, window_bounds = array<i64: 1, 64>}, {pipeline_mode = #tpu.pipeline_mode<synchronous>, transform_indices = @transform_14, window_bounds = array<i64: 64, 32>}, {pipeline_mode = #tpu.pipeline_mode<synchronous>, transform_indices = @transform_15, window_bounds = array<i64: 1, 32>}, {transform_indices = @transform_16, window_bounds = array<i64: 8, 32>}]} {
    %c0 = arith.constant 0 : index
    %c0_0 = arith.constant 0 : index
    %0 = vector.load %arg1[%c0, %c0_0] : memref<8x32xf32, #tpu.memory_space<vmem>>, vector<8x32xf32>
    %c0_1 = arith.constant 0 : index
    %c0_2 = arith.constant 0 : index
    %1 = vector.load %arg2[%c0_1, %c0_2] : memref<1x32xf32, #tpu.memory_space<vmem>>, vector<1x32xf32>
    %c0_3 = arith.constant 0 : index
    %c0_4 = arith.constant 0 : index
    %2 = vector.load %arg3[%c0_3, %c0_4] : memref<1x32xf32, #tpu.memory_space<vmem>>, vector<1x32xf32>
    %cst = arith.constant dense<0.000000e+00> : vector<8xf32>
    %3 = vector.multi_reduction <add>, %0, %cst [1] : vector<8x32xf32> to vector<8xf32>
    %4 = vector.shape_cast %3 : vector<8xf32> to vector<8x1xf32>
    %cst_5 = arith.constant 3.200000e+01 : f32
    %5 = vector.broadcast %cst_5 : f32 to vector<8x1xf32>
    %6 = arith.divf %4, %5 : vector<8x1xf32>
    %7 = vector.broadcast %6 : vector<8x1xf32> to vector<8x32xf32>
    %8 = arith.subf %0, %7 : vector<8x32xf32>
    %9 = arith.mulf %8, %8 : vector<8x32xf32>
    %cst_6 = arith.constant dense<0.000000e+00> : vector<8xf32>
    %10 = vector.multi_reduction <add>, %9, %cst_6 [1] : vector<8x32xf32> to vector<8xf32>
    %11 = vector.shape_cast %10 : vector<8xf32> to vector<8x1xf32>
    %cst_7 = arith.constant 3.200000e+01 : f32
    %12 = vector.broadcast %cst_7 : f32 to vector<8x1xf32>
    %13 = arith.divf %11, %12 : vector<8x1xf32>
    %cst_8 = arith.constant 9.99999997E-7 : f32
    %14 = vector.broadcast %cst_8 : f32 to vector<8x1xf32>
    %15 = arith.addf %13, %14 : vector<8x1xf32>
    %16 = math.rsqrt %15 : vector<8x1xf32>
    %17 = vector.broadcast %16 : vector<8x1xf32> to vector<8x32xf32>
    %18 = arith.mulf %8, %17 : vector<8x32xf32>
    %19 = vector.broadcast %1 : vector<1x32xf32> to vector<8x32xf32>
    %20 = arith.mulf %18, %19 : vector<8x32xf32>
    %21 = vector.broadcast %2 : vector<1x32xf32> to vector<8x32xf32>
    %22 = arith.addf %20, %21 : vector<8x32xf32>
    %23 = arith.truncf %22 : vector<8x32xf32> to vector<8x32xbf16>
    %c0_9 = arith.constant 0 : index
    %c0_10 = arith.constant 0 : index
    %24 = vector.load %arg4[%c0_9, %c0_10] : memref<32x96xbf16, #tpu.memory_space<vmem>>, vector<32x96xbf16>
    %cst_11 = arith.constant dense<0.000000e+00> : vector<8x96xf32>
    %25 = tpu.matmul %23, %24, %cst_11 {dimension_numbers = #tpu.dot_dimension_numbers<[1], [0], [0], [1], [0, 0, 1, 1], [], []>} : vector<8x32xbf16>, vector<32x96xbf16>, vector<8x96xf32> -> vector<8x96xf32>
    %c0_12 = arith.constant 0 : index
    %c0_13 = arith.constant 0 : index
    %26 = vector.load %arg5[%c0_12, %c0_13] : memref<1x96xf32, #tpu.memory_space<vmem>>, vector<1x96xf32>
    %27 = vector.broadcast %26 : vector<1x96xf32> to vector<8x96xf32>
    %28 = arith.addf %25, %27 : vector<8x96xf32>
    %29 = vector.extract_strided_slice %28 {offsets = [0, 0], sizes = [8, 32], strides = [1, 1]} : vector<8x96xf32> to vector<8x32xf32>
    %c0_14 = arith.constant 0 : index
    %c0_15 = arith.constant 0 : index
    %30 = vector.load %arg6[%c0_14, %c0_15] : memref<1x32xf32, #tpu.memory_space<vmem>>, vector<1x32xf32>
    %31 = arith.mulf %29, %29 : vector<8x32xf32>
    %cst_16 = arith.constant dense<0.000000e+00> : vector<8xf32>
    %32 = vector.multi_reduction <add>, %31, %cst_16 [1] : vector<8x32xf32> to vector<8xf32>
    %33 = vector.shape_cast %32 : vector<8xf32> to vector<8x1xf32>
    %cst_17 = arith.constant 1.000000e-24 : f32
    %34 = vector.broadcast %cst_17 : f32 to vector<8x1xf32>
    %35 = arith.maximumf %33, %34 : vector<8x1xf32>
    %36 = math.rsqrt %35 : vector<8x1xf32>
    %37 = vector.broadcast %36 : vector<8x1xf32> to vector<8x32xf32>
    %38 = arith.mulf %29, %37 : vector<8x32xf32>
    %39 = vector.broadcast %30 : vector<1x32xf32> to vector<8x32xf32>
    %40 = arith.mulf %38, %39 : vector<8x32xf32>
    %cst_18 = arith.constant 5.65685415 : f32
    %41 = vector.broadcast %cst_18 : f32 to vector<8x32xf32>
    %42 = arith.mulf %40, %41 : vector<8x32xf32>
    %cst_19 = arith.constant 0.353553385 : f32
    %43 = vector.broadcast %cst_19 : f32 to vector<8x32xf32>
    %44 = arith.mulf %42, %43 : vector<8x32xf32>
    %45 = vector.extract_strided_slice %28 {offsets = [0, 32], sizes = [8, 32], strides = [1, 1]} : vector<8x96xf32> to vector<8x32xf32>
    %c0_20 = arith.constant 0 : index
    %c0_21 = arith.constant 0 : index
    %46 = vector.load %arg7[%c0_20, %c0_21] : memref<1x32xf32, #tpu.memory_space<vmem>>, vector<1x32xf32>
    %47 = arith.mulf %45, %45 : vector<8x32xf32>
    %cst_22 = arith.constant dense<0.000000e+00> : vector<8xf32>
    %48 = vector.multi_reduction <add>, %47, %cst_22 [1] : vector<8x32xf32> to vector<8xf32>
    %49 = vector.shape_cast %48 : vector<8xf32> to vector<8x1xf32>
    %cst_23 = arith.constant 1.000000e-24 : f32
    %50 = vector.broadcast %cst_23 : f32 to vector<8x1xf32>
    %51 = arith.maximumf %49, %50 : vector<8x1xf32>
    %52 = math.rsqrt %51 : vector<8x1xf32>
    %53 = vector.broadcast %52 : vector<8x1xf32> to vector<8x32xf32>
    %54 = arith.mulf %45, %53 : vector<8x32xf32>
    %55 = vector.broadcast %46 : vector<1x32xf32> to vector<8x32xf32>
    %56 = arith.mulf %54, %55 : vector<8x32xf32>
    %cst_24 = arith.constant 5.65685415 : f32
    %57 = vector.broadcast %cst_24 : f32 to vector<8x32xf32>
    %58 = arith.mulf %56, %57 : vector<8x32xf32>
    %59 = vector.extract_strided_slice %28 {offsets = [0, 64], sizes = [8, 32], strides = [1, 1]} : vector<8x96xf32> to vector<8x32xf32>
    %60 = vector.shape_cast %44 : vector<8x32xf32> to vector<1x8x32xf32>
    %61 = arith.truncf %60 : vector<1x8x32xf32> to vector<1x8x32xbf16>
    %62 = vector.shape_cast %58 : vector<8x32xf32> to vector<1x8x32xf32>
    %63 = arith.truncf %62 : vector<1x8x32xf32> to vector<1x8x32xbf16>
    %64 = vector.shape_cast %59 : vector<8x32xf32> to vector<1x8x32xf32>
    %65 = arith.truncf %64 : vector<1x8x32xf32> to vector<1x8x32xbf16>
    %66 = vector.extract_strided_slice %61 {offsets = [0, 0, 0], sizes = [1, 8, 8], strides = [1, 1, 1]} : vector<1x8x32xbf16> to vector<1x8x8xbf16>
    %67 = vector.extract_strided_slice %63 {offsets = [0, 0, 0], sizes = [1, 8, 8], strides = [1, 1, 1]} : vector<1x8x32xbf16> to vector<1x8x8xbf16>
    %68 = vector.extract_strided_slice %65 {offsets = [0, 0, 0], sizes = [1, 8, 8], strides = [1, 1, 1]} : vector<1x8x32xbf16> to vector<1x8x8xbf16>
    "tpu.trace_start"() <{level = 10 : i32, message = "bqd,bkd->bqk"}> : () -> ()
    %cst_25 = arith.constant dense<0.000000e+00> : vector<1x8x8xf32>
    %69 = tpu.matmul %66, %67, %cst_25 {dimension_numbers = #tpu.dot_dimension_numbers<[2], [2], [1], [1], [0, 0, 0, 1, 1, 1], [0], [0]>} : vector<1x8x8xbf16>, vector<1x8x8xbf16>, vector<1x8x8xf32> -> vector<1x8x8xf32>
    "tpu.trace_stop"() : () -> ()
    %cst_26 = arith.constant dense<0xFF800000> : vector<1x8xf32>
    %70 = vector.multi_reduction <maximumf>, %69, %cst_26 [2] : vector<1x8x8xf32> to vector<1x8xf32>
    %71 = vector.shape_cast %70 : vector<1x8xf32> to vector<1x8x1xf32>
    %72 = vector.broadcast %71 : vector<1x8x1xf32> to vector<1x8x8xf32>
    %73 = arith.subf %69, %72 : vector<1x8x8xf32>
    %74 = math.exp %73 : vector<1x8x8xf32>
    %cst_27 = arith.constant dense<0.000000e+00> : vector<1x8xf32>
    %75 = vector.multi_reduction <add>, %74, %cst_27 [2] : vector<1x8x8xf32> to vector<1x8xf32>
    %76 = vector.shape_cast %75 : vector<1x8xf32> to vector<1x8x1xf32>
    %77 = tpu.reciprocal %76 {approx = true} : vector<1x8x1xf32> -> vector<1x8x1xf32>
    %78 = vector.broadcast %77 : vector<1x8x1xf32> to vector<1x8x8xf32>
    %79 = arith.mulf %74, %78 : vector<1x8x8xf32>
    %80 = arith.truncf %79 : vector<1x8x8xf32> to vector<1x8x8xbf16>
    "tpu.trace_start"() <{level = 10 : i32, message = "bqk,bkd->bqd"}> : () -> ()
    %cst_28 = arith.constant dense<0.000000e+00> : vector<1x8x8xf32>
    %81 = tpu.matmul %80, %68, %cst_28 {dimension_numbers = #tpu.dot_dimension_numbers<[2], [1], [1], [2], [0, 0, 0, 1, 1, 2], [0], [0]>} : vector<1x8x8xbf16>, vector<1x8x8xbf16>, vector<1x8x8xf32> -> vector<1x8x8xf32>
    "tpu.trace_stop"() : () -> ()
    %82 = vector.shape_cast %81 : vector<1x8x8xf32> to vector<8x8xf32>
    %c0_29 = arith.constant 0 : index
    %c0_30 = arith.constant 0 : index
    %83 = vector.load %arg18[%c0_29, %c0_30] : memref<8x32xf32, #tpu.memory_space<vmem>>, vector<8x8xf32>
    tpu.vector_store %arg18[%c0_29, %c0_30], %82 {strides = array<i32>} : memref<8x32xf32, #tpu.memory_space<vmem>>, vector<8x8xf32>,
    %84 = vector.extract_strided_slice %61 {offsets = [0, 0, 8], sizes = [1, 8, 8], strides = [1, 1, 1]} : vector<1x8x32xbf16> to vector<1x8x8xbf16>
    %85 = vector.extract_strided_slice %63 {offsets = [0, 0, 8], sizes = [1, 8, 8], strides = [1, 1, 1]} : vector<1x8x32xbf16> to vector<1x8x8xbf16>
    %86 = vector.extract_strided_slice %65 {offsets = [0, 0, 8], sizes = [1, 8, 8], strides = [1, 1, 1]} : vector<1x8x32xbf16> to vector<1x8x8xbf16>
    "tpu.trace_start"() <{level = 10 : i32, message = "bqd,bkd->bqk"}> : () -> ()
    %cst_31 = arith.constant dense<0.000000e+00> : vector<1x8x8xf32>
    %87 = tpu.matmul %84, %85, %cst_31 {dimension_numbers = #tpu.dot_dimension_numbers<[2], [2], [1], [1], [0, 0, 0, 1, 1, 1], [0], [0]>} : vector<1x8x8xbf16>, vector<1x8x8xbf16>, vector<1x8x8xf32> -> vector<1x8x8xf32>
    "tpu.trace_stop"() : () -> ()
    %cst_32 = arith.constant dense<0xFF800000> : vector<1x8xf32>
    %88 = vector.multi_reduction <maximumf>, %87, %cst_32 [2] : vector<1x8x8xf32> to vector<1x8xf32>
    %89 = vector.shape_cast %88 : vector<1x8xf32> to vector<1x8x1xf32>
    %90 = vector.broadcast %89 : vector<1x8x1xf32> to vector<1x8x8xf32>
    %91 = arith.subf %87, %90 : vector<1x8x8xf32>
    %92 = math.exp %91 : vector<1x8x8xf32>
    %cst_33 = arith.constant dense<0.000000e+00> : vector<1x8xf32>
    %93 = vector.multi_reduction <add>, %92, %cst_33 [2] : vector<1x8x8xf32> to vector<1x8xf32>
    %94 = vector.shape_cast %93 : vector<1x8xf32> to vector<1x8x1xf32>
    %95 = tpu.reciprocal %94 {approx = true} : vector<1x8x1xf32> -> vector<1x8x1xf32>
    %96 = vector.broadcast %95 : vector<1x8x1xf32> to vector<1x8x8xf32>
    %97 = arith.mulf %92, %96 : vector<1x8x8xf32>
    %98 = arith.truncf %97 : vector<1x8x8xf32> to vector<1x8x8xbf16>
    "tpu.trace_start"() <{level = 10 : i32, message = "bqk,bkd->bqd"}> : () -> ()
    %cst_34 = arith.constant dense<0.000000e+00> : vector<1x8x8xf32>
    %99 = tpu.matmul %98, %86, %cst_34 {dimension_numbers = #tpu.dot_dimension_numbers<[2], [1], [1], [2], [0, 0, 0, 1, 1, 2], [0], [0]>} : vector<1x8x8xbf16>, vector<1x8x8xbf16>, vector<1x8x8xf32> -> vector<1x8x8xf32>
    "tpu.trace_stop"() : () -> ()
    %100 = vector.shape_cast %99 : vector<1x8x8xf32> to vector<8x8xf32>
    %c0_35 = arith.constant 0 : index
    %c8 = arith.constant 8 : index
    %101 = vector.load %arg18[%c0_35, %c8] : memref<8x32xf32, #tpu.memory_space<vmem>>, vector<8x8xf32>
    tpu.vector_store %arg18[%c0_35, %c8], %100 {strides = array<i32>} : memref<8x32xf32, #tpu.memory_space<vmem>>, vector<8x8xf32>,
    %102 = vector.extract_strided_slice %61 {offsets = [0, 0, 16], sizes = [1, 8, 8], strides = [1, 1, 1]} : vector<1x8x32xbf16> to vector<1x8x8xbf16>
    %103 = vector.extract_strided_slice %63 {offsets = [0, 0, 16], sizes = [1, 8, 8], strides = [1, 1, 1]} : vector<1x8x32xbf16> to vector<1x8x8xbf16>
    %104 = vector.extract_strided_slice %65 {offsets = [0, 0, 16], sizes = [1, 8, 8], strides = [1, 1, 1]} : vector<1x8x32xbf16> to vector<1x8x8xbf16>
    "tpu.trace_start"() <{level = 10 : i32, message = "bqd,bkd->bqk"}> : () -> ()
    %cst_36 = arith.constant dense<0.000000e+00> : vector<1x8x8xf32>
    %105 = tpu.matmul %102, %103, %cst_36 {dimension_numbers = #tpu.dot_dimension_numbers<[2], [2], [1], [1], [0, 0, 0, 1, 1, 1], [0], [0]>} : vector<1x8x8xbf16>, vector<1x8x8xbf16>, vector<1x8x8xf32> -> vector<1x8x8xf32>
    "tpu.trace_stop"() : () -> ()
    %cst_37 = arith.constant dense<0xFF800000> : vector<1x8xf32>
    %106 = vector.multi_reduction <maximumf>, %105, %cst_37 [2] : vector<1x8x8xf32> to vector<1x8xf32>
    %107 = vector.shape_cast %106 : vector<1x8xf32> to vector<1x8x1xf32>
    %108 = vector.broadcast %107 : vector<1x8x1xf32> to vector<1x8x8xf32>
    %109 = arith.subf %105, %108 : vector<1x8x8xf32>
    %110 = math.exp %109 : vector<1x8x8xf32>
    %cst_38 = arith.constant dense<0.000000e+00> : vector<1x8xf32>
    %111 = vector.multi_reduction <add>, %110, %cst_38 [2] : vector<1x8x8xf32> to vector<1x8xf32>
    %112 = vector.shape_cast %111 : vector<1x8xf32> to vector<1x8x1xf32>
    %113 = tpu.reciprocal %112 {approx = true} : vector<1x8x1xf32> -> vector<1x8x1xf32>
    %114 = vector.broadcast %113 : vector<1x8x1xf32> to vector<1x8x8xf32>
    %115 = arith.mulf %110, %114 : vector<1x8x8xf32>
    %116 = arith.truncf %115 : vector<1x8x8xf32> to vector<1x8x8xbf16>
    "tpu.trace_start"() <{level = 10 : i32, message = "bqk,bkd->bqd"}> : () -> ()
    %cst_39 = arith.constant dense<0.000000e+00> : vector<1x8x8xf32>
    %117 = tpu.matmul %116, %104, %cst_39 {dimension_numbers = #tpu.dot_dimension_numbers<[2], [1], [1], [2], [0, 0, 0, 1, 1, 2], [0], [0]>} : vector<1x8x8xbf16>, vector<1x8x8xbf16>, vector<1x8x8xf32> -> vector<1x8x8xf32>
    "tpu.trace_stop"() : () -> ()
    %118 = vector.shape_cast %117 : vector<1x8x8xf32> to vector<8x8xf32>
    %c0_40 = arith.constant 0 : index
    %c16 = arith.constant 16 : index
    %119 = vector.load %arg18[%c0_40, %c16] : memref<8x32xf32, #tpu.memory_space<vmem>>, vector<8x8xf32>
    tpu.vector_store %arg18[%c0_40, %c16], %118 {strides = array<i32>} : memref<8x32xf32, #tpu.memory_space<vmem>>, vector<8x8xf32>,
    %120 = vector.extract_strided_slice %61 {offsets = [0, 0, 24], sizes = [1, 8, 8], strides = [1, 1, 1]} : vector<1x8x32xbf16> to vector<1x8x8xbf16>
    %121 = vector.extract_strided_slice %63 {offsets = [0, 0, 24], sizes = [1, 8, 8], strides = [1, 1, 1]} : vector<1x8x32xbf16> to vector<1x8x8xbf16>
    %122 = vector.extract_strided_slice %65 {offsets = [0, 0, 24], sizes = [1, 8, 8], strides = [1, 1, 1]} : vector<1x8x32xbf16> to vector<1x8x8xbf16>
    "tpu.trace_start"() <{level = 10 : i32, message = "bqd,bkd->bqk"}> : () -> ()
    %cst_41 = arith.constant dense<0.000000e+00> : vector<1x8x8xf32>
    %123 = tpu.matmul %120, %121, %cst_41 {dimension_numbers = #tpu.dot_dimension_numbers<[2], [2], [1], [1], [0, 0, 0, 1, 1, 1], [0], [0]>} : vector<1x8x8xbf16>, vector<1x8x8xbf16>, vector<1x8x8xf32> -> vector<1x8x8xf32>
    "tpu.trace_stop"() : () -> ()
    %cst_42 = arith.constant dense<0xFF800000> : vector<1x8xf32>
    %124 = vector.multi_reduction <maximumf>, %123, %cst_42 [2] : vector<1x8x8xf32> to vector<1x8xf32>
    %125 = vector.shape_cast %124 : vector<1x8xf32> to vector<1x8x1xf32>
    %126 = vector.broadcast %125 : vector<1x8x1xf32> to vector<1x8x8xf32>
    %127 = arith.subf %123, %126 : vector<1x8x8xf32>
    %128 = math.exp %127 : vector<1x8x8xf32>
    %cst_43 = arith.constant dense<0.000000e+00> : vector<1x8xf32>
    %129 = vector.multi_reduction <add>, %128, %cst_43 [2] : vector<1x8x8xf32> to vector<1x8xf32>
    %130 = vector.shape_cast %129 : vector<1x8xf32> to vector<1x8x1xf32>
    %131 = tpu.reciprocal %130 {approx = true} : vector<1x8x1xf32> -> vector<1x8x1xf32>
    %132 = vector.broadcast %131 : vector<1x8x1xf32> to vector<1x8x8xf32>
    %133 = arith.mulf %128, %132 : vector<1x8x8xf32>
    %134 = arith.truncf %133 : vector<1x8x8xf32> to vector<1x8x8xbf16>
    "tpu.trace_start"() <{level = 10 : i32, message = "bqk,bkd->bqd"}> : () -> ()
    %cst_44 = arith.constant dense<0.000000e+00> : vector<1x8x8xf32>
    %135 = tpu.matmul %134, %122, %cst_44 {dimension_numbers = #tpu.dot_dimension_numbers<[2], [1], [1], [2], [0, 0, 0, 1, 1, 2], [0], [0]>} : vector<1x8x8xbf16>, vector<1x8x8xbf16>, vector<1x8x8xf32> -> vector<1x8x8xf32>
    "tpu.trace_stop"() : () -> ()
    %136 = vector.shape_cast %135 : vector<1x8x8xf32> to vector<8x8xf32>
    %c0_45 = arith.constant 0 : index
    %c24 = arith.constant 24 : index
    %137 = vector.load %arg18[%c0_45, %c24] : memref<8x32xf32, #tpu.memory_space<vmem>>, vector<8x8xf32>
    tpu.vector_store %arg18[%c0_45, %c24], %136 {strides = array<i32>} : memref<8x32xf32, #tpu.memory_space<vmem>>, vector<8x8xf32>,
    %c0_46 = arith.constant 0 : index
    %c0_47 = arith.constant 0 : index
    %138 = vector.load %arg18[%c0_46, %c0_47] : memref<8x32xf32, #tpu.memory_space<vmem>>, vector<8x32xf32>
    %139 = arith.truncf %138 : vector<8x32xf32> to vector<8x32xbf16>
    %c0_48 = arith.constant 0 : index
    %c0_49 = arith.constant 0 : index
    %140 = vector.load %arg8[%c0_48, %c0_49] : memref<32x32xbf16, #tpu.memory_space<vmem>>, vector<32x32xbf16>
    %cst_50 = arith.constant dense<0.000000e+00> : vector<8x32xf32>
    %141 = tpu.matmul %139, %140, %cst_50 {dimension_numbers = #tpu.dot_dimension_numbers<[1], [0], [0], [1], [0, 0, 1, 1], [], []>} : vector<8x32xbf16>, vector<32x32xbf16>, vector<8x32xf32> -> vector<8x32xf32>
    %c0_51 = arith.constant 0 : index
    %c0_52 = arith.constant 0 : index
    %142 = vector.load %arg9[%c0_51, %c0_52] : memref<1x32xf32, #tpu.memory_space<vmem>>, vector<1x32xf32>
    %143 = vector.broadcast %142 : vector<1x32xf32> to vector<8x32xf32>
    %144 = arith.addf %141, %143 : vector<8x32xf32>
    %c0_53 = arith.constant 0 : index
    %c0_54 = arith.constant 0 : index
    %145 = vector.load %arg10[%c0_53, %c0_54] : memref<1x32xf32, #tpu.memory_space<vmem>>, vector<1x32xf32>
    %146 = arith.mulf %144, %144 : vector<8x32xf32>
    %cst_55 = arith.constant dense<0.000000e+00> : vector<8xf32>
    %147 = vector.multi_reduction <add>, %146, %cst_55 [1] : vector<8x32xf32> to vector<8xf32>
    %148 = vector.shape_cast %147 : vector<8xf32> to vector<8x1xf32>
    %cst_56 = arith.constant 1.000000e-24 : f32
    %149 = vector.broadcast %cst_56 : f32 to vector<8x1xf32>
    %150 = arith.maximumf %148, %149 : vector<8x1xf32>
    %151 = math.rsqrt %150 : vector<8x1xf32>
    %152 = vector.broadcast %151 : vector<8x1xf32> to vector<8x32xf32>
    %153 = arith.mulf %144, %152 : vector<8x32xf32>
    %154 = vector.broadcast %145 : vector<1x32xf32> to vector<8x32xf32>
    %155 = arith.mulf %153, %154 : vector<8x32xf32>
    %cst_57 = arith.constant 5.65685415 : f32
    %156 = vector.broadcast %cst_57 : f32 to vector<8x32xf32>
    %157 = arith.mulf %155, %156 : vector<8x32xf32>
    %158 = arith.addf %0, %157 : vector<8x32xf32>
    %c0_58 = arith.constant 0 : index
    %c0_59 = arith.constant 0 : index
    %159 = vector.load %arg11[%c0_58, %c0_59] : memref<1x32xf32, #tpu.memory_space<vmem>>, vector<1x32xf32>
    %c0_60 = arith.constant 0 : index
    %c0_61 = arith.constant 0 : index
    %160 = vector.load %arg12[%c0_60, %c0_61] : memref<1x32xf32, #tpu.memory_space<vmem>>, vector<1x32xf32>
    %cst_62 = arith.constant dense<0.000000e+00> : vector<8xf32>
    %161 = vector.multi_reduction <add>, %158, %cst_62 [1] : vector<8x32xf32> to vector<8xf32>
    %162 = vector.shape_cast %161 : vector<8xf32> to vector<8x1xf32>
    %cst_63 = arith.constant 3.200000e+01 : f32
    %163 = vector.broadcast %cst_63 : f32 to vector<8x1xf32>
    %164 = arith.divf %162, %163 : vector<8x1xf32>
    %165 = vector.broadcast %164 : vector<8x1xf32> to vector<8x32xf32>
    %166 = arith.subf %158, %165 : vector<8x32xf32>
    %167 = arith.mulf %166, %166 : vector<8x32xf32>
    %cst_64 = arith.constant dense<0.000000e+00> : vector<8xf32>
    %168 = vector.multi_reduction <add>, %167, %cst_64 [1] : vector<8x32xf32> to vector<8xf32>
    %169 = vector.shape_cast %168 : vector<8xf32> to vector<8x1xf32>
    %cst_65 = arith.constant 3.200000e+01 : f32
    %170 = vector.broadcast %cst_65 : f32 to vector<8x1xf32>
    %171 = arith.divf %169, %170 : vector<8x1xf32>
    %cst_66 = arith.constant 9.99999997E-7 : f32
    %172 = vector.broadcast %cst_66 : f32 to vector<8x1xf32>
    %173 = arith.addf %171, %172 : vector<8x1xf32>
    %174 = math.rsqrt %173 : vector<8x1xf32>
    %175 = vector.broadcast %174 : vector<8x1xf32> to vector<8x32xf32>
    %176 = arith.mulf %166, %175 : vector<8x32xf32>
    %177 = vector.broadcast %159 : vector<1x32xf32> to vector<8x32xf32>
    %178 = arith.mulf %176, %177 : vector<8x32xf32>
    %179 = vector.broadcast %160 : vector<1x32xf32> to vector<8x32xf32>
    %180 = arith.addf %178, %179 : vector<8x32xf32>
    %181 = arith.truncf %180 : vector<8x32xf32> to vector<8x32xbf16>
    %c0_67 = arith.constant 0 : index
    %c0_68 = arith.constant 0 : index
    %182 = vector.load %arg13[%c0_67, %c0_68] : memref<32x64xbf16, #tpu.memory_space<vmem>>, vector<32x64xbf16>
    %cst_69 = arith.constant dense<0.000000e+00> : vector<8x64xf32>
    %183 = tpu.matmul %181, %182, %cst_69 {dimension_numbers = #tpu.dot_dimension_numbers<[1], [0], [0], [1], [0, 0, 1, 1], [], []>} : vector<8x32xbf16>, vector<32x64xbf16>, vector<8x64xf32> -> vector<8x64xf32>
    %c0_70 = arith.constant 0 : index
    %c0_71 = arith.constant 0 : index
    %184 = vector.load %arg14[%c0_70, %c0_71] : memref<1x64xf32, #tpu.memory_space<vmem>>, vector<1x64xf32>
    %185 = vector.broadcast %184 : vector<1x64xf32> to vector<8x64xf32>
    %186 = arith.addf %183, %185 : vector<8x64xf32>
    %187 = arith.negf %186 : vector<8x64xf32>
    %188 = math.exp %187 : vector<8x64xf32>
    %cst_72 = arith.constant 1.000000e+00 : f32
    %189 = vector.broadcast %cst_72 : f32 to vector<8x64xf32>
    %190 = arith.addf %189, %188 : vector<8x64xf32>
    %191 = arith.divf %189, %190 : vector<8x64xf32>
    %192 = arith.mulf %186, %191 : vector<8x64xf32>
    %193 = arith.truncf %192 : vector<8x64xf32> to vector<8x64xbf16>
    %c0_73 = arith.constant 0 : index
    %c0_74 = arith.constant 0 : index
    %194 = vector.load %arg15[%c0_73, %c0_74] : memref<64x32xbf16, #tpu.memory_space<vmem>>, vector<64x32xbf16>
    %cst_75 = arith.constant dense<0.000000e+00> : vector<8x32xf32>
    %195 = tpu.matmul %193, %194, %cst_75 {dimension_numbers = #tpu.dot_dimension_numbers<[1], [0], [0], [1], [0, 0, 1, 1], [], []>} : vector<8x64xbf16>, vector<64x32xbf16>, vector<8x32xf32> -> vector<8x32xf32>
    %c0_76 = arith.constant 0 : index
    %c0_77 = arith.constant 0 : index
    %196 = vector.load %arg16[%c0_76, %c0_77] : memref<1x32xf32, #tpu.memory_space<vmem>>, vector<1x32xf32>
    %197 = vector.broadcast %196 : vector<1x32xf32> to vector<8x32xf32>
    %198 = arith.addf %195, %197 : vector<8x32xf32>
    %199 = arith.addf %158, %198 : vector<8x32xf32>
    %c0_78 = arith.constant 0 : index
    %c0_79 = arith.constant 0 : index
    %200 = vector.load %arg17[%c0_78, %c0_79] : memref<8x32xf32, #tpu.memory_space<vmem>>, vector<8x32xf32>
    tpu.vector_store %arg17[%c0_78, %c0_79], %199 {strides = array<i32>} : memref<8x32xf32, #tpu.memory_space<vmem>>, vector<8x32xf32>,
    return
  }
  func.func @transform_0(%arg0: i32) -> (i32, i32) {
    %c0_i32 = arith.constant 0 : i32
    %c0_i32_0 = arith.constant 0 : i32
    return %arg0, %c0_i32 : i32, i32
  }
  func.func @transform_1(%arg0: i32) -> (i32, i32) {
    %c0_i32 = arith.constant 0 : i32
    %c0_i32_0 = arith.constant 0 : i32
    %c0_i32_1 = arith.constant 0 : i32
    return %c0_i32, %c0_i32_0 : i32, i32
  }
  func.func @transform_2(%arg0: i32) -> (i32, i32) {
    %c0_i32 = arith.constant 0 : i32
    %c0_i32_0 = arith.constant 0 : i32
    %c0_i32_1 = arith.constant 0 : i32
    return %c0_i32, %c0_i32_0 : i32, i32
  }
  func.func @transform_3(%arg0: i32) -> (i32, i32) {
    %c0_i32 = arith.constant 0 : i32
    %c0_i32_0 = arith.constant 0 : i32
    %c0_i32_1 = arith.constant 0 : i32
    return %c0_i32, %c0_i32_0 : i32, i32
  }
  func.func @transform_4(%arg0: i32) -> (i32, i32) {
    %c0_i32 = arith.constant 0 : i32
    %c0_i32_0 = arith.constant 0 : i32
    %c0_i32_1 = arith.constant 0 : i32
    return %c0_i32, %c0_i32_0 : i32, i32
  }
  func.func @transform_5(%arg0: i32) -> (i32, i32) {
    %c0_i32 = arith.constant 0 : i32
    %c0_i32_0 = arith.constant 0 : i32
    %c0_i32_1 = arith.constant 0 : i32
    return %c0_i32, %c0_i32_0 : i32, i32
  }
  func.func @transform_6(%arg0: i32) -> (i32, i32) {
    %c0_i32 = arith.constant 0 : i32
    %c0_i32_0 = arith.constant 0 : i32
    %c0_i32_1 = arith.constant 0 : i32
    return %c0_i32, %c0_i32_0 : i32, i32
  }
  func.func @transform_7(%arg0: i32) -> (i32, i32) {
    %c0_i32 = arith.constant 0 : i32
    %c0_i32_0 = arith.constant 0 : i32
    %c0_i32_1 = arith.constant 0 : i32
    return %c0_i32, %c0_i32_0 : i32, i32
  }
  func.func @transform_8(%arg0: i32) -> (i32, i32) {
    %c0_i32 = arith.constant 0 : i32
    %c0_i32_0 = arith.constant 0 : i32
    %c0_i32_1 = arith.constant 0 : i32
    return %c0_i32, %c0_i32_0 : i32, i32
  }
  func.func @transform_9(%arg0: i32) -> (i32, i32) {
    %c0_i32 = arith.constant 0 : i32
    %c0_i32_0 = arith.constant 0 : i32
    %c0_i32_1 = arith.constant 0 : i32
    return %c0_i32, %c0_i32_0 : i32, i32
  }
  func.func @transform_10(%arg0: i32) -> (i32, i32) {
    %c0_i32 = arith.constant 0 : i32
    %c0_i32_0 = arith.constant 0 : i32
    %c0_i32_1 = arith.constant 0 : i32
    return %c0_i32, %c0_i32_0 : i32, i32
  }
  func.func @transform_11(%arg0: i32) -> (i32, i32) {
    %c0_i32 = arith.constant 0 : i32
    %c0_i32_0 = arith.constant 0 : i32
    %c0_i32_1 = arith.constant 0 : i32
    return %c0_i32, %c0_i32_0 : i32, i32
  }
  func.func @transform_12(%arg0: i32) -> (i32, i32) {
    %c0_i32 = arith.constant 0 : i32
    %c0_i32_0 = arith.constant 0 : i32
    %c0_i32_1 = arith.constant 0 : i32
    return %c0_i32, %c0_i32_0 : i32, i32
  }
  func.func @transform_13(%arg0: i32) -> (i32, i32) {
    %c0_i32 = arith.constant 0 : i32
    %c0_i32_0 = arith.constant 0 : i32
    %c0_i32_1 = arith.constant 0 : i32
    return %c0_i32, %c0_i32_0 : i32, i32
  }
  func.func @transform_14(%arg0: i32) -> (i32, i32) {
    %c0_i32 = arith.constant 0 : i32
    %c0_i32_0 = arith.constant 0 : i32
    %c0_i32_1 = arith.constant 0 : i32
    return %c0_i32, %c0_i32_0 : i32, i32
  }
  func.func @transform_15(%arg0: i32) -> (i32, i32) {
    %c0_i32 = arith.constant 0 : i32
    %c0_i32_0 = arith.constant 0 : i32
    %c0_i32_1 = arith.constant 0 : i32
    return %c0_i32, %c0_i32_0 : i32, i32
  }
  func.func @transform_16(%arg0: i32) -> (i32, i32) {
    %c0_i32 = arith.constant 0 : i32
    %c0_i32_0 = arith.constant 0 : i32
    return %arg0, %c0_i32 : i32, i32
  }
}

module attributes {stable_mosaic.version = 11 : i64} {
  func.func @decoder_block_kernel(%arg0: i32, %arg1: memref<8x32xf32, #tpu.memory_space<vmem>>, %arg2: memref<1x32xf32, #tpu.memory_space<vmem>>, %arg3: memref<1x32xf32, #tpu.memory_space<vmem>>, %arg4: memref<32x96xbf16, #tpu.memory_space<vmem>>, %arg5: memref<1x96xf32, #tpu.memory_space<vmem>>, %arg6: memref<1x32xf32, #tpu.memory_space<vmem>>, %arg7: memref<1x32xf32, #tpu.memory_space<vmem>>, %arg8: memref<32x32xbf16, #tpu.memory_space<vmem>>, %arg9: memref<1x32xf32, #tpu.memory_space<vmem>>, %arg10: memref<1x32xf32, #tpu.memory_space<vmem>>, %arg11: memref<1x32xf32, #tpu.memory_space<vmem>>, %arg12: memref<1x32xf32, #tpu.memory_space<vmem>>, %arg13: memref<32x64xbf16, #tpu.memory_space<vmem>>, %arg14: memref<1x64xf32, #tpu.memory_space<vmem>>, %arg15: memref<64x32xbf16, #tpu.memory_space<vmem>>, %arg16: memref<1x32xf32, #tpu.memory_space<vmem>>, %arg17: memref<8x32xf32, #tpu.memory_space<vmem>>, %arg18: memref<8x32xf32, #tpu.memory_space<vmem>>) attributes {dimension_semantics = [#tpu.dimension_semantics<parallel>], iteration_bounds = array<i64: 2>, scalar_prefetch = 0 : i64, scratch_operands = 1 : i64, tpu.core_type = #tpu.core_type<tc>, window_params = [{transform_indices = @transform_0, window_bounds = array<i64: 8, 32>}, {pipeline_mode = #tpu.pipeline_mode<synchronous>, transform_indices = @transform_1, window_bounds = array<i64: 1, 32>}, {pipeline_mode = #tpu.pipeline_mode<synchronous>, transform_indices = @transform_2, window_bounds = array<i64: 1, 32>}, {pipeline_mode = #tpu.pipeline_mode<synchronous>, transform_indices = @transform_3, window_bounds = array<i64: 32, 96>}, {pipeline_mode = #tpu.pipeline_mode<synchronous>, transform_indices = @transform_4, window_bounds = array<i64: 1, 96>}, {pipeline_mode = #tpu.pipeline_mode<synchronous>, transform_indices = @transform_5, window_bounds = array<i64: 1, 32>}, {pipeline_mode = #tpu.pipeline_mode<synchronous>, transform_indices = @transform_6, window_bounds = array<i64: 1, 32>}, {pipeline_mode = #tpu.pipeline_mode<synchronous>, transform_indices = @transform_7, window_bounds = array<i64: 32, 32>}, {pipeline_mode = #tpu.pipeline_mode<synchronous>, transform_indices = @transform_8, window_bounds = array<i64: 1, 32>}, {pipeline_mode = #tpu.pipeline_mode<synchronous>, transform_indices = @transform_9, window_bounds = array<i64: 1, 32>}, {pipeline_mode = #tpu.pipeline_mode<synchronous>, transform_indices = @transform_10, window_bounds = array<i64: 1, 32>}, {pipeline_mode = #tpu.pipeline_mode<synchronous>, transform_indices = @transform_11, window_bounds = array<i64: 1, 32>}, {pipeline_mode = #tpu.pipeline_mode<synchronous>, transform_indices = @transform_12, window_bounds = array<i64: 32, 64>}, {pipeline_mode = #tpu.pipeline_mode<synchronous>, transform_indices = @transform_13, window_bounds = array<i64: 1, 64>}, {pipeline_mode = #tpu.pipeline_mode<synchronous>, transform_indices = @transform_14, window_bounds = array<i64: 64, 32>}, {pipeline_mode = #tpu.pipeline_mode<synchronous>, transform_indices = @transform_15, window_bounds = array<i64: 1, 32>}, {transform_indices = @transform_16, window_bounds = array<i64: 8, 32>}]} {
    %c0 = arith.constant 0 : index
    %c0_0 = arith.constant 0 : index
    %0 = vector.load %arg1[%c0, %c0_0] : memref<8x32xf32, #tpu.memory_space<vmem>>, vector<8x32xf32>
    %c0_1 = arith.constant 0 : index
    %c0_2 = arith.constant 0 : index
    %1 = vector.load %arg2[%c0_1, %c0_2] : memref<1x32xf32, #tpu.memory_space<vmem>>, vector<1x32xf32>
    %c0_3 = arith.constant 0 : index
    %c0_4 = arith.constant 0 : index
    %2 = vector.load %arg3[%c0_3, %c0_4] : memref<1x32xf32, #tpu.memory_space<vmem>>, vector<1x32xf32>
    %cst = arith.constant dense<0.000000e+00> : vector<8xf32>
    %3 = vector.multi_reduction <add>, %0, %cst [1] : vector<8x32xf32> to vector<8xf32>
    %4 = vector.shape_cast %3 : vector<8xf32> to vector<8x1xf32>
    %cst_5 = arith.constant 3.200000e+01 : f32
    %5 = vector.broadcast %cst_5 : f32 to vector<8x1xf32>
    %6 = arith.divf %4, %5 : vector<8x1xf32>
    %7 = vector.broadcast %6 : vector<8x1xf32> to vector<8x32xf32>
    %8 = arith.subf %0, %7 : vector<8x32xf32>
    %9 = arith.mulf %8, %8 : vector<8x32xf32>
    %cst_6 = arith.constant dense<0.000000e+00> : vector<8xf32>
    %10 = vector.multi_reduction <add>, %9, %cst_6 [1] : vector<8x32xf32> to vector<8xf32>
    %11 = vector.shape_cast %10 : vector<8xf32> to vector<8x1xf32>
    %cst_7 = arith.constant 3.200000e+01 : f32
    %12 = vector.broadcast %cst_7 : f32 to vector<8x1xf32>
    %13 = arith.divf %11, %12 : vector<8x1xf32>
    %cst_8 = arith.constant 9.99999997E-7 : f32
    %14 = vector.broadcast %cst_8 : f32 to vector<8x1xf32>
    %15 = arith.addf %13, %14 : vector<8x1xf32>
    %16 = math.rsqrt %15 : vector<8x1xf32>
    %17 = vector.broadcast %16 : vector<8x1xf32> to vector<8x32xf32>
    %18 = arith.mulf %8, %17 : vector<8x32xf32>
    %19 = vector.broadcast %1 : vector<1x32xf32> to vector<8x32xf32>
    %20 = arith.mulf %18, %19 : vector<8x32xf32>
    %21 = vector.broadcast %2 : vector<1x32xf32> to vector<8x32xf32>
    %22 = arith.addf %20, %21 : vector<8x32xf32>
    %23 = arith.truncf %22 : vector<8x32xf32> to vector<8x32xbf16>
    %c0_9 = arith.constant 0 : index
    %c0_10 = arith.constant 0 : index
    %24 = vector.load %arg4[%c0_9, %c0_10] : memref<32x96xbf16, #tpu.memory_space<vmem>>, vector<32x96xbf16>
    %cst_11 = arith.constant dense<0.000000e+00> : vector<8x96xf32>
    %25 = tpu.matmul %23, %24, %cst_11 {dimension_numbers = #tpu.dot_dimension_numbers<[1], [0], [0], [1], [0, 0, 1, 1], [], []>} : vector<8x32xbf16>, vector<32x96xbf16>, vector<8x96xf32> -> vector<8x96xf32>
    %c0_12 = arith.constant 0 : index
    %c0_13 = arith.constant 0 : index
    %26 = vector.load %arg5[%c0_12, %c0_13] : memref<1x96xf32, #tpu.memory_space<vmem>>, vector<1x96xf32>
    %27 = vector.broadcast %26 : vector<1x96xf32> to vector<8x96xf32>
    %28 = arith.addf %25, %27 : vector<8x96xf32>
    %29 = vector.extract_strided_slice %28 {offsets = [0, 0], sizes = [8, 32], strides = [1, 1]} : vector<8x96xf32> to vector<8x32xf32>
    %c0_14 = arith.constant 0 : index
    %c0_15 = arith.constant 0 : index
    %30 = vector.load %arg6[%c0_14, %c0_15] : memref<1x32xf32, #tpu.memory_space<vmem>>, vector<1x32xf32>
    %31 = arith.mulf %29, %29 : vector<8x32xf32>
    %cst_16 = arith.constant dense<0.000000e+00> : vector<8xf32>
    %32 = vector.multi_reduction <add>, %31, %cst_16 [1] : vector<8x32xf32> to vector<8xf32>
    %33 = vector.shape_cast %32 : vector<8xf32> to vector<8x1xf32>
    %cst_17 = arith.constant 1.000000e-24 : f32
    %34 = vector.broadcast %cst_17 : f32 to vector<8x1xf32>
    %35 = arith.maximumf %33, %34 : vector<8x1xf32>
    %36 = math.rsqrt %35 : vector<8x1xf32>
    %37 = vector.broadcast %36 : vector<8x1xf32> to vector<8x32xf32>
    %38 = arith.mulf %29, %37 : vector<8x32xf32>
    %39 = vector.broadcast %30 : vector<1x32xf32> to vector<8x32xf32>
    %40 = arith.mulf %38, %39 : vector<8x32xf32>
    %cst_18 = arith.constant 5.65685415 : f32
    %41 = vector.broadcast %cst_18 : f32 to vector<8x32xf32>
    %42 = arith.mulf %40, %41 : vector<8x32xf32>
    %cst_19 = arith.constant 0.353553385 : f32
    %43 = vector.broadcast %cst_19 : f32 to vector<8x32xf32>
    %44 = arith.mulf %42, %43 : vector<8x32xf32>
    %45 = vector.extract_strided_slice %28 {offsets = [0, 32], sizes = [8, 32], strides = [1, 1]} : vector<8x96xf32> to vector<8x32xf32>
    %c0_20 = arith.constant 0 : index
    %c0_21 = arith.constant 0 : index
    %46 = vector.load %arg7[%c0_20, %c0_21] : memref<1x32xf32, #tpu.memory_space<vmem>>, vector<1x32xf32>
    %47 = arith.mulf %45, %45 : vector<8x32xf32>
    %cst_22 = arith.constant dense<0.000000e+00> : vector<8xf32>
    %48 = vector.multi_reduction <add>, %47, %cst_22 [1] : vector<8x32xf32> to vector<8xf32>
    %49 = vector.shape_cast %48 : vector<8xf32> to vector<8x1xf32>
    %cst_23 = arith.constant 1.000000e-24 : f32
    %50 = vector.broadcast %cst_23 : f32 to vector<8x1xf32>
    %51 = arith.maximumf %49, %50 : vector<8x1xf32>
    %52 = math.rsqrt %51 : vector<8x1xf32>
    %53 = vector.broadcast %52 : vector<8x1xf32> to vector<8x32xf32>
    %54 = arith.mulf %45, %53 : vector<8x32xf32>
    %55 = vector.broadcast %46 : vector<1x32xf32> to vector<8x32xf32>
    %56 = arith.mulf %54, %55 : vector<8x32xf32>
    %cst_24 = arith.constant 5.65685415 : f32
    %57 = vector.broadcast %cst_24 : f32 to vector<8x32xf32>
    %58 = arith.mulf %56, %57 : vector<8x32xf32>
    %59 = vector.extract_strided_slice %28 {offsets = [0, 64], sizes = [8, 32], strides = [1, 1]} : vector<8x96xf32> to vector<8x32xf32>
    %60 = vector.shape_cast %44 : vector<8x32xf32> to vector<1x8x32xf32>
    %61 = arith.truncf %60 : vector<1x8x32xf32> to vector<1x8x32xbf16>
    %62 = vector.shape_cast %58 : vector<8x32xf32> to vector<1x8x32xf32>
    %63 = arith.truncf %62 : vector<1x8x32xf32> to vector<1x8x32xbf16>
    %64 = vector.shape_cast %59 : vector<8x32xf32> to vector<1x8x32xf32>
    %65 = arith.truncf %64 : vector<1x8x32xf32> to vector<1x8x32xbf16>
    %66 = vector.extract_strided_slice %61 {offsets = [0, 0, 0], sizes = [1, 8, 8], strides = [1, 1, 1]} : vector<1x8x32xbf16> to vector<1x8x8xbf16>
    %67 = vector.extract_strided_slice %63 {offsets = [0, 0, 0], sizes = [1, 8, 8], strides = [1, 1, 1]} : vector<1x8x32xbf16> to vector<1x8x8xbf16>
    %68 = vector.extract_strided_slice %65 {offsets = [0, 0, 0], sizes = [1, 8, 8], strides = [1, 1, 1]} : vector<1x8x32xbf16> to vector<1x8x8xbf16>
    "tpu.trace_start"() <{level = 10 : i32, message = "bqd,bkd->bqk"}> : () -> ()
    %cst_25 = arith.constant dense<0.000000e+00> : vector<1x8x8xf32>
    %69 = tpu.matmul %66, %67, %cst_25 {dimension_numbers = #tpu.dot_dimension_numbers<[2], [2], [1], [1], [0, 0, 0, 1, 1, 1], [0], [0]>} : vector<1x8x8xbf16>, vector<1x8x8xbf16>, vector<1x8x8xf32> -> vector<1x8x8xf32>
    "tpu.trace_stop"() : () -> ()
    %cst_26 = arith.constant dense<0xFF800000> : vector<1x8xf32>
    %70 = vector.multi_reduction <maximumf>, %69, %cst_26 [2] : vector<1x8x8xf32> to vector<1x8xf32>
    %71 = vector.shape_cast %70 : vector<1x8xf32> to vector<1x8x1xf32>
    %72 = vector.broadcast %71 : vector<1x8x1xf32> to vector<1x8x8xf32>
    %73 = arith.subf %69, %72 : vector<1x8x8xf32>
    %74 = math.exp %73 : vector<1x8x8xf32>
    %cst_27 = arith.constant dense<0.000000e+00> : vector<1x8xf32>
    %75 = vector.multi_reduction <add>, %74, %cst_27 [2] : vector<1x8x8xf32> to vector<1x8xf32>
    %76 = vector.shape_cast %75 : vector<1x8xf32> to vector<1x8x1xf32>
    %77 = tpu.reciprocal %76 {approx = true} : vector<1x8x1xf32> -> vector<1x8x1xf32>
    %78 = vector.broadcast %77 : vector<1x8x1xf32> to vector<1x8x8xf32>
    %79 = arith.mulf %74, %78 : vector<1x8x8xf32>
    %80 = arith.truncf %79 : vector<1x8x8xf32> to vector<1x8x8xbf16>
    "tpu.trace_start"() <{level = 10 : i32, message = "bqk,bkd->bqd"}> : () -> ()
    %cst_28 = arith.constant dense<0.000000e+00> : vector<1x8x8xf32>
    %81 = tpu.matmul %80, %68, %cst_28 {dimension_numbers = #tpu.dot_dimension_numbers<[2], [1], [1], [2], [0, 0, 0, 1, 1, 2], [0], [0]>} : vector<1x8x8xbf16>, vector<1x8x8xbf16>, vector<1x8x8xf32> -> vector<1x8x8xf32>
    "tpu.trace_stop"() : () -> ()
    %82 = vector.shape_cast %81 : vector<1x8x8xf32> to vector<8x8xf32>
    %c0_29 = arith.constant 0 : index
    %c0_30 = arith.constant 0 : index
    %83 = vector.load %arg18[%c0_29, %c0_30] : memref<8x32xf32, #tpu.memory_space<vmem>>, vector<8x8xf32>
    tpu.vector_store %arg18[%c0_29, %c0_30], %82 {strides = array<i32>} : memref<8x32xf32, #tpu.memory_space<vmem>>, vector<8x8xf32>,
    %84 = vector.extract_strided_slice %61 {offsets = [0, 0, 8], sizes = [1, 8, 8], strides = [1, 1, 1]} : vector<1x8x32xbf16> to vector<1x8x8xbf16>
    %85 = vector.extract_strided_slice %63 {offsets = [0, 0, 8], sizes = [1, 8, 8], strides = [1, 1, 1]} : vector<1x8x32xbf16> to vector<1x8x8xbf16>
    %86 = vector.extract_strided_slice %65 {offsets = [0, 0, 8], sizes = [1, 8, 8], strides = [1, 1, 1]} : vector<1x8x32xbf16> to vector<1x8x8xbf16>
    "tpu.trace_start"() <{level = 10 : i32, message = "bqd,bkd->bqk"}> : () -> ()
    %cst_31 = arith.constant dense<0.000000e+00> : vector<1x8x8xf32>
    %87 = tpu.matmul %84, %85, %cst_31 {dimension_numbers = #tpu.dot_dimension_numbers<[2], [2], [1], [1], [0, 0, 0, 1, 1, 1], [0], [0]>} : vector<1x8x8xbf16>, vector<1x8x8xbf16>, vector<1x8x8xf32> -> vector<1x8x8xf32>
    "tpu.trace_stop"() : () -> ()
    %cst_32 = arith.constant dense<0xFF800000> : vector<1x8xf32>
    %88 = vector.multi_reduction <maximumf>, %87, %cst_32 [2] : vector<1x8x8xf32> to vector<1x8xf32>
    %89 = vector.shape_cast %88 : vector<1x8xf32> to vector<1x8x1xf32>
    %90 = vector.broadcast %89 : vector<1x8x1xf32> to vector<1x8x8xf32>
    %91 = arith.subf %87, %90 : vector<1x8x8xf32>
    %92 = math.exp %91 : vector<1x8x8xf32>
    %cst_33 = arith.constant dense<0.000000e+00> : vector<1x8xf32>
    %93 = vector.multi_reduction <add>, %92, %cst_33 [2] : vector<1x8x8xf32> to vector<1x8xf32>
    %94 = vector.shape_cast %93 : vector<1x8xf32> to vector<1x8x1xf32>
    %95 = tpu.reciprocal %94 {approx = true} : vector<1x8x1xf32> -> vector<1x8x1xf32>
    %96 = vector.broadcast %95 : vector<1x8x1xf32> to vector<1x8x8xf32>
    %97 = arith.mulf %92, %96 : vector<1x8x8xf32>
    %98 = arith.truncf %97 : vector<1x8x8xf32> to vector<1x8x8xbf16>
    "tpu.trace_start"() <{level = 10 : i32, message = "bqk,bkd->bqd"}> : () -> ()
    %cst_34 = arith.constant dense<0.000000e+00> : vector<1x8x8xf32>
    %99 = tpu.matmul %98, %86, %cst_34 {dimension_numbers = #tpu.dot_dimension_numbers<[2], [1], [1], [2], [0, 0, 0, 1, 1, 2], [0], [0]>} : vector<1x8x8xbf16>, vector<1x8x8xbf16>, vector<1x8x8xf32> -> vector<1x8x8xf32>
    "tpu.trace_stop"() : () -> ()
    %100 = vector.shape_cast %99 : vector<1x8x8xf32> to vector<8x8xf32>
    %c0_35 = arith.constant 0 : index
    %c8 = arith.constant 8 : index
    %101 = vector.load %arg18[%c0_35, %c8] : memref<8x32xf32, #tpu.memory_space<vmem>>, vector<8x8xf32>
    tpu.vector_store %arg18[%c0_35, %c8], %100 {strides = array<i32>} : memref<8x32xf32, #tpu.memory_space<vmem>>, vector<8x8xf32>,
    %102 = vector.extract_strided_slice %61 {offsets = [0, 0, 16], sizes = [1, 8, 8], strides = [1, 1, 1]} : vector<1x8x32xbf16> to vector<1x8x8xbf16>
    %103 = vector.extract_strided_slice %63 {offsets = [0, 0, 16], sizes = [1, 8, 8], strides = [1, 1, 1]} : vector<1x8x32xbf16> to vector<1x8x8xbf16>
    %104 = vector.extract_strided_slice %65 {offsets = [0, 0, 16], sizes = [1, 8, 8], strides = [1, 1, 1]} : vector<1x8x32xbf16> to vector<1x8x8xbf16>
    "tpu.trace_start"() <{level = 10 : i32, message = "bqd,bkd->bqk"}> : () -> ()
    %cst_36 = arith.constant dense<0.000000e+00> : vector<1x8x8xf32>
    %105 = tpu.matmul %102, %103, %cst_36 {dimension_numbers = #tpu.dot_dimension_numbers<[2], [2], [1], [1], [0, 0, 0, 1, 1, 1], [0], [0]>} : vector<1x8x8xbf16>, vector<1x8x8xbf16>, vector<1x8x8xf32> -> vector<1x8x8xf32>
    "tpu.trace_stop"() : () -> ()
    %cst_37 = arith.constant dense<0xFF800000> : vector<1x8xf32>
    %106 = vector.multi_reduction <maximumf>, %105, %cst_37 [2] : vector<1x8x8xf32> to vector<1x8xf32>
    %107 = vector.shape_cast %106 : vector<1x8xf32> to vector<1x8x1xf32>
    %108 = vector.broadcast %107 : vector<1x8x1xf32> to vector<1x8x8xf32>
    %109 = arith.subf %105, %108 : vector<1x8x8xf32>
    %110 = math.exp %109 : vector<1x8x8xf32>
    %cst_38 = arith.constant dense<0.000000e+00> : vector<1x8xf32>
    %111 = vector.multi_reduction <add>, %110, %cst_38 [2] : vector<1x8x8xf32> to vector<1x8xf32>
    %112 = vector.shape_cast %111 : vector<1x8xf32> to vector<1x8x1xf32>
    %113 = tpu.reciprocal %112 {approx = true} : vector<1x8x1xf32> -> vector<1x8x1xf32>
    %114 = vector.broadcast %113 : vector<1x8x1xf32> to vector<1x8x8xf32>
    %115 = arith.mulf %110, %114 : vector<1x8x8xf32>
    %116 = arith.truncf %115 : vector<1x8x8xf32> to vector<1x8x8xbf16>
    "tpu.trace_start"() <{level = 10 : i32, message = "bqk,bkd->bqd"}> : () -> ()
    %cst_39 = arith.constant dense<0.000000e+00> : vector<1x8x8xf32>
    %117 = tpu.matmul %116, %104, %cst_39 {dimension_numbers = #tpu.dot_dimension_numbers<[2], [1], [1], [2], [0, 0, 0, 1, 1, 2], [0], [0]>} : vector<1x8x8xbf16>, vector<1x8x8xbf16>, vector<1x8x8xf32> -> vector<1x8x8xf32>
    "tpu.trace_stop"() : () -> ()
    %118 = vector.shape_cast %117 : vector<1x8x8xf32> to vector<8x8xf32>
    %c0_40 = arith.constant 0 : index
    %c16 = arith.constant 16 : index
    %119 = vector.load %arg18[%c0_40, %c16] : memref<8x32xf32, #tpu.memory_space<vmem>>, vector<8x8xf32>
    tpu.vector_store %arg18[%c0_40, %c16], %118 {strides = array<i32>} : memref<8x32xf32, #tpu.memory_space<vmem>>, vector<8x8xf32>,
    %120 = vector.extract_strided_slice %61 {offsets = [0, 0, 24], sizes = [1, 8, 8], strides = [1, 1, 1]} : vector<1x8x32xbf16> to vector<1x8x8xbf16>
    %121 = vector.extract_strided_slice %63 {offsets = [0, 0, 24], sizes = [1, 8, 8], strides = [1, 1, 1]} : vector<1x8x32xbf16> to vector<1x8x8xbf16>
    %122 = vector.extract_strided_slice %65 {offsets = [0, 0, 24], sizes = [1, 8, 8], strides = [1, 1, 1]} : vector<1x8x32xbf16> to vector<1x8x8xbf16>
    "tpu.trace_start"() <{level = 10 : i32, message = "bqd,bkd->bqk"}> : () -> ()
    %cst_41 = arith.constant dense<0.000000e+00> : vector<1x8x8xf32>
    %123 = tpu.matmul %120, %121, %cst_41 {dimension_numbers = #tpu.dot_dimension_numbers<[2], [2], [1], [1], [0, 0, 0, 1, 1, 1], [0], [0]>} : vector<1x8x8xbf16>, vector<1x8x8xbf16>, vector<1x8x8xf32> -> vector<1x8x8xf32>
    "tpu.trace_stop"() : () -> ()
    %cst_42 = arith.constant dense<0xFF800000> : vector<1x8xf32>
    %124 = vector.multi_reduction <maximumf>, %123, %cst_42 [2] : vector<1x8x8xf32> to vector<1x8xf32>
    %125 = vector.shape_cast %124 : vector<1x8xf32> to vector<1x8x1xf32>
    %126 = vector.broadcast %125 : vector<1x8x1xf32> to vector<1x8x8xf32>
    %127 = arith.subf %123, %126 : vector<1x8x8xf32>
    %128 = math.exp %127 : vector<1x8x8xf32>
    %cst_43 = arith.constant dense<0.000000e+00> : vector<1x8xf32>
    %129 = vector.multi_reduction <add>, %128, %cst_43 [2] : vector<1x8x8xf32> to vector<1x8xf32>
    %130 = vector.shape_cast %129 : vector<1x8xf32> to vector<1x8x1xf32>
    %131 = tpu.reciprocal %130 {approx = true} : vector<1x8x1xf32> -> vector<1x8x1xf32>
    %132 = vector.broadcast %131 : vector<1x8x1xf32> to vector<1x8x8xf32>
    %133 = arith.mulf %128, %132 : vector<1x8x8xf32>
    %134 = arith.truncf %133 : vector<1x8x8xf32> to vector<1x8x8xbf16>
    "tpu.trace_start"() <{level = 10 : i32, message = "bqk,bkd->bqd"}> : () -> ()
    %cst_44 = arith.constant dense<0.000000e+00> : vector<1x8x8xf32>
    %135 = tpu.matmul %134, %122, %cst_44 {dimension_numbers = #tpu.dot_dimension_numbers<[2], [1], [1], [2], [0, 0, 0, 1, 1, 2], [0], [0]>} : vector<1x8x8xbf16>, vector<1x8x8xbf16>, vector<1x8x8xf32> -> vector<1x8x8xf32>
    "tpu.trace_stop"() : () -> ()
    %136 = vector.shape_cast %135 : vector<1x8x8xf32> to vector<8x8xf32>
    %c0_45 = arith.constant 0 : index
    %c24 = arith.constant 24 : index
    %137 = vector.load %arg18[%c0_45, %c24] : memref<8x32xf32, #tpu.memory_space<vmem>>, vector<8x8xf32>
    tpu.vector_store %arg18[%c0_45, %c24], %136 {strides = array<i32>} : memref<8x32xf32, #tpu.memory_space<vmem>>, vector<8x8xf32>,
    %c0_46 = arith.constant 0 : index
    %c0_47 = arith.constant 0 : index
    %138 = vector.load %arg18[%c0_46, %c0_47] : memref<8x32xf32, #tpu.memory_space<vmem>>, vector<8x32xf32>
    %139 = arith.truncf %138 : vector<8x32xf32> to vector<8x32xbf16>
    %c0_48 = arith.constant 0 : index
    %c0_49 = arith.constant 0 : index
    %140 = vector.load %arg8[%c0_48, %c0_49] : memref<32x32xbf16, #tpu.memory_space<vmem>>, vector<32x32xbf16>
    %cst_50 = arith.constant dense<0.000000e+00> : vector<8x32xf32>
    %141 = tpu.matmul %139, %140, %cst_50 {dimension_numbers = #tpu.dot_dimension_numbers<[1], [0], [0], [1], [0, 0, 1, 1], [], []>} : vector<8x32xbf16>, vector<32x32xbf16>, vector<8x32xf32> -> vector<8x32xf32>
    %c0_51 = arith.constant 0 : index
    %c0_52 = arith.constant 0 : index
    %142 = vector.load %arg9[%c0_51, %c0_52] : memref<1x32xf32, #tpu.memory_space<vmem>>, vector<1x32xf32>
    %143 = vector.broadcast %142 : vector<1x32xf32> to vector<8x32xf32>
    %144 = arith.addf %141, %143 : vector<8x32xf32>
    %c0_53 = arith.constant 0 : index
    %c0_54 = arith.constant 0 : index
    %145 = vector.load %arg10[%c0_53, %c0_54] : memref<1x32xf32, #tpu.memory_space<vmem>>, vector<1x32xf32>
    %146 = arith.mulf %144, %144 : vector<8x32xf32>
    %cst_55 = arith.constant dense<0.000000e+00> : vector<8xf32>
    %147 = vector.multi_reduction <add>, %146, %cst_55 [1] : vector<8x32xf32> to vector<8xf32>
    %148 = vector.shape_cast %147 : vector<8xf32> to vector<8x1xf32>
    %cst_56 = arith.constant 1.000000e-24 : f32
    %149 = vector.broadcast %cst_56 : f32 to vector<8x1xf32>
    %150 = arith.maximumf %148, %149 : vector<8x1xf32>
    %151 = math.rsqrt %150 : vector<8x1xf32>
    %152 = vector.broadcast %151 : vector<8x1xf32> to vector<8x32xf32>
    %153 = arith.mulf %144, %152 : vector<8x32xf32>
    %154 = vector.broadcast %145 : vector<1x32xf32> to vector<8x32xf32>
    %155 = arith.mulf %153, %154 : vector<8x32xf32>
    %cst_57 = arith.constant 5.65685415 : f32
    %156 = vector.broadcast %cst_57 : f32 to vector<8x32xf32>
    %157 = arith.mulf %155, %156 : vector<8x32xf32>
    %158 = arith.addf %0, %157 : vector<8x32xf32>
    %c0_58 = arith.constant 0 : index
    %c0_59 = arith.constant 0 : index
    %159 = vector.load %arg11[%c0_58, %c0_59] : memref<1x32xf32, #tpu.memory_space<vmem>>, vector<1x32xf32>
    %c0_60 = arith.constant 0 : index
    %c0_61 = arith.constant 0 : index
    %160 = vector.load %arg12[%c0_60, %c0_61] : memref<1x32xf32, #tpu.memory_space<vmem>>, vector<1x32xf32>
    %cst_62 = arith.constant dense<0.000000e+00> : vector<8xf32>
    %161 = vector.multi_reduction <add>, %158, %cst_62 [1] : vector<8x32xf32> to vector<8xf32>
    %162 = vector.shape_cast %161 : vector<8xf32> to vector<8x1xf32>
    %cst_63 = arith.constant 3.200000e+01 : f32
    %163 = vector.broadcast %cst_63 : f32 to vector<8x1xf32>
    %164 = arith.divf %162, %163 : vector<8x1xf32>
    %165 = vector.broadcast %164 : vector<8x1xf32> to vector<8x32xf32>
    %166 = arith.subf %158, %165 : vector<8x32xf32>
    %167 = arith.mulf %166, %166 : vector<8x32xf32>
    %cst_64 = arith.constant dense<0.000000e+00> : vector<8xf32>
    %168 = vector.multi_reduction <add>, %167, %cst_64 [1] : vector<8x32xf32> to vector<8xf32>
    %169 = vector.shape_cast %168 : vector<8xf32> to vector<8x1xf32>
    %cst_65 = arith.constant 3.200000e+01 : f32
    %170 = vector.broadcast %cst_65 : f32 to vector<8x1xf32>
    %171 = arith.divf %169, %170 : vector<8x1xf32>
    %cst_66 = arith.constant 9.99999997E-7 : f32
    %172 = vector.broadcast %cst_66 : f32 to vector<8x1xf32>
    %173 = arith.addf %171, %172 : vector<8x1xf32>
    %174 = math.rsqrt %173 : vector<8x1xf32>
    %175 = vector.broadcast %174 : vector<8x1xf32> to vector<8x32xf32>
    %176 = arith.mulf %166, %175 : vector<8x32xf32>
    %177 = vector.broadcast %159 : vector<1x32xf32> to vector<8x32xf32>
    %178 = arith.mulf %176, %177 : vector<8x32xf32>
    %179 = vector.broadcast %160 : vector<1x32xf32> to vector<8x32xf32>
    %180 = arith.addf %178, %179 : vector<8x32xf32>
    %181 = arith.truncf %180 : vector<8x32xf32> to vector<8x32xbf16>
    %c0_67 = arith.constant 0 : index
    %c0_68 = arith.constant 0 : index
    %182 = vector.load %arg13[%c0_67, %c0_68] : memref<32x64xbf16, #tpu.memory_space<vmem>>, vector<32x64xbf16>
    %cst_69 = arith.constant dense<0.000000e+00> : vector<8x64xf32>
    %183 = tpu.matmul %181, %182, %cst_69 {dimension_numbers = #tpu.dot_dimension_numbers<[1], [0], [0], [1], [0, 0, 1, 1], [], []>} : vector<8x32xbf16>, vector<32x64xbf16>, vector<8x64xf32> -> vector<8x64xf32>
    %c0_70 = arith.constant 0 : index
    %c0_71 = arith.constant 0 : index
    %184 = vector.load %arg14[%c0_70, %c0_71] : memref<1x64xf32, #tpu.memory_space<vmem>>, vector<1x64xf32>
    %185 = vector.broadcast %184 : vector<1x64xf32> to vector<8x64xf32>
    %186 = arith.addf %183, %185 : vector<8x64xf32>
    %187 = arith.negf %186 : vector<8x64xf32>
    %188 = math.exp %187 : vector<8x64xf32>
    %cst_72 = arith.constant 1.000000e+00 : f32
    %189 = vector.broadcast %cst_72 : f32 to vector<8x64xf32>
    %190 = arith.addf %189, %188 : vector<8x64xf32>
    %191 = arith.divf %189, %190 : vector<8x64xf32>
    %192 = arith.mulf %186, %191 : vector<8x64xf32>
    %193 = arith.truncf %192 : vector<8x64xf32> to vector<8x64xbf16>
    %c0_73 = arith.constant 0 : index
    %c0_74 = arith.constant 0 : index
    %194 = vector.load %arg15[%c0_73, %c0_74] : memref<64x32xbf16, #tpu.memory_space<vmem>>, vector<64x32xbf16>
    %cst_75 = arith.constant dense<0.000000e+00> : vector<8x32xf32>
    %195 = tpu.matmul %193, %194, %cst_75 {dimension_numbers = #tpu.dot_dimension_numbers<[1], [0], [0], [1], [0, 0, 1, 1], [], []>} : vector<8x64xbf16>, vector<64x32xbf16>, vector<8x32xf32> -> vector<8x32xf32>
    %c0_76 = arith.constant 0 : index
    %c0_77 = arith.constant 0 : index
    %196 = vector.load %arg16[%c0_76, %c0_77] : memref<1x32xf32, #tpu.memory_space<vmem>>, vector<1x32xf32>
    %197 = vector.broadcast %196 : vector<1x32xf32> to vector<8x32xf32>
    %198 = arith.addf %195, %197 : vector<8x32xf32>
    %199 = arith.addf %158, %198 : vector<8x32xf32>
    %c0_78 = arith.constant 0 : index
    %c0_79 = arith.constant 0 : index
    %200 = vector.load %arg17[%c0_78, %c0_79] : memref<8x32xf32, #tpu.memory_space<vmem>>, vector<8x32xf32>
    tpu.vector_store %arg17[%c0_78, %c0_79], %199 {strides = array<i32>} : memref<8x32xf32, #tpu.memory_space<vmem>>, vector<8x32xf32>,
    return
  }
  func.func @transform_0(%arg0: i32) -> (i32, i32) {
    %c0_i32 = arith.constant 0 : i32
    %c0_i32_0 = arith.constant 0 : i32
    return %arg0, %c0_i32 : i32, i32
  }
  func.func @transform_1(%arg0: i32) -> (i32, i32) {
    %c0_i32 = arith.constant 0 : i32
    %c0_i32_0 = arith.constant 0 : i32
    %c0_i32_1 = arith.constant 0 : i32
    return %c0_i32, %c0_i32_0 : i32, i32
  }
  func.func @transform_2(%arg0: i32) -> (i32, i32) {
    %c0_i32 = arith.constant 0 : i32
    %c0_i32_0 = arith.constant 0 : i32
    %c0_i32_1 = arith.constant 0 : i32
    return %c0_i32, %c0_i32_0 : i32, i32
  }
  func.func @transform_3(%arg0: i32) -> (i32, i32) {
    %c0_i32 = arith.constant 0 : i32
    %c0_i32_0 = arith.constant 0 : i32
    %c0_i32_1 = arith.constant 0 : i32
    return %c0_i32, %c0_i32_0 : i32, i32
  }
  func.func @transform_4(%arg0: i32) -> (i32, i32) {
    %c0_i32 = arith.constant 0 : i32
    %c0_i32_0 = arith.constant 0 : i32
    %c0_i32_1 = arith.constant 0 : i32
    return %c0_i32, %c0_i32_0 : i32, i32
  }
  func.func @transform_5(%arg0: i32) -> (i32, i32) {
    %c0_i32 = arith.constant 0 : i32
    %c0_i32_0 = arith.constant 0 : i32
    %c0_i32_1 = arith.constant 0 : i32
    return %c0_i32, %c0_i32_0 : i32, i32
  }
  func.func @transform_6(%arg0: i32) -> (i32, i32) {
    %c0_i32 = arith.constant 0 : i32
    %c0_i32_0 = arith.constant 0 : i32
    %c0_i32_1 = arith.constant 0 : i32
    return %c0_i32, %c0_i32_0 : i32, i32
  }
  func.func @transform_7(%arg0: i32) -> (i32, i32) {
    %c0_i32 = arith.constant 0 : i32
    %c0_i32_0 = arith.constant 0 : i32
    %c0_i32_1 = arith.constant 0 : i32
    return %c0_i32, %c0_i32_0 : i32, i32
  }
  func.func @transform_8(%arg0: i32) -> (i32, i32) {
    %c0_i32 = arith.constant 0 : i32
    %c0_i32_0 = arith.constant 0 : i32
    %c0_i32_1 = arith.constant 0 : i32
    return %c0_i32, %c0_i32_0 : i32, i32
  }
  func.func @transform_9(%arg0: i32) -> (i32, i32) {
    %c0_i32 = arith.constant 0 : i32
    %c0_i32_0 = arith.constant 0 : i32
    %c0_i32_1 = arith.constant 0 : i32
    return %c0_i32, %c0_i32_0 : i32, i32
  }
  func.func @transform_10(%arg0: i32) -> (i32, i32) {
    %c0_i32 = arith.constant 0 : i32
    %c0_i32_0 = arith.constant 0 : i32
    %c0_i32_1 = arith.constant 0 : i32
    return %c0_i32, %c0_i32_0 : i32, i32
  }
  func.func @transform_11(%arg0: i32) -> (i32, i32) {
    %c0_i32 = arith.constant 0 : i32
    %c0_i32_0 = arith.constant 0 : i32
    %c0_i32_1 = arith.constant 0 : i32
    return %c0_i32, %c0_i32_0 : i32, i32
  }
  func.func @transform_12(%arg0: i32) -> (i32, i32) {
    %c0_i32 = arith.constant 0 : i32
    %c0_i32_0 = arith.constant 0 : i32
    %c0_i32_1 = arith.constant 0 : i32
    return %c0_i32, %c0_i32_0 : i32, i32
  }
  func.func @transform_13(%arg0: i32) -> (i32, i32) {
    %c0_i32 = arith.constant 0 : i32
    %c0_i32_0 = arith.constant 0 : i32
    %c0_i32_1 = arith.constant 0 : i32
    return %c0_i32, %c0_i32_0 : i32, i32
  }
  func.func @transform_14(%arg0: i32) -> (i32, i32) {
    %c0_i32 = arith.constant 0 : i32
    %c0_i32_0 = arith.constant 0 : i32
    %c0_i32_1 = arith.constant 0 : i32
    return %c0_i32, %c0_i32_0 : i32, i32
  }
  func.func @transform_15(%arg0: i32) -> (i32, i32) {
    %c0_i32 = arith.constant 0 : i32
    %c0_i32_0 = arith.constant 0 : i32
    %c0_i32_1 = arith.constant 0 : i32
    return %c0_i32, %c0_i32_0 : i32, i32
  }
  func.func @transform_16(%arg0: i32) -> (i32, i32) {
    %c0_i32 = arith.constant 0 : i32
    %c0_i32_0 = arith.constant 0 : i32
    return %arg0, %c0_i32 : i32, i32
  }
}

</mosaic_0001>

<bundles_post_ra>
// kernel: tpu_custom_call.1
= control target key start
LH: loop header
LB: loop body
LE: loop exit
PB: predicated region body
PF: predicated region fallthrough
CT: control target
= control target key end

     0   :  { %s2604_s0 = inlined_call_operand.vmem [shape: f32[16,32], index: 0, kind: input, shape index: {}]   ;;  %s2605_s1 = inlined_call_operand.vmem [shape: f32[1,32], index: 1, kind: input, shape index: {}]   ;;  %s2606_s2 = inlined_call_operand.vmem [shape: f32[1,32], index: 2, kind: input, shape index: {}]   ;;  %s2607_s3 = inlined_call_operand.vmem [shape: bf16[32,96], index: 3, kind: input, shape index: {}]   ;;  %s2608_s4 = inlined_call_operand.hbm [shape: f32[1,96], index: 4, kind: input, shape index: {}]   ;;  %s2609_s5 = inlined_call_operand.hbm [shape: f32[1,32], index: 5, kind: input, shape index: {}]   ;;  %s2610_s6 = inlined_call_operand.hbm [shape: f32[1,32], index: 6, kind: input, shape index: {}]   ;;  %s2611_s7 = inlined_call_operand.vmem [shape: bf16[32,32], index: 7, kind: input, shape index: {}]   ;;  %s2612_s8 = inlined_call_operand.hbm [shape: f32[1,32], index: 8, kind: input, shape index: {}]   ;;  %s2613_s9 = inlined_call_operand.hbm [shape: f32[1,32], index: 9, kind: input, shape index: {}]   ;;  %s2614_s10 = inlined_call_operand.vmem [shape: f32[1,32], index: 10, kind: input, shape index: {}]   ;;  %s2615_s11 = inlined_call_operand.vmem [shape: f32[1,32], index: 11, kind: input, shape index: {}]   ;;  %s2616_s12 = inlined_call_operand.vmem [shape: bf16[32,64], index: 12, kind: input, shape index: {}]   ;;  %s2617_s13 = inlined_call_operand.vmem [shape: f32[1,64], index: 13, kind: input, shape index: {}]   ;;  %s2618_s14 = inlined_call_operand.vmem [shape: bf16[64,32], index: 14, kind: input, shape index: {}]   ;;  %s2619_s15 = inlined_call_operand.vmem [shape: f32[1,32], index: 15, kind: input, shape index: {}]   ;;  %s2620_s16 = inlined_call_operand.hbm [shape: f32[16,32], index: 16, kind: output, shape index: {}]  }
   0x1   :  { %2633 = sst [smem:[#allocation24_spill]] %s2604_s0 }
   0x2   :  { %2634 = sst [smem:[#allocation25_spill]] %s2609_s5 }
   0x3   :  { %2635 = sst [smem:[#allocation26_spill]] %s2619_s15 }
   0x4   :  { %2636 = sst [smem:[#allocation27_spill]] %s2620_s16 }
   0x5   :  { %21 = vsyncpa [#allocation4], 0 }
   0x6   :  { %22 = vsyncpa [#allocation7], 0 }
   0x7   :  { %23 = vsyncpa [#allocation10], 0 }
   0x8   :  { %24 = vsyncpa [#allocation5], 0 }
   0x9   :  { %26 = vsyncpa [#allocation5 + $0x1], 0  ;;  %s2219_s21 = smov 0   ;;  %s2221_s22 = smov 0  }
   0xa   :  { %s2223_s23 = smov 0   ;;  %s2225_s24 = smov 0  }
   0xb LB: > { %2637 = sst [smem:[#allocation17_spill]] %s2097_s21  ;;  %s2240_s25 = sadd.s32 4294967295, %s2109_s24   ;;  %s2109_s24 = sphi %s2225_s24, %s2667_s24   ;;  %s2105_s23 = sphi %s2223_s23, %s2669_s23   ;;  %s2101_s22 = sphi %s2221_s22, %s2671_s22   ;;  %s2097_s21 = sphi %s2219_s21, %s2670_s21  }
   0xc   : > { %2638 = sst [smem:[#allocation18_spill]] %s2105_s23  ;;  %s1580_s26 = sadd.s32 4294967294, %s2109_s24  }
   0xd   : > { %2639 = sst [smem:[#allocation19_spill]] %s2109_s24  ;;  %s2244_s27 = sadd.s32 1, %s2109_s24  }
   0xe   : > { %2640 = sst [smem:[#allocation20_spill]] %s2244_s27  ;;  %s380_s28 = sadd.s32 1, %s2105_s23 }
   0xf   : > { %s377_s29 = ssub.s32 %s2109_s24, %s2244_s27  ;;  %p390_p0 = scmp.ne.s32.totalorder %s2105_s23, %s2101_s22 }
  0x10   : > { %p378_p1 = scmp.eq.s32.totalorder %s377_s29, 0  ;;  %p391_p2 = scmp.eq.s32.totalorder %s2240_s25, 1 }
  0x11   : > { %p396_p3 = scmp.ne.s32.totalorder %s2101_s22, %s2097_s21  ;;  %p397_p4 = scmp.eq.s32.totalorder %s1580_s26, 1 }
  0x12   : > { %s2255_s30 = scalar_select %p378_p1, %s2105_s23, %s380_s28  }
  0x13   : > { %p2257_p5 = por %p391_p2, %p390_p0  ;;  %p2261_p6 = por %p397_p4, %p396_p3 }
  0x14   : > { %2641 = sst [smem:[#allocation21_spill]] %s2255_s30  ;;  %p1581_p7 = scmp.ge.s32.totalorder %s2109_s24, 1 }
  0x15   : > { %s2642_s0 = scalar_select %p2257_p5, 1, 0 }
  0x16   : > { %s2644_s17 = scalar_select %p2261_p6, 1, 0 }
  0x17   : > { %2643 = sst [smem:[#allocation22_spill]] %s2642_s0  ;;  %p404_p8 = scmp.lt.s32.totalorder %s2109_s24, 3 }
  0x18   : > { %2645 = sst [smem:[#allocation23_spill]] %s2644_s17  ;;  %p2628_p9 = scmp.eq.s32.totalorder %s2240_s25, 0 }
  0x19   : > { %p2268_p10 = pnand %p1581_p7, %p404_p8  ;;  %s2111_s19 = smov [#allocation6]  }
  0x1a   : > { %s437_s20 = sshll.u32 %s2111_s19, 4  ;;  %s2112_s26 = smov [#allocation9]   ;;  %s438_s20 = int_to_ptr.vmem [resolvable:$true] %s437_s20 }
  0x1b   : > { %s2646_s18 = scalar_select %p2268_p10, 1, 0 }
  0x1c   : > { %p1770_p11 = pneg %p2268_p10  ;;  %s462_s28 = sshll.u32 %s2112_s26, 4  ;;  %s2280_s28 = int_to_ptr.vmem [resolvable:$true] %s462_s28 }
  0x1d   : > { %s2113_s30 = smov [#allocation3]   ;;  %s2648_s5 = sld [smem:[#allocation25_spill]] }
  0x1e   : > { %p2276_p12 = pnand %p2628_p9, %p1770_p11  ;;  %s426_s23 = sshll.u32 %s2113_s30, 4  ;;  %s2282_s23 = int_to_ptr.vmem [resolvable:$true] %s426_s23 }
  0x20   : > { %p2292_p0 = pneg %p2276_p12 }
  0x23   : > { %s1895_s19 = scalar_lea.hbm %s2648_s5, 16 }
  0x24   : > { %p1896_p13 = scmp.ne.s32.totalorder %s2648_s5, %s1895_s19  ;;  %p1902_p3 = scmp.lt.u32.totalorder %s1895_s19, %s2648_s5 }
  0x26   : > { %p1898_p1 = pnand %p2292_p0, %p1896_p13 }
  0x28   : > { %p1899_p2 = pneg %p1898_p1 }
  0x2a   : > { %p1904_p4 = pnand %p1902_p3, %p1899_p2 }
  0x2c   : > { %1907 = shalt.err (!%p1904_p4)
}
  0x2d   : > { %s1908_s27 = scalar_lea.vmem %s438_s20, 16  ;;  %s1915_s21 = scalar_lea.vmem %s438_s20, 32 }
  0x2e   : > { %p1909_p7 = scmp.ne.s32.totalorder %s438_s20, %s1908_s27  ;;  %p1916_p9 = scmp.lt.s32.totalorder %s438_s20, %s438_s20 }
  0x2f   : > { %p1917_p6 = scmp.lt.s32.totalorder %s1915_s21, %s1908_s27 }
  0x30   : > { %p1911_p8 = pnand %p1909_p7, %p2292_p0 }
  0x31   : > { %p1918_p5 = por %p1917_p6, %p1916_p9 }
  0x32   : > { %p1912_p11 = pneg %p1911_p8 }
  0x34   : > { %p1919_p10 = pnand %p1918_p5, %p1912_p11 }
  0x36   : > { %1922 = shalt.err (!%p1919_p10)
}
  0x37   : > { %1776 = dma.hbm_to_vmem [thread:$0]  (!%p2276_p12), %s2648_s5, 16, %s438_s20, [#allocation7]  }
  0x38   : > { %s1923_s30 = scalar_lea.hbm %s2612_s8, 16 }
  0x39   : > { %p1924_p13 = scmp.ne.s32.totalorder %s2612_s8, %s1923_s30  ;;  %p1930_p5 = scmp.lt.u32.totalorder %s1923_s30, %s2612_s8 }
  0x3b   : > { %p1926_p1 = pnand %p1924_p13, %p2292_p0 }
  0x3d   : > { %p1927_p6 = pneg %p1926_p1 }
  0x3f   : > { %p1932_p9 = pnand %p1930_p5, %p1927_p6 }
  0x41   : > { %1935 = shalt.err (!%p1932_p9)
}
  0x42   : > { %s1936_s20 = scalar_lea.vmem %s2280_s28, 16  ;;  %s1943_s15 = scalar_lea.vmem %s2280_s28, 32 }
  0x43   : > { %p1937_p10 = scmp.ne.s32.totalorder %s2280_s28, %s1936_s20  ;;  %p1944_p4 = scmp.lt.s32.totalorder %s2280_s28, %s2280_s28 }
  0x44   : > { %p1945_p7 = scmp.lt.s32.totalorder %s1943_s15, %s1936_s20 }
  0x45   : > { %p1939_p2 = pnand %p1937_p10, %p2292_p0 }
  0x46   : > { %p1946_p8 = por %p1945_p7, %p1944_p4 }
  0x47   : > { %p1940_p3 = pneg %p1939_p2 }
  0x49   : > { %p1947_p11 = pnand %p1946_p8, %p1940_p3 }
  0x4b   : > { %1950 = shalt.err (!%p1947_p11)
}
  0x4c   : > { %1782 = dma.hbm_to_vmem [thread:$0]  (!%p2276_p12), %s2612_s8, 16, %s2280_s28, [#allocation10]  }
  0x4d   : > { %s1951_s19 = scalar_lea.hbm %s2608_s4, 16 }
  0x4e   : > { %p1952_p13 = scmp.ne.s32.totalorder %s2608_s4, %s1951_s19  ;;  %p1958_p5 = scmp.lt.u32.totalorder %s1951_s19, %s2608_s4 }
  0x50   : > { %p1954_p1 = pnand %p1952_p13, %p2292_p0 }
  0x52   : > { %p1955_p6 = pneg %p1954_p1 }
  0x54   : > { %p1960_p9 = pnand %p1958_p5, %p1955_p6 }
  0x56   : > { %1963 = shalt.err (!%p1960_p9)
}
  0x57   : > { %s1964_s28 = scalar_lea.vmem %s2282_s23, 16  ;;  %s1971_s15 = scalar_lea.vmem %s2282_s23, 32 }
  0x58   : > { %p1965_p10 = scmp.ne.s32.totalorder %s2282_s23, %s1964_s28  ;;  %p1972_p4 = scmp.lt.s32.totalorder %s2282_s23, %s2282_s23 }
  0x59   : > { %p1973_p7 = scmp.lt.s32.totalorder %s1971_s15, %s1964_s28 }
  0x5a   : > { %p1967_p2 = pnand %p1965_p10, %p2292_p0 }
  0x5b   : > { %p1974_p8 = por %p1973_p7, %p1972_p4 }
  0x5c   : > { %p1968_p3 = pneg %p1967_p2 }
  0x5e   : > { %p1975_p11 = pnand %p1974_p8, %p1968_p3 }
  0x60   : > { %1978 = shalt.err (!%p1975_p11)
}
  0x61   : > { %1773 = dma.hbm_to_vmem [thread:$0]  (!%p2276_p12), %s2608_s4, 16, %s2282_s23, [#allocation4]  }
  0x62   : > { %s2114_s17 = smov [#allocation8]   ;;  %s2115_s19 = smov [#allocation11]  }
  0x63   : > { %s448_s16 = sshll.u32 %s2114_s17, 4  ;;  %s473_s30 = sshll.u32 %s2115_s19, 4  ;;  %s449_s16 = int_to_ptr.vmem [resolvable:$true] %s448_s16  ;;  %s474_s30 = int_to_ptr.vmem [resolvable:$true] %s473_s30 }
  0x64   : > { %s1979_s20 = scalar_lea.hbm %s2610_s6, 16 }
  0x65   : > { %p1980_p13 = scmp.ne.s32.totalorder %s2610_s6, %s1979_s20  ;;  %p1986_p5 = scmp.lt.u32.totalorder %s1979_s20, %s2610_s6 }
  0x67   : > { %p1982_p1 = pnand %p1980_p13, %p2292_p0 }
  0x69   : > { %p1983_p6 = pneg %p1982_p1 }
  0x6b   : > { %p1988_p9 = pnand %p1986_p5, %p1983_p6 }
  0x6d   : > { %1991 = shalt.err (!%p1988_p9)
}
  0x6e   : > { %s1992_s23 = scalar_lea.vmem %s449_s16, 16  ;;  %s1999_s24 = scalar_lea.vmem %s449_s16, 32 }
  0x6f   : > { %p1993_p10 = scmp.ne.s32.totalorder %s449_s16, %s1992_s23  ;;  %p2000_p4 = scmp.lt.s32.totalorder %s449_s16, %s449_s16 }
  0x70   : > { %p2001_p7 = scmp.lt.s32.totalorder %s1999_s24, %s1992_s23 }
  0x71   : > { %p1995_p2 = pnand %p1993_p10, %p2292_p0 }
  0x72   : > { %p2002_p8 = por %p2001_p7, %p2000_p4 }
  0x73   : > { %p1996_p3 = pneg %p1995_p2 }
  0x75   : > { %p2003_p11 = pnand %p2002_p8, %p1996_p3 }
  0x77   : > { %2006 = shalt.err (!%p2003_p11)
}
  0x78   : > { %1779 = dma.hbm_to_vmem [thread:$0]  (!%p2276_p12), %s2610_s6, 16, %s449_s16, [#allocation7]  }
  0x79   : > { %s2007_s21 = scalar_lea.hbm %s2613_s9, 16 }
  0x7a   : > { %p2008_p13 = scmp.ne.s32.totalorder %s2613_s9, %s2007_s21  ;;  %p2014_p5 = scmp.lt.u32.totalorder %s2007_s21, %s2613_s9 }
  0x7c   : > { %p2010_p1 = pnand %p2008_p13, %p2292_p0 }
  0x7e   : > { %p2011_p6 = pneg %p2010_p1 }
  0x80   : > { %p2016_p9 = pnand %p2014_p5, %p2011_p6 }
  0x82   : > { %2019 = shalt.err (!%p2016_p9)
}
  0x83   : > { %s2020_s23 = scalar_lea.vmem %s474_s30, 16  ;;  %s2027_s16 = scalar_lea.vmem %s474_s30, 32 }
  0x84   : > { %p2021_p10 = scmp.ne.s32.totalorder %s474_s30, %s2020_s23  ;;  %p2028_p4 = scmp.lt.s32.totalorder %s474_s30, %s474_s30 }
  0x85   : > { %p2029_p7 = scmp.lt.s32.totalorder %s2027_s16, %s2020_s23 }
  0x86   : > { %p2023_p2 = pnand %p2021_p10, %p2292_p0 }
  0x87   : > { %p2030_p8 = por %p2029_p7, %p2028_p4 }
  0x88   : > { %p2024_p3 = pneg %p2023_p2 }
  0x8a   : > { %p2031_p11 = pnand %p2030_p8, %p2024_p3 }
  0x8c   : > { %2034 = shalt.err (!%p2031_p11)
}
  0x8d   : > { %1785 = dma.hbm_to_vmem [thread:$0]  (!%p2276_p12), %s2613_s9, 16, %s474_s30, [#allocation10]  }
  0x8e   : > { %p2650_p13 = scmp.ne.s32.totalorder %s2646_s18, 0 }
  0x8f   : > { %p2651_p1 = scmp.eq.s32.totalorder (!%p2650_p13), %s2240_s25, 0 }
  0x90   : > { %511 = sbr.rel (%p2650_p13) target bundleno = 3195 (0xc7b), region = 84 }
  0x97   : > { %2080 = dma.done.wait (%p2651_p1), [#allocation4], 16   ;;  %p2652_p0 = pmov %p2651_p1 }
  0x99   : > { %2082 = vsyncadd (%p2652_p0), [#allocation4], 4294967280  ;;  %p2653_p6 = pmov %p2652_p0 }
  0x9a   : > { %p2654_p5 = pmov %p2652_p0 }
  0x9b   : > { %2084 = dma.done.wait (%p2653_p6), [#allocation7], 32  }
  0x9c   : > { %2086 = vsyncadd (%p2654_p5), [#allocation7], 4294967264  ;;  %p2655_p9 = pmov %p2652_p0 }
  0x9d   : > { %p2656_p12 = pmov %p2652_p0 }
  0x9e   : > { %2088 = dma.done.wait (%p2655_p9), [#allocation10], 32  }
  0x9f   : > { %2090 = vsyncadd (%p2656_p12), [#allocation10], 4294967264  ;;  %p576_p10 = scmp.lt.s32.totalorder %s2240_s25, 1  ;;  %s2657_s19 = sld [smem:[#allocation24_spill]]  ;;  %vm584_vm0 = vcmask 261120   ;;  %v1855_v7 = vld [vmem:[%s2607_s3] sm:$0xff]  }
  0xa0   : > { %v2116_v8 = vmov 0.0   ;;  %vm2117_vm1 = vmmov 0   ;;  %v1856_v9 = vld [vmem:[%s2607_s3 + $0x8] sm:$0xff]   ;;  %v1596_v14 = vld [vmem:[%s2605_s1] ss:$0 sm:$0xff]  ;;  %s2118_s24 = smov 96  }
  0xa1   : > { %s577_s18 = scalar_select %p576_p10, %s2240_s25, 1  ;;  %1664 = vmatprep.subr.bf16.mxu0 %v2116_v8  ;;  %1668 = vmatprep.mubr.msk.bf16.mxu0 %vm2117_vm1, %v2116_v8  ;;  %v1597_v16 = vld [vmem:[%s2606_s2] ss:$0 sm:$0xff]  ;;  %v1598_v20 = vld [vmem:[#allocation3] ss:$0 sm:$0xff]  ;;  %vm724_vm2 = vcmask 64512  }
  0xa2   : > { %1665 = vmatpush3.bf16.msra.mxu0 %v1855_v7  ;;  %1672 = vmatprep.subr.bf16.mxu1 %v2116_v8  ;;  %v1603_v28 = vld [vmem:[#allocation8] ss:$0 sm:$0xff]  ;;  %s2119_s17 = smov 32   ;;  %v1602_v34 = vld [vmem:[#allocation6] ss:$0 sm:$0xff]  ;;  %s2122_s26 = smov 80  }
  0xa3   : > { %s1595_s29 = sshll.u32 %s577_s18, 3  ;;  %1666 = vmatprep.subr.bf16.mxu0 %v2116_v8  ;;  %1674 = vmatprep.mubr.msk.bf16.mxu1 %vm2117_vm1, %v2116_v8  ;;  %s2120_s18 = smov 120   ;;  %vm789_vm3 = vcmask 1043456   ;;  %vm949_vm4 = vcmask 130112   ;;  %vm1065_vm5 = vcmask 195712   ;;  %vm1181_vm6 = vcmask 261312  }
  0xa4   : > { %s2123_s30 = smov 112   ;;  %s2126_s27 = smov 64   ;;  %vm1411_vm7 = vcmask 523264  }
  0xa5   : > { %s579_s5 = scalar_lea.vmem %s2657_s19, %s1595_s29  ;;  %s2121_s29 = smov 88  }
  0xa6   : > { %v2411_v0 = vld [vmem:[%s579_s5] sm:$0xff]  ;;  %1667 = vmatpush3.bf16.msra.mxu0 %v1856_v9  ;;  %s2124_s19 = smov 72   ;;  %s2125_s5 = smov 104  }
  0xa7   : > { %v585_v1 = vsel %vm584_vm0, %v2411_v0, 0.0  ;;  %1678 = vmatprep.subr.bf16.mxu0 %v2116_v8  ;;  %s2127_s21 = smov 56   ;;  %s2128_s20 = smov 48  }
  0xa8   : > { %586 = vadd.xlane.f32.xlu0 %v585_v1  ;;  %s2129_s28 = smov 40   ;;  %s2130_s15 = smov 8  }
 0x135   : > { %v587_v2 = vpop.xlane.xlu0 %586 }
 0x136   : > { %v589_v3 = vmul.f32 0.03125, %v587_v2 }
 0x138   : > { %v590_v4 = vsub.f32 %v2411_v0, %v589_v3 }
 0x13a   : > { %v591_v5 = vmul.f32 %v590_v4, %v590_v4 }
 0x13c   : > { %v592_v6 = vsel %vm584_vm0, %v591_v5, 0.0 }
 0x13d   : > { %593 = vadd.xlane.f32.xlu0 %v592_v6 }
 0x1ca   : > { %v594_v10 = vpop.xlane.xlu0 %593 }
 0x1cb   : > { %v595_v11 = vmul.f32 0.03125, %v594_v10 }
 0x1cd   : > { %v596_v12 = vadd.f32 1e-06, %v595_v11 }
 0x1cf   : > { %1865 = vrsqrt.f32 %v596_v12 }
 0x1d9   : > { %v1866_v13 = vpop.eup %1865 }
 0x1da   : > { %v598_v15 = vmul.f32 %v1866_v13, %v590_v4 }
 0x1dc   : > { %v605_v17 = vmul.f32 %v1596_v14, %v598_v15 }
 0x1de   : > { %v612_v18 = vadd.f32 %v1597_v16, %v605_v17 }
 0x1e0   : > { %v613_v19 = vpack.c.bf16 %v612_v18, %v612_v18 }
 0x1e2   : > { %1669 = vmatmul.mubr.msk.bf16.vlgmr.msra.gmra.mrb[0].mxu0 %vm584_vm0, %v613_v19 }
 0x1e3   : > { %1680 = vmatprep.mubr.msk.bf16.mxu0 %vm2117_vm1, %v2116_v8 }
 0x2b5   : > { %v674_v21 = vpop.f32.mrb[0].mxu0 }
 0x2b6   : > { %v2440_v22 = vadd.f32 %v1598_v20, %v674_v21  ;;  %v1670_v23 = vpop.f32.mrb[1].mxu0 }
 0x2b7   : > { %v677_v24 = vpop.f32.mrb[2].mxu0 }
 0x2b8   : > { %v1671_v25 = vpop.f32.mrb[3].mxu0  ;;  %v681_v26 = vmul.f32 %v2440_v22, %v2440_v22 }
 0x2ba   : > { %699 = vrot.lane.b32.xlu1 %v681_v26, %s2118_s24  ;;  %v682_v27 = vsel %vm584_vm0, %v681_v26, 0.0 }
 0x2bb   : > { %683 = vadd.xlane.f32.xlu0 %v682_v27 }
 0x2d1   : > { %713 = vrot.lane.b32.xlu0 %v1603_v28, %s2119_s17  ;;  %s2131_s17 = smov 16  }
 0x32c   : > { %v700_v29 = vpop.permute.xlu1 %699 }
 0x32d   : > { %v702_v30 = vsel %vm584_vm0, %v700_v29, 0.0 }
 0x32e   : > { %703 = vadd.xlane.f32.xlu1 %v702_v30 }
 0x348   : > { %v684_v31 = vpop.xlane.xlu0 %683 }
 0x349   : > { %v685_v32 = vmax.f32 %v684_v31, 1e-24 }
 0x34b   : > { %1867 = vrsqrt.f32 %v685_v32  ;;  %v720_v32 = vpack.c.bf16 %v2440_v22, %v2440_v22 }
 0x34c   : > { %v714_v43 = vpop.permute.xlu0 %713 }
 0x355   : > { %v1868_v33 = vpop.eup %1867 }
 0x356   : > { %v687_v35 = vmul.f32 %v1868_v33, %v2440_v22 }
 0x358   : > { %v694_v36 = vmul.f32 %v1602_v34, %v687_v35 }
 0x35a   : > { %v695_v37 = vmul.f32 5.656854, %v694_v36 }
 0x35c   : > { %v696_v38 = vmul.f32 0.35355338, %v695_v37 }
 0x35e   : > { %v718_v39 = vpack.c.bf16 %v696_v38, %v696_v38 }
 0x360   : > { %835 = vrot.lane.b32.xlu1 %v718_v39, %s2120_s18  ;;  %s2132_s18 = smov 24  }
 0x3bb   : > { %v704_v40 = vpop.xlane.xlu1 %703 }
 0x3bc   : > { %v705_v41 = vmax.f32 %v704_v40, 1e-24 }
 0x3be   : > { %1869 = vrsqrt.f32 %v705_v41 }
 0x3c8   : > { %v1870_v42 = vpop.eup %1869 }
 0x3c9   : > { %v707_v44 = vmul.f32 %v1870_v42, %v2440_v22 }
 0x3cb   : > { %v716_v45 = vmul.f32 %v714_v43, %v707_v44 }
 0x3cd   : > { %v717_v46 = vmul.f32 5.656854, %v716_v45 }
 0x3cf   : > { %v719_v47 = vpack.c.bf16 %v717_v46, %v717_v46 }
 0x3d1   : > { %722 = vrot.lane.b32.xlu0 %v719_v47, %s2118_s24  ;;  %s2660_s24 = sld [smem:[#allocation27_spill]] }
 0x3d2   : > { %v836_v53 = vpop.permute.xlu1 %835 }
 0x3d5   : > { %837 = vrot.lane.b32.xlu0 %v719_v47, %s2121_s29 }
 0x3d9   : > { %953 = vrot.lane.b32.xlu0 %v719_v47, %s2122_s26  ;;  %s2133_s26 = smov [#allocation12]  }
 0x3dd   : > { %951 = vrot.lane.b32.xlu0 %v718_v39, %s2123_s30  ;;  %s573_s30 = sand.u32 1, %s2101_s22  }
 0x3e1   : > { %1069 = vrot.lane.b32.xlu0 %v719_v47, %s2124_s19  ;;  %s1594_s19 = sshll.u32 %s573_s30, 3 }
 0x3e5   : > { %1067 = vrot.lane.b32.xlu0 %v718_v39, %s2125_s5 }
 0x443   : > { %v723_v48 = vpop.permute.xlu0 %722 }
 0x444   : > { %v729_v49 = vsel %vm724_vm2, %v723_v48, 0 }
 0x445   : > { %1673 = vmatpush3.bf16.xpose.msra.mxu1 %v729_v49 }
 0x446   : > { %1684 = vmatprep.subr.bf16.mxu1 %v2116_v8 }
 0x447   : > { %v838_v50 = vpop.permute.xlu0 %837 }
 0x448   : > { %v843_v51 = vsel %vm724_vm2, %v838_v50, 0 }
 0x44b   : > { %v954_v52 = vpop.permute.xlu0 %953 }
 0x44c   : > { %1675 = vmatmul.mubr.msk.bf16.vlgmr.msra.gmra.mrb[0].mxu1 %vm724_vm2, %v718_v39  ;;  %v959_v55 = vsel %vm724_vm2, %v954_v52, 0 }
 0x44d   : > { %1685 = vmatpush3.bf16.xpose.msra.mxu1 %v843_v51  ;;  %1686 = vmatprep.mubr.msk.bf16.mxu1 %vm2117_vm1, %v2116_v8 }
 0x44e   : > { %1696 = vmatprep.subr.bf16.mxu1 %v2116_v8 }
 0x44f   : > { %v952_v54 = vpop.permute.xlu0 %951 }
 0x453   : > { %v1070_v56 = vpop.permute.xlu0 %1069 }
 0x454   : > { %1687 = vmatmul.mubr.msk.bf16.vlgmr.msra.gmra.mrb[4].mxu1 %vm724_vm2, %v836_v53  ;;  %v1075_v57 = vsel %vm724_vm2, %v1070_v56, 0 }
 0x455   : > { %1697 = vmatpush3.bf16.xpose.msra.mxu1 %v959_v55  ;;  %1698 = vmatprep.mubr.msk.bf16.mxu1 %vm2117_vm1, %v2116_v8 }
 0x456   : > { %1708 = vmatprep.subr.bf16.mxu1 %v2116_v8 }
 0x457   : > { %v1068_v58 = vpop.permute.xlu0 %1067 }
 0x45c   : > { %1699 = vmatmul.mubr.msk.bf16.vlgmr.msra.gmra.mrb[8].mxu1 %vm724_vm2, %v952_v54 }
 0x45d   : > { %1709 = vmatpush3.bf16.xpose.msra.mxu1 %v1075_v57  ;;  %1710 = vmatprep.mubr.msk.bf16.mxu1 %vm2117_vm1, %v2116_v8 }
 0x45e   : > { %1720 = vmatprep.subr.bf16.mxu1 %v2116_v8 }
 0x464   : > { %1711 = vmatmul.mubr.msk.bf16.vlgmr.msra.gmra.mrb[12].mxu1 %vm724_vm2, %v1068_v58 }
 0x465   : > { %1724 = vmatprep.mubr.msk.bf16.mxu1 %vm2117_vm1, %v2116_v8 }
 0x51f   : > { %v765_v59 = vpop.f32.mrb[0].mxu1 }
 0x520   : > { %v1676_v60 = vpop.f32.mrb[1].mxu1  ;;  %v771_v61 = vsel %vm724_vm2, %v765_v59, -inf }
 0x521   : > { %772 = vmax.xlane.f32.xlu1 %v771_v61  ;;  %v768_v62 = vpop.f32.mrb[2].mxu1 }
 0x522   : > { %v1677_v63 = vpop.f32.mrb[3].mxu1 }
 0x527   : > { %v879_v1 = vpop.f32.mrb[4].mxu1 }
 0x528   : > { %v1688_v2 = vpop.f32.mrb[5].mxu1  ;;  %v885_v3 = vsel %vm724_vm2, %v879_v1, -inf }
 0x529   : > { %886 = vmax.xlane.f32.xlu0 %v885_v3  ;;  %v882_v4 = vpop.f32.mrb[6].mxu1 }
 0x52a   : > { %v1689_v5 = vpop.f32.mrb[7].mxu1 }
 0x52f   : > { %v995_v6 = vpop.f32.mrb[8].mxu1 }
 0x530   : > { %v1700_v7 = vpop.f32.mrb[9].mxu1  ;;  %v1001_v9 = vsel %vm724_vm2, %v995_v6, -inf }
 0x531   : > { %1002 = vmax.xlane.f32.xlu0 %v1001_v9  ;;  %v998_v10 = vpop.f32.mrb[10].mxu1  ;;  %v1857_v7 = vld [vmem:[%s2611_s7] sm:$0xff]   ;;  %v1858_v9 = vld [vmem:[%s2611_s7 + $0x8] sm:$0xff]  }
 0x532   : > { %v1701_v11 = vpop.f32.mrb[11].mxu1  ;;  %1721 = vmatpush3.bf16.msra.mxu1 %v1857_v7 }
 0x533   : > { %1722 = vmatprep.subr.bf16.mxu1 %v2116_v8 }
 0x536   : > { %1723 = vmatpush3.bf16.msra.mxu1 %v1858_v9 }
 0x537   : > { %v1111_v12 = vpop.f32.mrb[12].mxu1  ;;  %1736 = vmatprep.subr.bf16.mxu1 %v2116_v8 }
 0x538   : > { %v1712_v13 = vpop.f32.mrb[13].mxu1  ;;  %v1117_v14 = vsel %vm724_vm2, %v1111_v12, -inf }
 0x539   : > { %1118 = vmax.xlane.f32.xlu0 %v1117_v14  ;;  %v1114_v15 = vpop.f32.mrb[14].mxu1 }
 0x53a   : > { %v1713_v16 = vpop.f32.mrb[15].mxu1 }
 0x5ae   : > { %v773_v17 = vpop.xlane.xlu1 %772 }
 0x5af   : > { %v774_v18 = vsub.f32 %v765_v59, %v773_v17 }
 0x5b1   : > { %v775_v19 = vmul.f32 1.442695, %v774_v18 }
 0x5b3   : > { %1871 = vpow2.f32 %v775_v19 }
 0x5b6   : > { %v887_v20 = vpop.xlane.xlu0 %886 }
 0x5b7   : > { %v888_v21 = vsub.f32 %v879_v1, %v887_v20 }
 0x5b9   : > { %v889_v23 = vmul.f32 1.442695, %v888_v21 }
 0x5bb   : > { %1873 = vpow2.f32 %v889_v23 }
 0x5bd   : > { %v1872_v24 = vpop.eup %1871 }
 0x5be   : > { %v777_v25 = vsel %vm724_vm2, %v1872_v24, 0.0  ;;  %v1003_v26 = vpop.xlane.xlu0 %1002 }
 0x5bf   : > { %778 = vadd.xlane.f32.xlu1 %v777_v25  ;;  %v1004_v35 = vsub.f32 %v995_v6, %v1003_v26 }
 0x5c1   : > { %v1005_v36 = vmul.f32 1.442695, %v1004_v35  ;;  %v1616_v35 = vld [vmem:[#allocation11] ss:$0 sm:$0xff] }
 0x5c5   : > { %v1874_v27 = vpop.eup %1873 }
 0x5c6   : > { %v1119_v28 = vpop.xlane.xlu0 %1118  ;;  %v891_v29 = vsel %vm724_vm2, %v1874_v27, 0.0 }
 0x5c7   : > { %v1120_v30 = vsub.f32 %v1111_v12, %v1119_v28  ;;  %892 = vadd.xlane.f32.xlu0 %v891_v29 }
 0x5c9   : > { %v1121_v31 = vmul.f32 1.442695, %v1120_v30 }
 0x5cb   : > { %1875 = vpow2.f32 %v1121_v31 }
 0x5cc   : > { %1877 = vpow2.f32 %v1005_v36 }
 0x5d0   : > { %784 = vrot.lane.b32.xlu1 %v720_v32, %s2126_s27 }
 0x5d5   : > { %v1876_v33 = vpop.eup %1875 }
 0x5d6   : > { %v1123_v34 = vsel %vm724_vm2, %v1876_v33, 0.0  ;;  %v1878_v37 = vpop.eup %1877 }
 0x5d7   : > { %1124 = vadd.xlane.f32.xlu0 %v1123_v34  ;;  %v1007_v38 = vsel %vm724_vm2, %v1878_v37, 0.0 }
 0x5ed   : > { %897 = vrot.lane.b32.xlu0 %v720_v32, %s2127_s21  ;;  %s2658_s21 = sld [smem:[#allocation26_spill]] }
 0x5f3   : > { %v1624_v9 = vld [vmem:[%s2658_s21] ss:$0 sm:$0xff] }
 0x5f4   : > { %1008 = vadd.xlane.f32.xlu1 %v1007_v38 }
 0x605   : > { %1013 = vrot.lane.b32.xlu1 %v720_v32, %s2128_s20  ;;  %s2659_s20 = sld [smem:[#allocation22_spill]] }
 0x609   : > { %1129 = vrot.lane.b32.xlu1 %v720_v32, %s2129_s28  ;;  %s1631_s28 = sshll.u32 %s2240_s25, 7  ;;  %s1458_s25 = scalar_lea.sflag [#allocation5], %s573_s30 }
 0x60b   : > { %p2662_p3 = scmp.ne.s32.totalorder %s2659_s20, 0 }
 0x64c   : > { %v779_v22 = vpop.xlane.xlu1 %778 }
 0x64d   : > { %1879 = vrcp.f32 %v779_v22 }
 0x650   : > { %v785_v39 = vpop.permute.xlu1 %784 }
 0x651   : > { %v791_v40 = vsel %vm789_vm3, %v785_v39, 0 }
 0x652   : > { %1679 = vmatpush3.bf16.msra.mxu0 %v791_v40 }
 0x653   : > { %1690 = vmatprep.subr.bf16.mxu0 %v2116_v8 }
 0x654   : > { %v893_v42 = vpop.xlane.xlu0 %892 }
 0x655   : > { %1881 = vrcp.f32 %v893_v42 }
 0x657   : > { %v1880_v41 = vpop.eup %1879 }
 0x658   : > { %v781_v43 = vmul.f32 %v1880_v41, %v1872_v24  ;;  %v1612_v24 = vld [vmem:[#allocation9] ss:$0 sm:$0xff] }
 0x65a   : > { %v782_v44 = vpack.c.bf16 %v781_v43, %v781_v43 }
 0x65c   : > { %1681 = vmatmul.mubr.msk.bf16.vlgmr.msra.gmra.mrb[4].mxu0 %vm724_vm2, %v782_v44 }
 0x65d   : > { %1692 = vmatprep.mubr.msk.bf16.mxu0 %vm2117_vm1, %v2116_v8 }
 0x65f   : > { %v1882_v45 = vpop.eup %1881 }
 0x660   : > { %v895_v47 = vmul.f32 %v1882_v45, %v1874_v27  ;;  %v1859_v45 = vld [vmem:[%s2616_s12] sm:$0xff]  }
 0x662   : > { %v896_v50 = vpack.c.bf16 %v895_v47, %v895_v47 }
 0x664   : > { %v1125_v46 = vpop.xlane.xlu0 %1124 }
 0x668   : > { %v898_v48 = vpop.permute.xlu0 %897 }
 0x669   : > { %v903_v49 = vsel %vm789_vm3, %v898_v48, 0 }
 0x66a   : > { %1691 = vmatpush3.bf16.msra.mxu0 %v903_v49 }
 0x66b   : > { %1702 = vmatprep.subr.bf16.mxu0 %v2116_v8 }
 0x66d   : > { %1693 = vmatmul.mubr.msk.bf16.vlgmr.msra.gmra.mrb[8].mxu0 %vm724_vm2, %v896_v50  ;;  %v1617_v50 = vld [vmem:[%s2614_s10] ss:$0 sm:$0xff] }
 0x66e   : > { %1704 = vmatprep.mubr.msk.bf16.mxu0 %vm2117_vm1, %v2116_v8 }
 0x681   : > { %v1009_v51 = vpop.xlane.xlu1 %1008 }
 0x682   : > { %1883 = vrcp.f32 %v1009_v51 }
 0x683   : > { %1885 = vrcp.f32 %v1125_v46 }
 0x685   : > { %v1014_v52 = vpop.permute.xlu1 %1013 }
 0x686   : > { %v1019_v53 = vsel %vm789_vm3, %v1014_v52, 0  ;;  %v1618_v52 = vld [vmem:[%s2615_s11] ss:$0 sm:$0xff] }
 0x687   : > { %1703 = vmatpush3.bf16.msra.mxu0 %v1019_v53 }
 0x688   : > { %1714 = vmatprep.subr.bf16.mxu0 %v2116_v8 }
 0x689   : > { %v1130_v56 = vpop.permute.xlu1 %1129 }
 0x68a   : > { %v1135_v59 = vsel %vm789_vm3, %v1130_v56, 0  ;;  %v1861_v56 = vld [vmem:[%s2618_s14] sm:$0xff]  }
 0x68c   : > { %v1884_v54 = vpop.eup %1883 }
 0x68d   : > { %v1011_v55 = vmul.f32 %v1884_v54, %v1878_v37  ;;  %v1886_v58 = vpop.eup %1885 }
 0x68e   : > { %v1127_v60 = vmul.f32 %v1886_v58, %v1876_v33  ;;  %v1863_v58 = vld [vmem:[%s2618_s14 + $0x10] sm:$0xff]  }
 0x68f   : > { %v1012_v57 = vpack.c.bf16 %v1011_v55, %v1011_v55 }
 0x690   : > { %v1128_v61 = vpack.c.bf16 %v1127_v60, %v1127_v60  ;;  %v1619_v60 = vld [vmem:[%s2617_s13] ss:$0 sm:$0xff] }
 0x691   : > { %1705 = vmatmul.mubr.msk.bf16.vlgmr.msra.gmra.mrb[12].mxu0 %vm724_vm2, %v1012_v57  ;;  %v1862_v57 = vld [vmem:[%s2618_s14 + $0x8] sm:$0xff]  }
 0x692   : > { %1715 = vmatpush3.bf16.msra.mxu0 %v1135_v59  ;;  %1716 = vmatprep.mubr.msk.bf16.mxu0 %vm2117_vm1, %v2116_v8  ;;  %v1864_v59 = vld [vmem:[%s2618_s14 + $0x18] sm:$0xff]  }
 0x693   : > { %1728 = vmatprep.subr.bf16.mxu0 %v2116_v8 }
 0x699   : > { %1717 = vmatmul.mubr.msk.bf16.vlgmr.msra.gmra.mrb[16].mxu0 %vm724_vm2, %v1128_v61 }
 0x69a   : > { %1732 = vmatprep.mubr.msk.bf16.mxu0 %vm2117_vm1, %v2116_v8  ;;  %1729 = vmatpush3.bf16.msra.mxu0 %v1859_v45 }
 0x69b   : > { %1730 = vmatprep.subr.bf16.mxu0 %v2116_v8 }
 0x72f   : > { %v827_v62 = vpop.f32.mrb[4].mxu0 }
 0x730   : > { %833 = vst.msk [vmem:[#allocation2] sm:$0xff] %vm724_vm2, %v827_v62  ;;  %v1682_v63 = vpop.f32.mrb[5].mxu0 }
 0x731   : > { %v830_v1 = vpop.f32.mrb[6].mxu0 }
 0x732   : > { %v1683_v2 = vpop.f32.mrb[7].mxu0 }
 0x740   : > { %v939_v3 = vpop.f32.mrb[8].mxu0 }
 0x741   : > { %946 = vrot.lane.b32.xlu1 %v939_v3, %s2130_s15  ;;  %v1694_v4 = vpop.f32.mrb[9].mxu0  ;;  %s575_s15 = scalar_lea.vmem [#allocation12], %s1594_s19  ;;  %s2039_s19 = sshll.u32 %s2133_s26, 4  ;;  %s2040_s19 = int_to_ptr.vmem [resolvable:$false] %s2039_s19 }
 0x742   : > { %v942_v5 = vpop.f32.mrb[10].mxu0  ;;  %s1471_s0 = sshll.u32 %s575_s15, 4  ;;  %s2041_s5 = scalar_lea.vmem %s2040_s19, 256  ;;  %s2563_s0 = int_to_ptr.vmem [resolvable:$true] %s1471_s0 }
 0x743   : > { %v1695_v6 = vpop.f32.mrb[11].mxu0  ;;  %s2035_s29 = scalar_lea.vmem %s2563_s0, 128  ;;  %p2042_p8 = scmp.lt.s32.totalorder %s2563_s0, %s2040_s19 }
 0x744   : > { %p2036_p2 = scmp.ne.s32.totalorder %s2563_s0, %s2035_s29  ;;  %p2043_p11 = scmp.lt.s32.totalorder %s2041_s5, %s2035_s29 }
 0x746   : > { %p2037_p4 = pnand %p2036_p2, %p2662_p3  ;;  %p2044_p13 = por %p2043_p11, %p2042_p8 }
 0x748   : > { %p2038_p7 = pneg %p2037_p4 }
 0x74a   : > { %p2045_p1 = pnand %p2044_p13, %p2038_p7 }
 0x764   : > { %v1055_v10 = vpop.f32.mrb[12].mxu0 }
 0x765   : > { %1062 = vrot.lane.b32.xlu0 %v1055_v10, %s2131_s17  ;;  %v1706_v11 = vpop.f32.mrb[13].mxu0  ;;  %s2661_s17 = smov %s2660_s24 }
 0x766   : > { %v1058_v12 = vpop.f32.mrb[14].mxu0 }
 0x767   : > { %v1707_v13 = vpop.f32.mrb[15].mxu0 }
 0x76c   : > { %v1171_v14 = vpop.f32.mrb[16].mxu0 }
 0x76d   : > { %1178 = vrot.lane.b32.xlu1 %v1171_v14, %s2132_s18  ;;  %v1718_v15 = vpop.f32.mrb[17].mxu0  ;;  %s2561_s18 = scalar_lea.hbm %s2660_s24, %s1631_s28 }
 0x76e   : > { %v1174_v16 = vpop.f32.mrb[18].mxu0 }
 0x76f   : > { %v1719_v17 = vpop.f32.mrb[19].mxu0 }
 0x7b3   : > { %v947_v18 = vpop.permute.xlu1 %946 }
 0x7b4   : > { %950 = vst.msk [vmem:[#allocation2] sm:$0xff] %vm949_vm4, %v947_v18 }
 0x7d7   : > { %v1063_v19 = vpop.permute.xlu0 %1062 }
 0x7d8   : > { %1066 = vst.msk [vmem:[#allocation2] sm:$0xff] %vm1065_vm5, %v1063_v19 }
 0x7df   : > { %v1179_v20 = vpop.permute.xlu1 %1178 }
 0x7e0   : > { %1182 = vst.msk [vmem:[#allocation2] sm:$0xff] %vm1181_vm6, %v1179_v20 }
 0x7e7   : > { %v1183_v21 = vld [vmem:[#allocation2] sm:$0xff] }
 0x7e8   : > { %v1184_v23 = vpack.c.bf16 %v1183_v21, %v1183_v21 }
 0x7ea   : > { %1725 = vmatmul.mubr.msk.bf16.vlgmr.msra.gmra.mrb[16].mxu1 %vm584_vm0, %v1184_v23 }
 0x7eb   : > { %1744 = vmatprep.mubr.msk.bf16.mxu1 %vm2117_vm1, %v2116_v8  ;;  %1737 = vmatpush3.bf16.msra.mxu1 %v1861_v56 }
 0x7ec   : > { %1738 = vmatprep.subr.bf16.mxu1 %v2116_v8 }
 0x7ef   : > { %1739 = vmatpush3.bf16.msra.mxu1 %v1862_v57 }
 0x7f0   : > { %1740 = vmatprep.subr.bf16.mxu1 %v2116_v8 }
 0x7f3   : > { %1741 = vmatpush3.bf16.msra.mxu1 %v1863_v58 }
 0x7f4   : > { %1742 = vmatprep.subr.bf16.mxu1 %v2116_v8 }
 0x7f7   : > { %1743 = vmatpush3.bf16.msra.mxu1 %v1864_v59 }
 0x8bd   : > { %v1245_v25 = vpop.f32.mrb[16].mxu1 }
 0x8be   : > { %v1246_v26 = vadd.f32 %v1612_v24, %v1245_v25  ;;  %v1726_v27 = vpop.f32.mrb[17].mxu1 }
 0x8bf   : > { %v1248_v28 = vpop.f32.mrb[18].mxu1 }
 0x8c0   : > { %v1727_v29 = vpop.f32.mrb[19].mxu1  ;;  %v1252_v30 = vmul.f32 %v1246_v26, %v1246_v26 }
 0x8c2   : > { %v1253_v31 = vsel %vm584_vm0, %v1252_v30, 0.0 }
 0x8c3   : > { %1254 = vadd.xlane.f32.xlu0 %v1253_v31 }
 0x950   : > { %v1255_v32 = vpop.xlane.xlu0 %1254 }
 0x951   : > { %v1256_v33 = vmax.f32 %v1255_v32, 1e-24 }
 0x953   : > { %1887 = vrsqrt.f32 %v1256_v33 }
 0x95d   : > { %v1888_v34 = vpop.eup %1887 }
 0x95e   : > { %v1258_v36 = vmul.f32 %v1888_v34, %v1246_v26 }
 0x960   : > { %v1265_v37 = vmul.f32 %v1616_v35, %v1258_v36 }
 0x962   : > { %v1266_v38 = vmul.f32 5.656854, %v1265_v37 }
 0x964   : > { %v2514_v22 = vadd.f32 %v1266_v38, %v2411_v0  ;;  %v1860_v0 = vld [vmem:[%s2616_s12 + $0x8] sm:$0xff]  }
 0x965   : > { %1731 = vmatpush3.bf16.msra.mxu0 %v1860_v0 }
 0x966   : > { %v1270_v39 = vsel %vm584_vm0, %v2514_v22, 0.0 }
 0x967   : > { %1271 = vadd.xlane.f32.xlu1 %v1270_v39 }
 0x9f4   : > { %v1272_v40 = vpop.xlane.xlu1 %1271 }
 0x9f5   : > { %v1273_v41 = vmul.f32 0.03125, %v1272_v40 }
 0x9f7   : > { %v1274_v42 = vsub.f32 %v2514_v22, %v1273_v41 }
 0x9f9   : > { %v1275_v43 = vmul.f32 %v1274_v42, %v1274_v42 }
 0x9fb   : > { %v1276_v44 = vsel %vm584_vm0, %v1275_v43, 0.0 }
 0x9fc   : > { %1277 = vadd.xlane.f32.xlu0 %v1276_v44 }
 0xa89   : > { %v1278_v46 = vpop.xlane.xlu0 %1277 }
 0xa8a   : > { %v1279_v47 = vmul.f32 0.03125, %v1278_v46 }
 0xa8c   : > { %v1280_v48 = vadd.f32 1e-06, %v1279_v47 }
 0xa8e   : > { %1889 = vrsqrt.f32 %v1280_v48 }
 0xa98   : > { %v1890_v49 = vpop.eup %1889 }
 0xa99   : > { %v1282_v51 = vmul.f32 %v1890_v49, %v1274_v42 }
 0xa9b   : > { %v1289_v53 = vmul.f32 %v1617_v50, %v1282_v51 }
 0xa9d   : > { %v1296_v54 = vadd.f32 %v1618_v52, %v1289_v53 }
 0xa9f   : > { %v1297_v55 = vpack.c.bf16 %v1296_v54, %v1296_v54 }
 0xaa1   : > { %1733 = vmatmul.mubr.msk.bf16.vlgmr.msra.gmra.mrb[20].mxu0 %vm584_vm0, %v1297_v55 }
 0xb74   : > { %v1358_v61 = vpop.f32.mrb[20].mxu0 }
 0xb75   : > { %v1359_v62 = vadd.f32 %v1619_v60, %v1358_v61  ;;  %v1734_v63 = vpop.f32.mrb[21].mxu0 }
 0xb76   : > { %v1361_v1 = vpop.f32.mrb[22].mxu0 }
 0xb77   : > { %v1623_v2 = vmul.f32 -1.442695, %v1359_v62  ;;  %v1735_v3 = vpop.f32.mrb[23].mxu0 }
 0xb79   : > { %1891 = vpow2.f32 %v1623_v2 }
 0xb83   : > { %v1892_v4 = vpop.eup %1891 }
 0xb84   : > { %v1367_v8 = vadd.f32 1.0, %v1892_v4 }
 0xb86   : > { %1893 = vrcp.f32 %v1367_v8 }
 0xb90   : > { %v1894_v5 = vpop.eup %1893 }
 0xb91   : > { %v1370_v6 = vmul.f32 %v1894_v5, %v1359_v62 }
 0xb93   : > { %v1371_v7 = vpack.c.bf16 %v1370_v6, %v1370_v6 }
 0xb95   : > { %1745 = vmatmul.mubr.msk.bf16.vlgmr.msra.gmra.mrb[20].mxu1 %vm1411_vm7, %v1371_v7 }
 0xc68   : > { %v1449_v10 = vpop.f32.mrb[20].mxu1 }
 0xc69   : > { %v1450_v11 = vadd.f32 %v1624_v9, %v1449_v10  ;;  %v1746_v12 = vpop.f32.mrb[21].mxu1 }
 0xc6a   : > { %v1452_v13 = vpop.f32.mrb[22].mxu1 }
 0xc6b   : > { %v1455_v14 = vadd.f32 %v1450_v11, %v2514_v22  ;;  %v1747_v15 = vpop.f32.mrb[23].mxu1 }
 0xc6d   : > { %1456 = vst.msk [vmem:[%s575_s15] sm:$0xff] %vm584_vm0, %v1455_v14 }
 0xc6e   : > { %2048 = shalt.err (!%p2045_p1)
}
 0xc6f   : > { %s2049_s30 = scalar_lea.hbm %s2561_s18, 128  ;;  %s2053_s28 = scalar_lea.hbm %s2661_s17, 256 }
 0xc70   : > { %p2050_p0 = scmp.ne.s32.totalorder %s2561_s18, %s2049_s30  ;;  %p2054_p9 = scmp.lt.u32.totalorder %s2561_s18, %s2661_s17 }
 0xc71   : > { %p2055_p12 = scmp.lt.u32.totalorder %s2053_s28, %s2049_s30  ;;  %p2057_p2 = scmp.lt.u32.totalorder %s2049_s30, %s2561_s18 }
 0xc72   : > { %p2051_p6 = pnand %p2050_p0, %p2662_p3 }
 0xc73   : > { %p2056_p10 = por %p2055_p12, %p2054_p9 }
 0xc74   : > { %p2052_p5 = pneg %p2051_p6 }
 0xc75   : > { %p2058_p4 = por %p2057_p2, %p2056_p10 }
 0xc77   : > { %p2059_p7 = pnand %p2058_p4, %p2052_p5 }
 0xc79   : > { %2062 = shalt.err (!%p2059_p7)
}
 0xc7a   : > { %1768 = dma.vmem_to_hbm [thread:$0]  (%p2662_p3), %s2563_s0, 128, %s2561_s18, %s1458_s25  }
 0xc7b PF: > { %s2663_s16 = sld [smem:[#allocation19_spill]]  ;;  %s2664_s24 = sld [smem:[#allocation17_spill]] }
 0xc7c   : > { %s2665_s29 = sld [smem:[#allocation23_spill]] }
 0xc81   : > { %p1800_p8 = scmp.ge.s32.totalorder %s2663_s16, 2  ;;  %s1483_s26 = sand.u32 1, %s2664_s24  }
 0xc82   : > { %p2666_p11 = scmp.ne.s32.totalorder %s2665_s29, 0  ;;  %s1484_s19 = scalar_lea.sflag [#allocation5], %s1483_s26 }
 0xc84   : > { %p1787_p13 = pnand %p1800_p8, %p2666_p11 }
 0xc86   : > { %2092 = dma.done.wait (!%p1787_p13), %s1484_s19, 128  }
 0xc87   : > { %2094 = vsyncadd (!%p1787_p13), %s1484_s19, 4294967168  ;;  %s2667_s24 = sld [smem:[#allocation20_spill]]  ;;  %s2668_s5 = sld [smem:[#allocation18_spill]] }
 0xc88   : > { %s2669_s23 = sld [smem:[#allocation21_spill]]  ;;  %s2670_s21 = smov %s2101_s22 }
 0xc8d   : > { %p29_p1 = scmp.ge.s32.totalorder %s2667_s24, 4   ;;  %s2671_s22 = smov %s2668_s5 }
 0xc8f   :  { %31 = sbr.rel (!%p29_p1) target bundleno = 11 (0xb), region = 140 }
 0xc96   :  { %1489 = vsyncpa [#allocation4], 1 }
 0xc97   :  { %1491 = vsyncpa [#allocation4 + $0x1], 1 }
 0xc98   :  { %1492 = vsyncpa [#allocation7], 1 }
 0xc99   :  { %1493 = vsyncpa [#allocation10], 1 }
 0xc9a   :  { %1494 = vsyncpa [#allocation5], 1 }
 0xc9b   :  { %1496 = vsyncpa [#allocation5 + $0x1], 1 }

// kernel: tpu_custom_call.1
= control target key start
LH: loop header
LB: loop body
LE: loop exit
PB: predicated region body
PF: predicated region fallthrough
CT: control target
= control target key end

     0   :  { %s2604_s0 = inlined_call_operand.vmem [shape: f32[16,32], index: 0, kind: input, shape index: {}]   ;;  %s2605_s1 = inlined_call_operand.vmem [shape: f32[1,32], index: 1, kind: input, shape index: {}]   ;;  %s2606_s2 = inlined_call_operand.vmem [shape: f32[1,32], index: 2, kind: input, shape index: {}]   ;;  %s2607_s3 = inlined_call_operand.vmem [shape: bf16[32,96], index: 3, kind: input, shape index: {}]   ;;  %s2608_s4 = inlined_call_operand.hbm [shape: f32[1,96], index: 4, kind: input, shape index: {}]   ;;  %s2609_s5 = inlined_call_operand.hbm [shape: f32[1,32], index: 5, kind: input, shape index: {}]   ;;  %s2610_s6 = inlined_call_operand.hbm [shape: f32[1,32], index: 6, kind: input, shape index: {}]   ;;  %s2611_s7 = inlined_call_operand.vmem [shape: bf16[32,32], index: 7, kind: input, shape index: {}]   ;;  %s2612_s8 = inlined_call_operand.hbm [shape: f32[1,32], index: 8, kind: input, shape index: {}]   ;;  %s2613_s9 = inlined_call_operand.hbm [shape: f32[1,32], index: 9, kind: input, shape index: {}]   ;;  %s2614_s10 = inlined_call_operand.vmem [shape: f32[1,32], index: 10, kind: input, shape index: {}]   ;;  %s2615_s11 = inlined_call_operand.vmem [shape: f32[1,32], index: 11, kind: input, shape index: {}]   ;;  %s2616_s12 = inlined_call_operand.vmem [shape: bf16[32,64], index: 12, kind: input, shape index: {}]   ;;  %s2617_s13 = inlined_call_operand.vmem [shape: f32[1,64], index: 13, kind: input, shape index: {}]   ;;  %s2618_s14 = inlined_call_operand.vmem [shape: bf16[64,32], index: 14, kind: input, shape index: {}]   ;;  %s2619_s15 = inlined_call_operand.vmem [shape: f32[1,32], index: 15, kind: input, shape index: {}]   ;;  %s2620_s16 = inlined_call_operand.hbm [shape: f32[16,32], index: 16, kind: output, shape index: {}]  }
   0x1   :  { %2633 = sst [smem:[#allocation24_spill]] %s2604_s0 }
   0x2   :  { %2634 = sst [smem:[#allocation25_spill]] %s2609_s5 }
   0x3   :  { %2635 = sst [smem:[#allocation26_spill]] %s2619_s15 }
   0x4   :  { %2636 = sst [smem:[#allocation27_spill]] %s2620_s16 }
   0x5   :  { %21 = vsyncpa [#allocation4], 0 }
   0x6   :  { %22 = vsyncpa [#allocation7], 0 }
   0x7   :  { %23 = vsyncpa [#allocation10], 0 }
   0x8   :  { %24 = vsyncpa [#allocation5], 0 }
   0x9   :  { %26 = vsyncpa [#allocation5 + $0x1], 0  ;;  %s2219_s21 = smov 0   ;;  %s2221_s22 = smov 0  }
   0xa   :  { %s2223_s23 = smov 0   ;;  %s2225_s24 = smov 0  }
   0xb LB: > { %2637 = sst [smem:[#allocation17_spill]] %s2097_s21  ;;  %s2240_s25 = sadd.s32 4294967295, %s2109_s24   ;;  %s2109_s24 = sphi %s2225_s24, %s2667_s24   ;;  %s2105_s23 = sphi %s2223_s23, %s2669_s23   ;;  %s2101_s22 = sphi %s2221_s22, %s2671_s22   ;;  %s2097_s21 = sphi %s2219_s21, %s2670_s21  }
   0xc   : > { %2638 = sst [smem:[#allocation18_spill]] %s2105_s23  ;;  %s1580_s26 = sadd.s32 4294967294, %s2109_s24  }
   0xd   : > { %2639 = sst [smem:[#allocation19_spill]] %s2109_s24  ;;  %s2244_s27 = sadd.s32 1, %s2109_s24  }
   0xe   : > { %2640 = sst [smem:[#allocation20_spill]] %s2244_s27  ;;  %s380_s28 = sadd.s32 1, %s2105_s23 }
   0xf   : > { %s377_s29 = ssub.s32 %s2109_s24, %s2244_s27  ;;  %p390_p0 = scmp.ne.s32.totalorder %s2105_s23, %s2101_s22 }
  0x10   : > { %p378_p1 = scmp.eq.s32.totalorder %s377_s29, 0  ;;  %p391_p2 = scmp.eq.s32.totalorder %s2240_s25, 1 }
  0x11   : > { %p396_p3 = scmp.ne.s32.totalorder %s2101_s22, %s2097_s21  ;;  %p397_p4 = scmp.eq.s32.totalorder %s1580_s26, 1 }
  0x12   : > { %s2255_s30 = scalar_select %p378_p1, %s2105_s23, %s380_s28  }
  0x13   : > { %p2257_p5 = por %p391_p2, %p390_p0  ;;  %p2261_p6 = por %p397_p4, %p396_p3 }
  0x14   : > { %2641 = sst [smem:[#allocation21_spill]] %s2255_s30  ;;  %p1581_p7 = scmp.ge.s32.totalorder %s2109_s24, 1 }
  0x15   : > { %s2642_s0 = scalar_select %p2257_p5, 1, 0 }
  0x16   : > { %s2644_s17 = scalar_select %p2261_p6, 1, 0 }
  0x17   : > { %2643 = sst [smem:[#allocation22_spill]] %s2642_s0  ;;  %p404_p8 = scmp.lt.s32.totalorder %s2109_s24, 3 }
  0x18   : > { %2645 = sst [smem:[#allocation23_spill]] %s2644_s17  ;;  %p2628_p9 = scmp.eq.s32.totalorder %s2240_s25, 0 }
  0x19   : > { %p2268_p10 = pnand %p1581_p7, %p404_p8  ;;  %s2111_s19 = smov [#allocation6]  }
  0x1a   : > { %s437_s20 = sshll.u32 %s2111_s19, 4  ;;  %s2112_s26 = smov [#allocation9]   ;;  %s438_s20 = int_to_ptr.vmem [resolvable:$true] %s437_s20 }
  0x1b   : > { %s2646_s18 = scalar_select %p2268_p10, 1, 0 }
  0x1c   : > { %p1770_p11 = pneg %p2268_p10  ;;  %s462_s28 = sshll.u32 %s2112_s26, 4  ;;  %s2280_s28 = int_to_ptr.vmem [resolvable:$true] %s462_s28 }
  0x1d   : > { %s2113_s30 = smov [#allocation3]   ;;  %s2648_s5 = sld [smem:[#allocation25_spill]] }
  0x1e   : > { %p2276_p12 = pnand %p2628_p9, %p1770_p11  ;;  %s426_s23 = sshll.u32 %s2113_s30, 4  ;;  %s2282_s23 = int_to_ptr.vmem [resolvable:$true] %s426_s23 }
  0x20   : > { %p2292_p0 = pneg %p2276_p12 }
  0x23   : > { %s1895_s19 = scalar_lea.hbm %s2648_s5, 16 }
  0x24   : > { %p1896_p13 = scmp.ne.s32.totalorder %s2648_s5, %s1895_s19  ;;  %p1902_p3 = scmp.lt.u32.totalorder %s1895_s19, %s2648_s5 }
  0x26   : > { %p1898_p1 = pnand %p2292_p0, %p1896_p13 }
  0x28   : > { %p1899_p2 = pneg %p1898_p1 }
  0x2a   : > { %p1904_p4 = pnand %p1902_p3, %p1899_p2 }
  0x2c   : > { %1907 = shalt.err (!%p1904_p4)
}
  0x2d   : > { %s1908_s27 = scalar_lea.vmem %s438_s20, 16  ;;  %s1915_s21 = scalar_lea.vmem %s438_s20, 32 }
  0x2e   : > { %p1909_p7 = scmp.ne.s32.totalorder %s438_s20, %s1908_s27  ;;  %p1916_p9 = scmp.lt.s32.totalorder %s438_s20, %s438_s20 }
  0x2f   : > { %p1917_p6 = scmp.lt.s32.totalorder %s1915_s21, %s1908_s27 }
  0x30   : > { %p1911_p8 = pnand %p1909_p7, %p2292_p0 }
  0x31   : > { %p1918_p5 = por %p1917_p6, %p1916_p9 }
  0x32   : > { %p1912_p11 = pneg %p1911_p8 }
  0x34   : > { %p1919_p10 = pnand %p1918_p5, %p1912_p11 }
  0x36   : > { %1922 = shalt.err (!%p1919_p10)
}
  0x37   : > { %1776 = dma.hbm_to_vmem [thread:$0]  (!%p2276_p12), %s2648_s5, 16, %s438_s20, [#allocation7]  }
  0x38   : > { %s1923_s30 = scalar_lea.hbm %s2612_s8, 16 }
  0x39   : > { %p1924_p13 = scmp.ne.s32.totalorder %s2612_s8, %s1923_s30  ;;  %p1930_p5 = scmp.lt.u32.totalorder %s1923_s30, %s2612_s8 }
  0x3b   : > { %p1926_p1 = pnand %p1924_p13, %p2292_p0 }
  0x3d   : > { %p1927_p6 = pneg %p1926_p1 }
  0x3f   : > { %p1932_p9 = pnand %p1930_p5, %p1927_p6 }
  0x41   : > { %1935 = shalt.err (!%p1932_p9)
}
  0x42   : > { %s1936_s20 = scalar_lea.vmem %s2280_s28, 16  ;;  %s1943_s15 = scalar_lea.vmem %s2280_s28, 32 }
  0x43   : > { %p1937_p10 = scmp.ne.s32.totalorder %s2280_s28, %s1936_s20  ;;  %p1944_p4 = scmp.lt.s32.totalorder %s2280_s28, %s2280_s28 }
  0x44   : > { %p1945_p7 = scmp.lt.s32.totalorder %s1943_s15, %s1936_s20 }
  0x45   : > { %p1939_p2 = pnand %p1937_p10, %p2292_p0 }
  0x46   : > { %p1946_p8 = por %p1945_p7, %p1944_p4 }
  0x47   : > { %p1940_p3 = pneg %p1939_p2 }
  0x49   : > { %p1947_p11 = pnand %p1946_p8, %p1940_p3 }
  0x4b   : > { %1950 = shalt.err (!%p1947_p11)
}
  0x4c   : > { %1782 = dma.hbm_to_vmem [thread:$0]  (!%p2276_p12), %s2612_s8, 16, %s2280_s28, [#allocation10]  }
  0x4d   : > { %s1951_s19 = scalar_lea.hbm %s2608_s4, 16 }
  0x4e   : > { %p1952_p13 = scmp.ne.s32.totalorder %s2608_s4, %s1951_s19  ;;  %p1958_p5 = scmp.lt.u32.totalorder %s1951_s19, %s2608_s4 }
  0x50   : > { %p1954_p1 = pnand %p1952_p13, %p2292_p0 }
  0x52   : > { %p1955_p6 = pneg %p1954_p1 }
  0x54   : > { %p1960_p9 = pnand %p1958_p5, %p1955_p6 }
  0x56   : > { %1963 = shalt.err (!%p1960_p9)
}
  0x57   : > { %s1964_s28 = scalar_lea.vmem %s2282_s23, 16  ;;  %s1971_s15 = scalar_lea.vmem %s2282_s23, 32 }
  0x58   : > { %p1965_p10 = scmp.ne.s32.totalorder %s2282_s23, %s1964_s28  ;;  %p1972_p4 = scmp.lt.s32.totalorder %s2282_s23, %s2282_s23 }
  0x59   : > { %p1973_p7 = scmp.lt.s32.totalorder %s1971_s15, %s1964_s28 }
  0x5a   : > { %p1967_p2 = pnand %p1965_p10, %p2292_p0 }
  0x5b   : > { %p1974_p8 = por %p1973_p7, %p1972_p4 }
  0x5c   : > { %p1968_p3 = pneg %p1967_p2 }
  0x5e   : > { %p1975_p11 = pnand %p1974_p8, %p1968_p3 }
  0x60   : > { %1978 = shalt.err (!%p1975_p11)
}
  0x61   : > { %1773 = dma.hbm_to_vmem [thread:$0]  (!%p2276_p12), %s2608_s4, 16, %s2282_s23, [#allocation4]  }
  0x62   : > { %s2114_s17 = smov [#allocation8]   ;;  %s2115_s19 = smov [#allocation11]  }
  0x63   : > { %s448_s16 = sshll.u32 %s2114_s17, 4  ;;  %s473_s30 = sshll.u32 %s2115_s19, 4  ;;  %s449_s16 = int_to_ptr.vmem [resolvable:$true] %s448_s16  ;;  %s474_s30 = int_to_ptr.vmem [resolvable:$true] %s473_s30 }
  0x64   : > { %s1979_s20 = scalar_lea.hbm %s2610_s6, 16 }
  0x65   : > { %p1980_p13 = scmp.ne.s32.totalorder %s2610_s6, %s1979_s20  ;;  %p1986_p5 = scmp.lt.u32.totalorder %s1979_s20, %s2610_s6 }
  0x67   : > { %p1982_p1 = pnand %p1980_p13, %p2292_p0 }
  0x69   : > { %p1983_p6 = pneg %p1982_p1 }
  0x6b   : > { %p1988_p9 = pnand %p1986_p5, %p1983_p6 }
  0x6d   : > { %1991 = shalt.err (!%p1988_p9)
}
  0x6e   : > { %s1992_s23 = scalar_lea.vmem %s449_s16, 16  ;;  %s1999_s24 = scalar_lea.vmem %s449_s16, 32 }
  0x6f   : > { %p1993_p10 = scmp.ne.s32.totalorder %s449_s16, %s1992_s23  ;;  %p2000_p4 = scmp.lt.s32.totalorder %s449_s16, %s449_s16 }
  0x70   : > { %p2001_p7 = scmp.lt.s32.totalorder %s1999_s24, %s1992_s23 }
  0x71   : > { %p1995_p2 = pnand %p1993_p10, %p2292_p0 }
  0x72   : > { %p2002_p8 = por %p2001_p7, %p2000_p4 }
  0x73   : > { %p1996_p3 = pneg %p1995_p2 }
  0x75   : > { %p2003_p11 = pnand %p2002_p8, %p1996_p3 }
  0x77   : > { %2006 = shalt.err (!%p2003_p11)
}
  0x78   : > { %1779 = dma.hbm_to_vmem [thread:$0]  (!%p2276_p12), %s2610_s6, 16, %s449_s16, [#allocation7]  }
  0x79   : > { %s2007_s21 = scalar_lea.hbm %s2613_s9, 16 }
  0x7a   : > { %p2008_p13 = scmp.ne.s32.totalorder %s2613_s9, %s2007_s21  ;;  %p2014_p5 = scmp.lt.u32.totalorder %s2007_s21, %s2613_s9 }
  0x7c   : > { %p2010_p1 = pnand %p2008_p13, %p2292_p0 }
  0x7e   : > { %p2011_p6 = pneg %p2010_p1 }
  0x80   : > { %p2016_p9 = pnand %p2014_p5, %p2011_p6 }
  0x82   : > { %2019 = shalt.err (!%p2016_p9)
}
  0x83   : > { %s2020_s23 = scalar_lea.vmem %s474_s30, 16  ;;  %s2027_s16 = scalar_lea.vmem %s474_s30, 32 }
  0x84   : > { %p2021_p10 = scmp.ne.s32.totalorder %s474_s30, %s2020_s23  ;;  %p2028_p4 = scmp.lt.s32.totalorder %s474_s30, %s474_s30 }
  0x85   : > { %p2029_p7 = scmp.lt.s32.totalorder %s2027_s16, %s2020_s23 }
  0x86   : > { %p2023_p2 = pnand %p2021_p10, %p2292_p0 }
  0x87   : > { %p2030_p8 = por %p2029_p7, %p2028_p4 }
  0x88   : > { %p2024_p3 = pneg %p2023_p2 }
  0x8a   : > { %p2031_p11 = pnand %p2030_p8, %p2024_p3 }
  0x8c   : > { %2034 = shalt.err (!%p2031_p11)
}
  0x8d   : > { %1785 = dma.hbm_to_vmem [thread:$0]  (!%p2276_p12), %s2613_s9, 16, %s474_s30, [#allocation10]  }
  0x8e   : > { %p2650_p13 = scmp.ne.s32.totalorder %s2646_s18, 0 }
  0x8f   : > { %p2651_p1 = scmp.eq.s32.totalorder (!%p2650_p13), %s2240_s25, 0 }
  0x90   : > { %511 = sbr.rel (%p2650_p13) target bundleno = 3195 (0xc7b), region = 84 }
  0x97   : > { %2080 = dma.done.wait (%p2651_p1), [#allocation4], 16   ;;  %p2652_p0 = pmov %p2651_p1 }
  0x99   : > { %2082 = vsyncadd (%p2652_p0), [#allocation4], 4294967280  ;;  %p2653_p6 = pmov %p2652_p0 }
  0x9a   : > { %p2654_p5 = pmov %p2652_p0 }
  0x9b   : > { %2084 = dma.done.wait (%p2653_p6), [#allocation7], 32  }
  0x9c   : > { %2086 = vsyncadd (%p2654_p5), [#allocation7], 4294967264  ;;  %p2655_p9 = pmov %p2652_p0 }
  0x9d   : > { %p2656_p12 = pmov %p2652_p0 }
  0x9e   : > { %2088 = dma.done.wait (%p2655_p9), [#allocation10], 32  }
  0x9f   : > { %2090 = vsyncadd (%p2656_p12), [#allocation10], 4294967264  ;;  %p576_p10 = scmp.lt.s32.totalorder %s2240_s25, 1  ;;  %s2657_s19 = sld [smem:[#allocation24_spill]]  ;;  %vm584_vm0 = vcmask 261120   ;;  %v1855_v7 = vld [vmem:[%s2607_s3] sm:$0xff]  }
  0xa0   : > { %v2116_v8 = vmov 0.0   ;;  %vm2117_vm1 = vmmov 0   ;;  %v1856_v9 = vld [vmem:[%s2607_s3 + $0x8] sm:$0xff]   ;;  %v1596_v14 = vld [vmem:[%s2605_s1] ss:$0 sm:$0xff]  ;;  %s2118_s24 = smov 96  }
  0xa1   : > { %s577_s18 = scalar_select %p576_p10, %s2240_s25, 1  ;;  %1664 = vmatprep.subr.bf16.mxu0 %v2116_v8  ;;  %1668 = vmatprep.mubr.msk.bf16.mxu0 %vm2117_vm1, %v2116_v8  ;;  %v1597_v16 = vld [vmem:[%s2606_s2] ss:$0 sm:$0xff]  ;;  %v1598_v20 = vld [vmem:[#allocation3] ss:$0 sm:$0xff]  ;;  %vm724_vm2 = vcmask 64512  }
  0xa2   : > { %1665 = vmatpush3.bf16.msra.mxu0 %v1855_v7  ;;  %1672 = vmatprep.subr.bf16.mxu1 %v2116_v8  ;;  %v1603_v28 = vld [vmem:[#allocation8] ss:$0 sm:$0xff]  ;;  %s2119_s17 = smov 32   ;;  %v1602_v34 = vld [vmem:[#allocation6] ss:$0 sm:$0xff]  ;;  %s2122_s26 = smov 80  }
  0xa3   : > { %s1595_s29 = sshll.u32 %s577_s18, 3  ;;  %1666 = vmatprep.subr.bf16.mxu0 %v2116_v8  ;;  %1674 = vmatprep.mubr.msk.bf16.mxu1 %vm2117_vm1, %v2116_v8  ;;  %s2120_s18 = smov 120   ;;  %vm789_vm3 = vcmask 1043456   ;;  %vm949_vm4 = vcmask 130112   ;;  %vm1065_vm5 = vcmask 195712   ;;  %vm1181_vm6 = vcmask 261312  }
  0xa4   : > { %s2123_s30 = smov 112   ;;  %s2126_s27 = smov 64   ;;  %vm1411_vm7 = vcmask 523264  }
  0xa5   : > { %s579_s5 = scalar_lea.vmem %s2657_s19, %s1595_s29  ;;  %s2121_s29 = smov 88  }
  0xa6   : > { %v2411_v0 = vld [vmem:[%s579_s5] sm:$0xff]  ;;  %1667 = vmatpush3.bf16.msra.mxu0 %v1856_v9  ;;  %s2124_s19 = smov 72   ;;  %s2125_s5 = smov 104  }
  0xa7   : > { %v585_v1 = vsel %vm584_vm0, %v2411_v0, 0.0  ;;  %1678 = vmatprep.subr.bf16.mxu0 %v2116_v8  ;;  %s2127_s21 = smov 56   ;;  %s2128_s20 = smov 48  }
  0xa8   : > { %586 = vadd.xlane.f32.xlu0 %v585_v1  ;;  %s2129_s28 = smov 40   ;;  %s2130_s15 = smov 8  }
 0x135   : > { %v587_v2 = vpop.xlane.xlu0 %586 }
 0x136   : > { %v589_v3 = vmul.f32 0.03125, %v587_v2 }
 0x138   : > { %v590_v4 = vsub.f32 %v2411_v0, %v589_v3 }
 0x13a   : > { %v591_v5 = vmul.f32 %v590_v4, %v590_v4 }
 0x13c   : > { %v592_v6 = vsel %vm584_vm0, %v591_v5, 0.0 }
 0x13d   : > { %593 = vadd.xlane.f32.xlu0 %v592_v6 }
 0x1ca   : > { %v594_v10 = vpop.xlane.xlu0 %593 }
 0x1cb   : > { %v595_v11 = vmul.f32 0.03125, %v594_v10 }
 0x1cd   : > { %v596_v12 = vadd.f32 1e-06, %v595_v11 }
 0x1cf   : > { %1865 = vrsqrt.f32 %v596_v12 }
 0x1d9   : > { %v1866_v13 = vpop.eup %1865 }
 0x1da   : > { %v598_v15 = vmul.f32 %v1866_v13, %v590_v4 }
 0x1dc   : > { %v605_v17 = vmul.f32 %v1596_v14, %v598_v15 }
 0x1de   : > { %v612_v18 = vadd.f32 %v1597_v16, %v605_v17 }
 0x1e0   : > { %v613_v19 = vpack.c.bf16 %v612_v18, %v612_v18 }
 0x1e2   : > { %1669 = vmatmul.mubr.msk.bf16.vlgmr.msra.gmra.mrb[0].mxu0 %vm584_vm0, %v613_v19 }
 0x1e3   : > { %1680 = vmatprep.mubr.msk.bf16.mxu0 %vm2117_vm1, %v2116_v8 }
 0x2b5   : > { %v674_v21 = vpop.f32.mrb[0].mxu0 }
 0x2b6   : > { %v2440_v22 = vadd.f32 %v1598_v20, %v674_v21  ;;  %v1670_v23 = vpop.f32.mrb[1].mxu0 }
 0x2b7   : > { %v677_v24 = vpop.f32.mrb[2].mxu0 }
 0x2b8   : > { %v1671_v25 = vpop.f32.mrb[3].mxu0  ;;  %v681_v26 = vmul.f32 %v2440_v22, %v2440_v22 }
 0x2ba   : > { %699 = vrot.lane.b32.xlu1 %v681_v26, %s2118_s24  ;;  %v682_v27 = vsel %vm584_vm0, %v681_v26, 0.0 }
 0x2bb   : > { %683 = vadd.xlane.f32.xlu0 %v682_v27 }
 0x2d1   : > { %713 = vrot.lane.b32.xlu0 %v1603_v28, %s2119_s17  ;;  %s2131_s17 = smov 16  }
 0x32c   : > { %v700_v29 = vpop.permute.xlu1 %699 }
 0x32d   : > { %v702_v30 = vsel %vm584_vm0, %v700_v29, 0.0 }
 0x32e   : > { %703 = vadd.xlane.f32.xlu1 %v702_v30 }
 0x348   : > { %v684_v31 = vpop.xlane.xlu0 %683 }
 0x349   : > { %v685_v32 = vmax.f32 %v684_v31, 1e-24 }
 0x34b   : > { %1867 = vrsqrt.f32 %v685_v32  ;;  %v720_v32 = vpack.c.bf16 %v2440_v22, %v2440_v22 }
 0x34c   : > { %v714_v43 = vpop.permute.xlu0 %713 }
 0x355   : > { %v1868_v33 = vpop.eup %1867 }
 0x356   : > { %v687_v35 = vmul.f32 %v1868_v33, %v2440_v22 }
 0x358   : > { %v694_v36 = vmul.f32 %v1602_v34, %v687_v35 }
 0x35a   : > { %v695_v37 = vmul.f32 5.656854, %v694_v36 }
 0x35c   : > { %v696_v38 = vmul.f32 0.35355338, %v695_v37 }
 0x35e   : > { %v718_v39 = vpack.c.bf16 %v696_v38, %v696_v38 }
 0x360   : > { %835 = vrot.lane.b32.xlu1 %v718_v39, %s2120_s18  ;;  %s2132_s18 = smov 24  }
 0x3bb   : > { %v704_v40 = vpop.xlane.xlu1 %703 }
 0x3bc   : > { %v705_v41 = vmax.f32 %v704_v40, 1e-24 }
 0x3be   : > { %1869 = vrsqrt.f32 %v705_v41 }
 0x3c8   : > { %v1870_v42 = vpop.eup %1869 }
 0x3c9   : > { %v707_v44 = vmul.f32 %v1870_v42, %v2440_v22 }
 0x3cb   : > { %v716_v45 = vmul.f32 %v714_v43, %v707_v44 }
 0x3cd   : > { %v717_v46 = vmul.f32 5.656854, %v716_v45 }
 0x3cf   : > { %v719_v47 = vpack.c.bf16 %v717_v46, %v717_v46 }
 0x3d1   : > { %722 = vrot.lane.b32.xlu0 %v719_v47, %s2118_s24  ;;  %s2660_s24 = sld [smem:[#allocation27_spill]] }
 0x3d2   : > { %v836_v53 = vpop.permute.xlu1 %835 }
 0x3d5   : > { %837 = vrot.lane.b32.xlu0 %v719_v47, %s2121_s29 }
 0x3d9   : > { %953 = vrot.lane.b32.xlu0 %v719_v47, %s2122_s26  ;;  %s2133_s26 = smov [#allocation12]  }
 0x3dd   : > { %951 = vrot.lane.b32.xlu0 %v718_v39, %s2123_s30  ;;  %s573_s30 = sand.u32 1, %s2101_s22  }
 0x3e1   : > { %1069 = vrot.lane.b32.xlu0 %v719_v47, %s2124_s19  ;;  %s1594_s19 = sshll.u32 %s573_s30, 3 }
 0x3e5   : > { %1067 = vrot.lane.b32.xlu0 %v718_v39, %s2125_s5 }
 0x443   : > { %v723_v48 = vpop.permute.xlu0 %722 }
 0x444   : > { %v729_v49 = vsel %vm724_vm2, %v723_v48, 0 }
 0x445   : > { %1673 = vmatpush3.bf16.xpose.msra.mxu1 %v729_v49 }
 0x446   : > { %1684 = vmatprep.subr.bf16.mxu1 %v2116_v8 }
 0x447   : > { %v838_v50 = vpop.permute.xlu0 %837 }
 0x448   : > { %v843_v51 = vsel %vm724_vm2, %v838_v50, 0 }
 0x44b   : > { %v954_v52 = vpop.permute.xlu0 %953 }
 0x44c   : > { %1675 = vmatmul.mubr.msk.bf16.vlgmr.msra.gmra.mrb[0].mxu1 %vm724_vm2, %v718_v39  ;;  %v959_v55 = vsel %vm724_vm2, %v954_v52, 0 }
 0x44d   : > { %1685 = vmatpush3.bf16.xpose.msra.mxu1 %v843_v51  ;;  %1686 = vmatprep.mubr.msk.bf16.mxu1 %vm2117_vm1, %v2116_v8 }
 0x44e   : > { %1696 = vmatprep.subr.bf16.mxu1 %v2116_v8 }
 0x44f   : > { %v952_v54 = vpop.permute.xlu0 %951 }
 0x453   : > { %v1070_v56 = vpop.permute.xlu0 %1069 }
 0x454   : > { %1687 = vmatmul.mubr.msk.bf16.vlgmr.msra.gmra.mrb[4].mxu1 %vm724_vm2, %v836_v53  ;;  %v1075_v57 = vsel %vm724_vm2, %v1070_v56, 0 }
 0x455   : > { %1697 = vmatpush3.bf16.xpose.msra.mxu1 %v959_v55  ;;  %1698 = vmatprep.mubr.msk.bf16.mxu1 %vm2117_vm1, %v2116_v8 }
 0x456   : > { %1708 = vmatprep.subr.bf16.mxu1 %v2116_v8 }
 0x457   : > { %v1068_v58 = vpop.permute.xlu0 %1067 }
 0x45c   : > { %1699 = vmatmul.mubr.msk.bf16.vlgmr.msra.gmra.mrb[8].mxu1 %vm724_vm2, %v952_v54 }
 0x45d   : > { %1709 = vmatpush3.bf16.xpose.msra.mxu1 %v1075_v57  ;;  %1710 = vmatprep.mubr.msk.bf16.mxu1 %vm2117_vm1, %v2116_v8 }
 0x45e   : > { %1720 = vmatprep.subr.bf16.mxu1 %v2116_v8 }
 0x464   : > { %1711 = vmatmul.mubr.msk.bf16.vlgmr.msra.gmra.mrb[12].mxu1 %vm724_vm2, %v1068_v58 }
 0x465   : > { %1724 = vmatprep.mubr.msk.bf16.mxu1 %vm2117_vm1, %v2116_v8 }
 0x51f   : > { %v765_v59 = vpop.f32.mrb[0].mxu1 }
 0x520   : > { %v1676_v60 = vpop.f32.mrb[1].mxu1  ;;  %v771_v61 = vsel %vm724_vm2, %v765_v59, -inf }
 0x521   : > { %772 = vmax.xlane.f32.xlu1 %v771_v61  ;;  %v768_v62 = vpop.f32.mrb[2].mxu1 }
 0x522   : > { %v1677_v63 = vpop.f32.mrb[3].mxu1 }
 0x527   : > { %v879_v1 = vpop.f32.mrb[4].mxu1 }
 0x528   : > { %v1688_v2 = vpop.f32.mrb[5].mxu1  ;;  %v885_v3 = vsel %vm724_vm2, %v879_v1, -inf }
 0x529   : > { %886 = vmax.xlane.f32.xlu0 %v885_v3  ;;  %v882_v4 = vpop.f32.mrb[6].mxu1 }
 0x52a   : > { %v1689_v5 = vpop.f32.mrb[7].mxu1 }
 0x52f   : > { %v995_v6 = vpop.f32.mrb[8].mxu1 }
 0x530   : > { %v1700_v7 = vpop.f32.mrb[9].mxu1  ;;  %v1001_v9 = vsel %vm724_vm2, %v995_v6, -inf }
 0x531   : > { %1002 = vmax.xlane.f32.xlu0 %v1001_v9  ;;  %v998_v10 = vpop.f32.mrb[10].mxu1  ;;  %v1857_v7 = vld [vmem:[%s2611_s7] sm:$0xff]   ;;  %v1858_v9 = vld [vmem:[%s2611_s7 + $0x8] sm:$0xff]  }
 0x532   : > { %v1701_v11 = vpop.f32.mrb[11].mxu1  ;;  %1721 = vmatpush3.bf16.msra.mxu1 %v1857_v7 }
 0x533   : > { %1722 = vmatprep.subr.bf16.mxu1 %v2116_v8 }
 0x536   : > { %1723 = vmatpush3.bf16.msra.mxu1 %v1858_v9 }
 0x537   : > { %v1111_v12 = vpop.f32.mrb[12].mxu1  ;;  %1736 = vmatprep.subr.bf16.mxu1 %v2116_v8 }
 0x538   : > { %v1712_v13 = vpop.f32.mrb[13].mxu1  ;;  %v1117_v14 = vsel %vm724_vm2, %v1111_v12, -inf }
 0x539   : > { %1118 = vmax.xlane.f32.xlu0 %v1117_v14  ;;  %v1114_v15 = vpop.f32.mrb[14].mxu1 }
 0x53a   : > { %v1713_v16 = vpop.f32.mrb[15].mxu1 }
 0x5ae   : > { %v773_v17 = vpop.xlane.xlu1 %772 }
 0x5af   : > { %v774_v18 = vsub.f32 %v765_v59, %v773_v17 }
 0x5b1   : > { %v775_v19 = vmul.f32 1.442695, %v774_v18 }
 0x5b3   : > { %1871 = vpow2.f32 %v775_v19 }
 0x5b6   : > { %v887_v20 = vpop.xlane.xlu0 %886 }
 0x5b7   : > { %v888_v21 = vsub.f32 %v879_v1, %v887_v20 }
 0x5b9   : > { %v889_v23 = vmul.f32 1.442695, %v888_v21 }
 0x5bb   : > { %1873 = vpow2.f32 %v889_v23 }
 0x5bd   : > { %v1872_v24 = vpop.eup %1871 }
 0x5be   : > { %v777_v25 = vsel %vm724_vm2, %v1872_v24, 0.0  ;;  %v1003_v26 = vpop.xlane.xlu0 %1002 }
 0x5bf   : > { %778 = vadd.xlane.f32.xlu1 %v777_v25  ;;  %v1004_v35 = vsub.f32 %v995_v6, %v1003_v26 }
 0x5c1   : > { %v1005_v36 = vmul.f32 1.442695, %v1004_v35  ;;  %v1616_v35 = vld [vmem:[#allocation11] ss:$0 sm:$0xff] }
 0x5c5   : > { %v1874_v27 = vpop.eup %1873 }
 0x5c6   : > { %v1119_v28 = vpop.xlane.xlu0 %1118  ;;  %v891_v29 = vsel %vm724_vm2, %v1874_v27, 0.0 }
 0x5c7   : > { %v1120_v30 = vsub.f32 %v1111_v12, %v1119_v28  ;;  %892 = vadd.xlane.f32.xlu0 %v891_v29 }
 0x5c9   : > { %v1121_v31 = vmul.f32 1.442695, %v1120_v30 }
 0x5cb   : > { %1875 = vpow2.f32 %v1121_v31 }
 0x5cc   : > { %1877 = vpow2.f32 %v1005_v36 }
 0x5d0   : > { %784 = vrot.lane.b32.xlu1 %v720_v32, %s2126_s27 }
 0x5d5   : > { %v1876_v33 = vpop.eup %1875 }
 0x5d6   : > { %v1123_v34 = vsel %vm724_vm2, %v1876_v33, 0.0  ;;  %v1878_v37 = vpop.eup %1877 }
 0x5d7   : > { %1124 = vadd.xlane.f32.xlu0 %v1123_v34  ;;  %v1007_v38 = vsel %vm724_vm2, %v1878_v37, 0.0 }
 0x5ed   : > { %897 = vrot.lane.b32.xlu0 %v720_v32, %s2127_s21  ;;  %s2658_s21 = sld [smem:[#allocation26_spill]] }
 0x5f3   : > { %v1624_v9 = vld [vmem:[%s2658_s21] ss:$0 sm:$0xff] }
 0x5f4   : > { %1008 = vadd.xlane.f32.xlu1 %v1007_v38 }
 0x605   : > { %1013 = vrot.lane.b32.xlu1 %v720_v32, %s2128_s20  ;;  %s2659_s20 = sld [smem:[#allocation22_spill]] }
 0x609   : > { %1129 = vrot.lane.b32.xlu1 %v720_v32, %s2129_s28  ;;  %s1631_s28 = sshll.u32 %s2240_s25, 7  ;;  %s1458_s25 = scalar_lea.sflag [#allocation5], %s573_s30 }
 0x60b   : > { %p2662_p3 = scmp.ne.s32.totalorder %s2659_s20, 0 }
 0x64c   : > { %v779_v22 = vpop.xlane.xlu1 %778 }
 0x64d   : > { %1879 = vrcp.f32 %v779_v22 }
 0x650   : > { %v785_v39 = vpop.permute.xlu1 %784 }
 0x651   : > { %v791_v40 = vsel %vm789_vm3, %v785_v39, 0 }
 0x652   : > { %1679 = vmatpush3.bf16.msra.mxu0 %v791_v40 }
 0x653   : > { %1690 = vmatprep.subr.bf16.mxu0 %v2116_v8 }
 0x654   : > { %v893_v42 = vpop.xlane.xlu0 %892 }
 0x655   : > { %1881 = vrcp.f32 %v893_v42 }
 0x657   : > { %v1880_v41 = vpop.eup %1879 }
 0x658   : > { %v781_v43 = vmul.f32 %v1880_v41, %v1872_v24  ;;  %v1612_v24 = vld [vmem:[#allocation9] ss:$0 sm:$0xff] }
 0x65a   : > { %v782_v44 = vpack.c.bf16 %v781_v43, %v781_v43 }
 0x65c   : > { %1681 = vmatmul.mubr.msk.bf16.vlgmr.msra.gmra.mrb[4].mxu0 %vm724_vm2, %v782_v44 }
 0x65d   : > { %1692 = vmatprep.mubr.msk.bf16.mxu0 %vm2117_vm1, %v2116_v8 }
 0x65f   : > { %v1882_v45 = vpop.eup %1881 }
 0x660   : > { %v895_v47 = vmul.f32 %v1882_v45, %v1874_v27  ;;  %v1859_v45 = vld [vmem:[%s2616_s12] sm:$0xff]  }
 0x662   : > { %v896_v50 = vpack.c.bf16 %v895_v47, %v895_v47 }
 0x664   : > { %v1125_v46 = vpop.xlane.xlu0 %1124 }
 0x668   : > { %v898_v48 = vpop.permute.xlu0 %897 }
 0x669   : > { %v903_v49 = vsel %vm789_vm3, %v898_v48, 0 }
 0x66a   : > { %1691 = vmatpush3.bf16.msra.mxu0 %v903_v49 }
 0x66b   : > { %1702 = vmatprep.subr.bf16.mxu0 %v2116_v8 }
 0x66d   : > { %1693 = vmatmul.mubr.msk.bf16.vlgmr.msra.gmra.mrb[8].mxu0 %vm724_vm2, %v896_v50  ;;  %v1617_v50 = vld [vmem:[%s2614_s10] ss:$0 sm:$0xff] }
 0x66e   : > { %1704 = vmatprep.mubr.msk.bf16.mxu0 %vm2117_vm1, %v2116_v8 }
 0x681   : > { %v1009_v51 = vpop.xlane.xlu1 %1008 }
 0x682   : > { %1883 = vrcp.f32 %v1009_v51 }
 0x683   : > { %1885 = vrcp.f32 %v1125_v46 }
 0x685   : > { %v1014_v52 = vpop.permute.xlu1 %1013 }
 0x686   : > { %v1019_v53 = vsel %vm789_vm3, %v1014_v52, 0  ;;  %v1618_v52 = vld [vmem:[%s2615_s11] ss:$0 sm:$0xff] }
 0x687   : > { %1703 = vmatpush3.bf16.msra.mxu0 %v1019_v53 }
 0x688   : > { %1714 = vmatprep.subr.bf16.mxu0 %v2116_v8 }
 0x689   : > { %v1130_v56 = vpop.permute.xlu1 %1129 }
 0x68a   : > { %v1135_v59 = vsel %vm789_vm3, %v1130_v56, 0  ;;  %v1861_v56 = vld [vmem:[%s2618_s14] sm:$0xff]  }
 0x68c   : > { %v1884_v54 = vpop.eup %1883 }
 0x68d   : > { %v1011_v55 = vmul.f32 %v1884_v54, %v1878_v37  ;;  %v1886_v58 = vpop.eup %1885 }
 0x68e   : > { %v1127_v60 = vmul.f32 %v1886_v58, %v1876_v33  ;;  %v1863_v58 = vld [vmem:[%s2618_s14 + $0x10] sm:$0xff]  }
 0x68f   : > { %v1012_v57 = vpack.c.bf16 %v1011_v55, %v1011_v55 }
 0x690   : > { %v1128_v61 = vpack.c.bf16 %v1127_v60, %v1127_v60  ;;  %v1619_v60 = vld [vmem:[%s2617_s13] ss:$0 sm:$0xff] }
 0x691   : > { %1705 = vmatmul.mubr.msk.bf16.vlgmr.msra.gmra.mrb[12].mxu0 %vm724_vm2, %v1012_v57  ;;  %v1862_v57 = vld [vmem:[%s2618_s14 + $0x8] sm:$0xff]  }
 0x692   : > { %1715 = vmatpush3.bf16.msra.mxu0 %v1135_v59  ;;  %1716 = vmatprep.mubr.msk.bf16.mxu0 %vm2117_vm1, %v2116_v8  ;;  %v1864_v59 = vld [vmem:[%s2618_s14 + $0x18] sm:$0xff]  }
 0x693   : > { %1728 = vmatprep.subr.bf16.mxu0 %v2116_v8 }
 0x699   : > { %1717 = vmatmul.mubr.msk.bf16.vlgmr.msra.gmra.mrb[16].mxu0 %vm724_vm2, %v1128_v61 }
 0x69a   : > { %1732 = vmatprep.mubr.msk.bf16.mxu0 %vm2117_vm1, %v2116_v8  ;;  %1729 = vmatpush3.bf16.msra.mxu0 %v1859_v45 }
 0x69b   : > { %1730 = vmatprep.subr.bf16.mxu0 %v2116_v8 }
 0x72f   : > { %v827_v62 = vpop.f32.mrb[4].mxu0 }
 0x730   : > { %833 = vst.msk [vmem:[#allocation2] sm:$0xff] %vm724_vm2, %v827_v62  ;;  %v1682_v63 = vpop.f32.mrb[5].mxu0 }
 0x731   : > { %v830_v1 = vpop.f32.mrb[6].mxu0 }
 0x732   : > { %v1683_v2 = vpop.f32.mrb[7].mxu0 }
 0x740   : > { %v939_v3 = vpop.f32.mrb[8].mxu0 }
 0x741   : > { %946 = vrot.lane.b32.xlu1 %v939_v3, %s2130_s15  ;;  %v1694_v4 = vpop.f32.mrb[9].mxu0  ;;  %s575_s15 = scalar_lea.vmem [#allocation12], %s1594_s19  ;;  %s2039_s19 = sshll.u32 %s2133_s26, 4  ;;  %s2040_s19 = int_to_ptr.vmem [resolvable:$false] %s2039_s19 }
 0x742   : > { %v942_v5 = vpop.f32.mrb[10].mxu0  ;;  %s1471_s0 = sshll.u32 %s575_s15, 4  ;;  %s2041_s5 = scalar_lea.vmem %s2040_s19, 256  ;;  %s2563_s0 = int_to_ptr.vmem [resolvable:$true] %s1471_s0 }
 0x743   : > { %v1695_v6 = vpop.f32.mrb[11].mxu0  ;;  %s2035_s29 = scalar_lea.vmem %s2563_s0, 128  ;;  %p2042_p8 = scmp.lt.s32.totalorder %s2563_s0, %s2040_s19 }
 0x744   : > { %p2036_p2 = scmp.ne.s32.totalorder %s2563_s0, %s2035_s29  ;;  %p2043_p11 = scmp.lt.s32.totalorder %s2041_s5, %s2035_s29 }
 0x746   : > { %p2037_p4 = pnand %p2036_p2, %p2662_p3  ;;  %p2044_p13 = por %p2043_p11, %p2042_p8 }
 0x748   : > { %p2038_p7 = pneg %p2037_p4 }
 0x74a   : > { %p2045_p1 = pnand %p2044_p13, %p2038_p7 }
 0x764   : > { %v1055_v10 = vpop.f32.mrb[12].mxu0 }
 0x765   : > { %1062 = vrot.lane.b32.xlu0 %v1055_v10, %s2131_s17  ;;  %v1706_v11 = vpop.f32.mrb[13].mxu0  ;;  %s2661_s17 = smov %s2660_s24 }
 0x766   : > { %v1058_v12 = vpop.f32.mrb[14].mxu0 }
 0x767   : > { %v1707_v13 = vpop.f32.mrb[15].mxu0 }
 0x76c   : > { %v1171_v14 = vpop.f32.mrb[16].mxu0 }
 0x76d   : > { %1178 = vrot.lane.b32.xlu1 %v1171_v14, %s2132_s18  ;;  %v1718_v15 = vpop.f32.mrb[17].mxu0  ;;  %s2561_s18 = scalar_lea.hbm %s2660_s24, %s1631_s28 }
 0x76e   : > { %v1174_v16 = vpop.f32.mrb[18].mxu0 }
 0x76f   : > { %v1719_v17 = vpop.f32.mrb[19].mxu0 }
 0x7b3   : > { %v947_v18 = vpop.permute.xlu1 %946 }
 0x7b4   : > { %950 = vst.msk [vmem:[#allocation2] sm:$0xff] %vm949_vm4, %v947_v18 }
 0x7d7   : > { %v1063_v19 = vpop.permute.xlu0 %1062 }
 0x7d8   : > { %1066 = vst.msk [vmem:[#allocation2] sm:$0xff] %vm1065_vm5, %v1063_v19 }
 0x7df   : > { %v1179_v20 = vpop.permute.xlu1 %1178 }
 0x7e0   : > { %1182 = vst.msk [vmem:[#allocation2] sm:$0xff] %vm1181_vm6, %v1179_v20 }
 0x7e7   : > { %v1183_v21 = vld [vmem:[#allocation2] sm:$0xff] }
 0x7e8   : > { %v1184_v23 = vpack.c.bf16 %v1183_v21, %v1183_v21 }
 0x7ea   : > { %1725 = vmatmul.mubr.msk.bf16.vlgmr.msra.gmra.mrb[16].mxu1 %vm584_vm0, %v1184_v23 }
 0x7eb   : > { %1744 = vmatprep.mubr.msk.bf16.mxu1 %vm2117_vm1, %v2116_v8  ;;  %1737 = vmatpush3.bf16.msra.mxu1 %v1861_v56 }
 0x7ec   : > { %1738 = vmatprep.subr.bf16.mxu1 %v2116_v8 }
 0x7ef   : > { %1739 = vmatpush3.bf16.msra.mxu1 %v1862_v57 }
 0x7f0   : > { %1740 = vmatprep.subr.bf16.mxu1 %v2116_v8 }
 0x7f3   : > { %1741 = vmatpush3.bf16.msra.mxu1 %v1863_v58 }
 0x7f4   : > { %1742 = vmatprep.subr.bf16.mxu1 %v2116_v8 }
 0x7f7   : > { %1743 = vmatpush3.bf16.msra.mxu1 %v1864_v59 }
 0x8bd   : > { %v1245_v25 = vpop.f32.mrb[16].mxu1 }
 0x8be   : > { %v1246_v26 = vadd.f32 %v1612_v24, %v1245_v25  ;;  %v1726_v27 = vpop.f32.mrb[17].mxu1 }
 0x8bf   : > { %v1248_v28 = vpop.f32.mrb[18].mxu1 }
 0x8c0   : > { %v1727_v29 = vpop.f32.mrb[19].mxu1  ;;  %v1252_v30 = vmul.f32 %v1246_v26, %v1246_v26 }
 0x8c2   : > { %v1253_v31 = vsel %vm584_vm0, %v1252_v30, 0.0 }
 0x8c3   : > { %1254 = vadd.xlane.f32.xlu0 %v1253_v31 }
 0x950   : > { %v1255_v32 = vpop.xlane.xlu0 %1254 }
 0x951   : > { %v1256_v33 = vmax.f32 %v1255_v32, 1e-24 }
 0x953   : > { %1887 = vrsqrt.f32 %v1256_v33 }
 0x95d   : > { %v1888_v34 = vpop.eup %1887 }
 0x95e   : > { %v1258_v36 = vmul.f32 %v1888_v34, %v1246_v26 }
 0x960   : > { %v1265_v37 = vmul.f32 %v1616_v35, %v1258_v36 }
 0x962   : > { %v1266_v38 = vmul.f32 5.656854, %v1265_v37 }
 0x964   : > { %v2514_v22 = vadd.f32 %v1266_v38, %v2411_v0  ;;  %v1860_v0 = vld [vmem:[%s2616_s12 + $0x8] sm:$0xff]  }
 0x965   : > { %1731 = vmatpush3.bf16.msra.mxu0 %v1860_v0 }
 0x966   : > { %v1270_v39 = vsel %vm584_vm0, %v2514_v22, 0.0 }
 0x967   : > { %1271 = vadd.xlane.f32.xlu1 %v1270_v39 }
 0x9f4   : > { %v1272_v40 = vpop.xlane.xlu1 %1271 }
 0x9f5   : > { %v1273_v41 = vmul.f32 0.03125, %v1272_v40 }
 0x9f7   : > { %v1274_v42 = vsub.f32 %v2514_v22, %v1273_v41 }
 0x9f9   : > { %v1275_v43 = vmul.f32 %v1274_v42, %v1274_v42 }
 0x9fb   : > { %v1276_v44 = vsel %vm584_vm0, %v1275_v43, 0.0 }
 0x9fc   : > { %1277 = vadd.xlane.f32.xlu0 %v1276_v44 }
 0xa89   : > { %v1278_v46 = vpop.xlane.xlu0 %1277 }
 0xa8a   : > { %v1279_v47 = vmul.f32 0.03125, %v1278_v46 }
 0xa8c   : > { %v1280_v48 = vadd.f32 1e-06, %v1279_v47 }
 0xa8e   : > { %1889 = vrsqrt.f32 %v1280_v48 }
 0xa98   : > { %v1890_v49 = vpop.eup %1889 }
 0xa99   : > { %v1282_v51 = vmul.f32 %v1890_v49, %v1274_v42 }
 0xa9b   : > { %v1289_v53 = vmul.f32 %v1617_v50, %v1282_v51 }
 0xa9d   : > { %v1296_v54 = vadd.f32 %v1618_v52, %v1289_v53 }
 0xa9f   : > { %v1297_v55 = vpack.c.bf16 %v1296_v54, %v1296_v54 }
 0xaa1   : > { %1733 = vmatmul.mubr.msk.bf16.vlgmr.msra.gmra.mrb[20].mxu0 %vm584_vm0, %v1297_v55 }
 0xb74   : > { %v1358_v61 = vpop.f32.mrb[20].mxu0 }
 0xb75   : > { %v1359_v62 = vadd.f32 %v1619_v60, %v1358_v61  ;;  %v1734_v63 = vpop.f32.mrb[21].mxu0 }
 0xb76   : > { %v1361_v1 = vpop.f32.mrb[22].mxu0 }
 0xb77   : > { %v1623_v2 = vmul.f32 -1.442695, %v1359_v62  ;;  %v1735_v3 = vpop.f32.mrb[23].mxu0 }
 0xb79   : > { %1891 = vpow2.f32 %v1623_v2 }
 0xb83   : > { %v1892_v4 = vpop.eup %1891 }
 0xb84   : > { %v1367_v8 = vadd.f32 1.0, %v1892_v4 }
 0xb86   : > { %1893 = vrcp.f32 %v1367_v8 }
 0xb90   : > { %v1894_v5 = vpop.eup %1893 }
 0xb91   : > { %v1370_v6 = vmul.f32 %v1894_v5, %v1359_v62 }
 0xb93   : > { %v1371_v7 = vpack.c.bf16 %v1370_v6, %v1370_v6 }
 0xb95   : > { %1745 = vmatmul.mubr.msk.bf16.vlgmr.msra.gmra.mrb[20].mxu1 %vm1411_vm7, %v1371_v7 }
 0xc68   : > { %v1449_v10 = vpop.f32.mrb[20].mxu1 }
 0xc69   : > { %v1450_v11 = vadd.f32 %v1624_v9, %v1449_v10  ;;  %v1746_v12 = vpop.f32.mrb[21].mxu1 }
 0xc6a   : > { %v1452_v13 = vpop.f32.mrb[22].mxu1 }
 0xc6b   : > { %v1455_v14 = vadd.f32 %v1450_v11, %v2514_v22  ;;  %v1747_v15 = vpop.f32.mrb[23].mxu1 }
 0xc6d   : > { %1456 = vst.msk [vmem:[%s575_s15] sm:$0xff] %vm584_vm0, %v1455_v14 }
 0xc6e   : > { %2048 = shalt.err (!%p2045_p1)
}
 0xc6f   : > { %s2049_s30 = scalar_lea.hbm %s2561_s18, 128  ;;  %s2053_s28 = scalar_lea.hbm %s2661_s17, 256 }
 0xc70   : > { %p2050_p0 = scmp.ne.s32.totalorder %s2561_s18, %s2049_s30  ;;  %p2054_p9 = scmp.lt.u32.totalorder %s2561_s18, %s2661_s17 }
 0xc71   : > { %p2055_p12 = scmp.lt.u32.totalorder %s2053_s28, %s2049_s30  ;;  %p2057_p2 = scmp.lt.u32.totalorder %s2049_s30, %s2561_s18 }
 0xc72   : > { %p2051_p6 = pnand %p2050_p0, %p2662_p3 }
 0xc73   : > { %p2056_p10 = por %p2055_p12, %p2054_p9 }
 0xc74   : > { %p2052_p5 = pneg %p2051_p6 }
 0xc75   : > { %p2058_p4 = por %p2057_p2, %p2056_p10 }
 0xc77   : > { %p2059_p7 = pnand %p2058_p4, %p2052_p5 }
 0xc79   : > { %2062 = shalt.err (!%p2059_p7)
}
 0xc7a   : > { %1768 = dma.vmem_to_hbm [thread:$0]  (%p2662_p3), %s2563_s0, 128, %s2561_s18, %s1458_s25  }
 0xc7b PF: > { %s2663_s16 = sld [smem:[#allocation19_spill]]  ;;  %s2664_s24 = sld [smem:[#allocation17_spill]] }
 0xc7c   : > { %s2665_s29 = sld [smem:[#allocation23_spill]] }
 0xc81   : > { %p1800_p8 = scmp.ge.s32.totalorder %s2663_s16, 2  ;;  %s1483_s26 = sand.u32 1, %s2664_s24  }
 0xc82   : > { %p2666_p11 = scmp.ne.s32.totalorder %s2665_s29, 0  ;;  %s1484_s19 = scalar_lea.sflag [#allocation5], %s1483_s26 }
 0xc84   : > { %p1787_p13 = pnand %p1800_p8, %p2666_p11 }
 0xc86   : > { %2092 = dma.done.wait (!%p1787_p13), %s1484_s19, 128  }
 0xc87   : > { %2094 = vsyncadd (!%p1787_p13), %s1484_s19, 4294967168  ;;  %s2667_s24 = sld [smem:[#allocation20_spill]]  ;;  %s2668_s5 = sld [smem:[#allocation18_spill]] }
 0xc88   : > { %s2669_s23 = sld [smem:[#allocation21_spill]]  ;;  %s2670_s21 = smov %s2101_s22 }
 0xc8d   : > { %p29_p1 = scmp.ge.s32.totalorder %s2667_s24, 4   ;;  %s2671_s22 = smov %s2668_s5 }
 0xc8f   :  { %31 = sbr.rel (!%p29_p1) target bundleno = 11 (0xb), region = 140 }
 0xc96   :  { %1489 = vsyncpa [#allocation4], 1 }
 0xc97   :  { %1491 = vsyncpa [#allocation4 + $0x1], 1 }
 0xc98   :  { %1492 = vsyncpa [#allocation7], 1 }
 0xc99   :  { %1493 = vsyncpa [#allocation10], 1 }
 0xc9a   :  { %1494 = vsyncpa [#allocation5], 1 }
 0xc9b   :  { %1496 = vsyncpa [#allocation5 + $0x1], 1 }

</bundles_post_ra>
